<compile_context>
chip_gen: v7x
topology: tpu7x:2x2x1
jax: 0.10.0
libtpu: 0.0.40
codegen_flags: <defaults>
</compile_context>

<pallas_src>
import jax
import jax.numpy as jnp
from jax import lax
from jax.experimental import pallas as pl
from jax.experimental.pallas import tpu as pltpu


def _round_up(x, m):
    return ((x + m - 1) // m) * m


def _pick_tile(n, candidates):
    for c in candidates:
        if n % c == 0:
            return c
    return n


# ----------------------------------------------------------------------------
# Tiled linear kernel: out = x @ w + b   (bf16 operands, f32 accumulation).
# Used to hoist the input-to-hidden GRU matmul out of the recurrence.
# ----------------------------------------------------------------------------
def _linear_kernel(x_ref, w_ref, b_ref, o_ref):
    o_ref[...] = (
        jnp.dot(x_ref[...], w_ref[...], preferred_element_type=jnp.float32)
        + b_ref[...]
    )


def linear(x, w, b):
    """x: (N, K) bf16, w: (K, D) bf16, b: (1, D) f32 -> (N, D) f32."""
    N, K = x.shape
    D = w.shape[1]
    tn = _pick_tile(N, (256, 128, 64, 32, 16, 8))
    td = _pick_tile(D, (256, 128))
    return pl.pallas_call(
        _linear_kernel,
        out_shape=jax.ShapeDtypeStruct((N, D), jnp.float32),
        grid_spec=pltpu.PrefetchScalarGridSpec(
            num_scalar_prefetch=0,
            grid=(N // tn, D // td),
            in_specs=[
                pl.BlockSpec((tn, K), lambda i, j: (i, 0)),
                pl.BlockSpec((K, td), lambda i, j: (0, j)),
                pl.BlockSpec((1, td), lambda i, j: (0, j)),
            ],
            out_specs=pl.BlockSpec((tn, td), lambda i, j: (i, j)),
        ),
        compiler_params=pltpu.CompilerParams(
            dimension_semantics=("parallel", "parallel"),
        ),
    )(x, w, b)


# ----------------------------------------------------------------------------
# GRU recurrence kernels.  Gate order [r, z, n] (PyTorch nn.GRU convention);
# gi = x @ W_ih + b_ih is precomputed outside (hoisted), only gh = h @ W_hh
# stays inside the sequential loop.  Gates live in 128-wide lane-aligned slabs.
# ----------------------------------------------------------------------------
def _gru_cell(gi, gh, h, Hp):
    r = jax.nn.sigmoid(gi[:, :Hp] + gh[:, :Hp])
    z = jax.nn.sigmoid(gi[:, Hp:2 * Hp] + gh[:, Hp:2 * Hp])
    n = jnp.tanh(gi[:, 2 * Hp:] + r * gh[:, 2 * Hp:])
    return (1.0 - z) * n + z * h


def _gru_encoder_kernel(gi_ref, whh_ref, bhh_ref, h_last_ref):
    """Runs the full recurrence in one kernel; emits only the last hidden state."""
    T, b_tile, _ = gi_ref.shape
    Hp = whh_ref.shape[0]
    whh = whh_ref[...]                                        # (Hp, 3Hp) bf16, resident
    bhh = jnp.broadcast_to(bhh_ref[...], (b_tile, 3 * Hp))    # hoisted broadcast

    def step(t, h):
        gi = gi_ref[t]                                        # (b_tile, 3Hp) f32
        gh = jnp.dot(h.astype(jnp.bfloat16), whh,
                     preferred_element_type=jnp.float32) + bhh
        return _gru_cell(gi, gh, h, Hp)

    h0 = jnp.zeros((b_tile, Hp), jnp.float32)
    h_last_ref[...] = lax.fori_loop(0, T, step, h0, unroll=(T <= 32))


def _gru_decoder_kernel(gi_ref, whh_ref, bhh_ref, h0_ref, wout_ref, bout_ref,
                        logits_ref):
    """Decoder recurrence with the vocab projection fused into each step."""
    T, b_tile, _ = gi_ref.shape
    Hp = whh_ref.shape[0]
    Vp = wout_ref.shape[1]
    whh = whh_ref[...]                                        # (Hp, 3Hp) bf16
    wout = wout_ref[...]                                      # (Hp, Vp)  bf16
    bhh = jnp.broadcast_to(bhh_ref[...], (b_tile, 3 * Hp))
    bout = jnp.broadcast_to(bout_ref[...], (b_tile, Vp))

    def step(t, h):
        gi = gi_ref[t]
        gh = jnp.dot(h.astype(jnp.bfloat16), whh,
                     preferred_element_type=jnp.float32) + bhh
        h_new = _gru_cell(gi, gh, h, Hp)
        # Fused projection: decoder hidden states never hit HBM.
        logits_ref[t] = jnp.dot(h_new.astype(jnp.bfloat16), wout,
                                preferred_element_type=jnp.float32) + bout
        return h_new

    lax.fori_loop(0, T, step, h0_ref[...], unroll=(T <= 32))


def gru_encoder_last_state(gi, w_hh, b_hh, *, b_tile=None):
    """gi: (T, Bp, 3Hp) f32 -> last hidden state (Bp, Hp) f32."""
    T, Bp, G = gi.shape
    Hp = w_hh.shape[0]
    b_tile = Bp if b_tile is None else b_tile                 # batch-parallel grid
    return pl.pallas_call(
        _gru_encoder_kernel,
        out_shape=jax.ShapeDtypeStruct((Bp, Hp), jnp.float32),
        grid_spec=pltpu.PrefetchScalarGridSpec(
            num_scalar_prefetch=0,
            grid=(Bp // b_tile,),
            in_specs=[
                pl.BlockSpec((T, b_tile, G), lambda b: (0, b, 0)),
                pl.BlockSpec((Hp, G), lambda b: (0, 0)),
                pl.BlockSpec((1, G), lambda b: (0, 0)),
            ],
            out_specs=pl.BlockSpec((b_tile, Hp), lambda b: (b, 0)),
        ),
        compiler_params=pltpu.CompilerParams(
            dimension_semantics=("parallel",),
        ),
    )(gi, w_hh, b_hh)


def gru_decoder_logits(gi, w_hh, b_hh, h0, w_out, b_out, *, b_tile=None):
    """gi: (T, Bp, 3Hp) f32, h0: (Bp, Hp) -> logits (T, Bp, Vp) f32."""
    T, Bp, G = gi.shape
    Hp = w_hh.shape[0]
    Vp = w_out.shape[1]
    b_tile = Bp if b_tile is None else b_tile
    return pl.pallas_call(
        _gru_decoder_kernel,
        out_shape=jax.ShapeDtypeStruct((T, Bp, Vp), jnp.float32),
        grid_spec=pltpu.PrefetchScalarGridSpec(
            num_scalar_prefetch=0,
            grid=(Bp // b_tile,),
            in_specs=[
                pl.BlockSpec((T, b_tile, G), lambda b: (0, b, 0)),
                pl.BlockSpec((Hp, G), lambda b: (0, 0)),
                pl.BlockSpec((1, G), lambda b: (0, 0)),
                pl.BlockSpec((b_tile, Hp), lambda b: (b, 0)),
                pl.BlockSpec((Hp, Vp), lambda b: (0, 0)),
                pl.BlockSpec((1, Vp), lambda b: (0, 0)),
            ],
            out_specs=pl.BlockSpec((T, b_tile, Vp), lambda b: (0, b, 0)),
        ),
        compiler_params=pltpu.CompilerParams(
            dimension_semantics=("parallel",),
        ),
    )(gi, w_hh, b_hh, h0, w_out, b_out)


# ----------------------------------------------------------------------------
# Parameters (logical PyTorch-like shapes, weights pre-transposed to (in, 3H)).
# ----------------------------------------------------------------------------
def init_params(key, vocab_size, hidden):
    ks = jax.random.split(key, 12)
    s = 0.1

    def mat(k, shape):
        return jax.random.normal(k, shape, dtype=jnp.float32) * s

    return {
        "enc_embed": mat(ks[0], (vocab_size, hidden)),
        "enc_w_ih": mat(ks[1], (hidden, 3 * hidden)),
        "enc_w_hh": mat(ks[2], (hidden, 3 * hidden)),
        "enc_b_ih": mat(ks[3], (1, 3 * hidden)),
        "enc_b_hh": mat(ks[4], (1, 3 * hidden)),
        "dec_embed": mat(ks[5], (vocab_size, hidden)),
        "dec_w_ih": mat(ks[6], (hidden, 3 * hidden)),
        "dec_w_hh": mat(ks[7], (hidden, 3 * hidden)),
        "dec_b_ih": mat(ks[8], (1, 3 * hidden)),
        "dec_b_hh": mat(ks[9], (1, 3 * hidden)),
        "out_w": mat(ks[10], (hidden, vocab_size)),
        "out_b": mat(ks[11], (1, vocab_size)),
    }


def pack_params(params, hidden, vocab):
    """Zero-pad to lane-dense shapes; per-gate 128-aligned slabs; bf16 matmul weights."""
    H, V = hidden, vocab
    Hp = _round_up(H, 128)
    Vp = _round_up(V, 128)

    def pad_gate_mat(w):   # (H, 3H) -> (Hp, 3Hp), each gate in its own Hp slab
        blocks = [jnp.pad(w[:, g * H:(g + 1) * H],
                          ((0, Hp - H), (0, Hp - H))) for g in range(3)]
        return jnp.concatenate(blocks, axis=1).astype(jnp.bfloat16)

    def pad_gate_bias(b):  # (1, 3H) -> (1, 3Hp)
        blocks = [jnp.pad(b[:, g * H:(g + 1) * H],
                          ((0, 0), (0, Hp - H))) for g in range(3)]
        return jnp.concatenate(blocks, axis=1).astype(jnp.float32)

    packed = {
        "enc_embed": jnp.pad(params["enc_embed"], ((0, 0), (0, Hp - H))),
        "dec_embed": jnp.pad(params["dec_embed"], ((0, 0), (0, Hp - H))),
        "enc_w_ih": pad_gate_mat(params["enc_w_ih"]),
        "enc_w_hh": pad_gate_mat(params["enc_w_hh"]),
        "enc_b_ih": pad_gate_bias(params["enc_b_ih"]),
        "enc_b_hh": pad_gate_bias(params["enc_b_hh"]),
        "dec_w_ih": pad_gate_mat(params["dec_w_ih"]),
        "dec_w_hh": pad_gate_mat(params["dec_w_hh"]),
        "dec_b_ih": pad_gate_bias(params["dec_b_ih"]),
        "dec_b_hh": pad_gate_bias(params["dec_b_hh"]),
        "out_w": jnp.pad(params["out_w"],
                         ((0, Hp - H), (0, Vp - V))).astype(jnp.bfloat16),
        "out_b": jnp.pad(params["out_b"],
                         ((0, 0), (0, Vp - V))).astype(jnp.float32),
    }
    return packed, Hp, Vp


# ----------------------------------------------------------------------------
# Seq2seq forward (teacher forcing over targets, like the reference module).
# ----------------------------------------------------------------------------
def make_seq2seq_forward(params, hidden, vocab):
    packed, Hp, Vp = pack_params(params, hidden, vocab)

    def _gi(embed_table, w_ih, b_ih, tokens, Bp):
        # TODO(synk): token-id embedding gather stays in plain JAX (no clean
        # rectangular-tile BlockSpec for a gather at this scale).
        B, T = tokens.shape
        emb = jnp.take(embed_table, tokens.T, axis=0)          # (T, B, Hp) f32
        emb = jnp.pad(emb, ((0, 0), (0, Bp - B), (0, 0)))      # (T, Bp, Hp)
        gi = linear(emb.reshape(T * Bp, Hp).astype(jnp.bfloat16), w_ih, b_ih)
        return gi.reshape(T, Bp, 3 * Hp)                       # hoisted ih matmul

    @jax.jit
    def forward(inputs, targets):
        B = inputs.shape[0]
        Bp = _round_up(max(B, 8), 8)

        # ---- Encoder: only the last hidden state is needed downstream. ----
        gi_enc = _gi(packed["enc_embed"], packed["enc_w_ih"],
                     packed["enc_b_ih"], inputs, Bp)
        h_enc = gru_encoder_last_state(gi_enc, packed["enc_w_hh"],
                                       packed["enc_b_hh"])

        # ---- Decoder with fused vocab projection. ----
        gi_dec = _gi(packed["dec_embed"], packed["dec_w_ih"],
                     packed["dec_b_ih"], targets, Bp)
        logits_tm = gru_decoder_logits(gi_dec, packed["dec_w_hh"],
                                       packed["dec_b_hh"], h_enc,
                                       packed["out_w"], packed["out_b"])
        # (T_tgt, Bp, Vp) -> (B, T_tgt, V)
        # TODO(synk): emitting batch-major directly from the kernel would need a
        # dynamic second-minor store; kept time-major + one small XLA transpose.
        return jnp.transpose(logits_tm[:, :B, :vocab], (1, 0, 2))

    return forward


# ----------------------------------------------------------------------------
# Pure-JAX reference (f32) for correctness checking.
# ----------------------------------------------------------------------------
def reference_forward(params, inputs, targets):
    H = params["enc_embed"].shape[1]
    B = inputs.shape[0]

    def run_gru(emb_tm, w_ih, w_hh, b_ih, b_hh, h):
        states = []
        for t in range(emb_tm.shape[0]):
            gi = emb_tm[t] @ w_ih + b_ih
            gh = h @ w_hh + b_hh
            r = jax.nn.sigmoid(gi[:, :H] + gh[:, :H])
            z = jax.nn.sigmoid(gi[:, H:2 * H] + gh[:, H:2 * H])
            n = jnp.tanh(gi[:, 2 * H:] + r * gh[:, 2 * H:])
            h = (1.0 - z) * n + z * h
            states.append(h)
        return jnp.stack(states), h

    enc_emb = jnp.take(params["enc_embed"], inputs.T, axis=0)
    _, h_last = run_gru(enc_emb, params["enc_w_ih"], params["enc_w_hh"],
                        params["enc_b_ih"], params["enc_b_hh"],
                        jnp.zeros((B, H), jnp.float32))
    dec_emb = jnp.take(params["dec_embed"], targets.T, axis=0)
    dec_states, _ = run_gru(dec_emb, params["dec_w_ih"], params["dec_w_hh"],
                            params["dec_b_ih"], params["dec_b_hh"], h_last)
    logits = dec_states @ params["out_w"] + params["out_b"]     # (T, B, V)
    return jnp.transpose(logits, (1, 0, 2))


if __name__ == "__main__":
    VOCAB = 16
    HIDDEN = 32
    B = 2
    T_IN = 8
    T_TGT = 8

    key = jax.random.PRNGKey(0)
    k_params, k_in, k_tgt = jax.random.split(key, 3)

    params = init_params(k_params, VOCAB, HIDDEN)
    inputs = jax.random.randint(k_in, (B, T_IN), 0, VOCAB, dtype=jnp.int32)
    targets = jax.random.randint(k_tgt, (B, T_TGT), 0, VOCAB, dtype=jnp.int32)

    forward = make_seq2seq_forward(params, HIDDEN, VOCAB)
    out = jax.block_until_ready(forward(inputs, targets))

    assert out.shape == (B, T_TGT, VOCAB), out.shape
    assert bool(jnp.all(jnp.isfinite(out)))

    ref = reference_forward(params, inputs, targets)
    max_err = float(jnp.max(jnp.abs(out - ref)))
    assert max_err < 2e-2, f"max abs error vs reference: {max_err}"

    print("KERNEL_OK")
</pallas_src>

<mosaic_0001>
module attributes {stable_mosaic.version = 11 : i64} {
  func.func @_linear_kernel(%arg0: i32, %arg1: i32, %arg2: memref<64x128xbf16, #tpu.memory_space<vmem>>, %arg3: memref<128x128xbf16, #tpu.memory_space<vmem>>, %arg4: memref<1x128xf32, #tpu.memory_space<vmem>>, %arg5: memref<64x128xf32, #tpu.memory_space<vmem>>) attributes {dimension_semantics = [#tpu.dimension_semantics<parallel>, #tpu.dimension_semantics<parallel>], iteration_bounds = array<i64: 1, 3>, scalar_prefetch = 0 : i64, scratch_operands = 0 : i64, tpu.core_type = #tpu.core_type<tc>, window_params = [{transform_indices = @transform_0, window_bounds = array<i64: 64, 128>}, {transform_indices = @transform_1, window_bounds = array<i64: 128, 128>}, {transform_indices = @transform_2, window_bounds = array<i64: 1, 128>}, {transform_indices = @transform_3, window_bounds = array<i64: 64, 128>}]} {
    %c0 = arith.constant 0 : index
    %c0_0 = arith.constant 0 : index
    %0 = vector.load %arg2[%c0, %c0_0] : memref<64x128xbf16, #tpu.memory_space<vmem>>, vector<64x128xbf16>
    %c0_1 = arith.constant 0 : index
    %c0_2 = arith.constant 0 : index
    %1 = vector.load %arg3[%c0_1, %c0_2] : memref<128x128xbf16, #tpu.memory_space<vmem>>, vector<128x128xbf16>
    %cst = arith.constant dense<0.000000e+00> : vector<64x128xf32>
    %2 = tpu.matmul %0, %1, %cst {dimension_numbers = #tpu.dot_dimension_numbers<[1], [0], [0], [1], [0, 0, 1, 1], [], []>} : vector<64x128xbf16>, vector<128x128xbf16>, vector<64x128xf32> -> vector<64x128xf32>
    %c0_3 = arith.constant 0 : index
    %c0_4 = arith.constant 0 : index
    %3 = vector.load %arg4[%c0_3, %c0_4] : memref<1x128xf32, #tpu.memory_space<vmem>>, vector<1x128xf32>
    %4 = vector.broadcast %3 : vector<1x128xf32> to vector<64x128xf32>
    %5 = arith.addf %2, %4 : vector<64x128xf32>
    %c0_5 = arith.constant 0 : index
    %c0_6 = arith.constant 0 : index
    %6 = vector.load %arg5[%c0_5, %c0_6] : memref<64x128xf32, #tpu.memory_space<vmem>>, vector<64x128xf32>
    tpu.vector_store %arg5[%c0_5, %c0_6], %5 {strides = array<i32>} : memref<64x128xf32, #tpu.memory_space<vmem>>, vector<64x128xf32>,
    return
  }
  func.func @transform_0(%arg0: i32, %arg1: i32) -> (i32, i32) {
    %c0_i32 = arith.constant 0 : i32
    %c0_i32_0 = arith.constant 0 : i32
    return %arg0, %c0_i32 : i32, i32
  }
  func.func @transform_1(%arg0: i32, %arg1: i32) -> (i32, i32) {
    %c0_i32 = arith.constant 0 : i32
    %c0_i32_0 = arith.constant 0 : i32
    return %c0_i32, %arg1 : i32, i32
  }
  func.func @transform_2(%arg0: i32, %arg1: i32) -> (i32, i32) {
    %c0_i32 = arith.constant 0 : i32
    %c0_i32_0 = arith.constant 0 : i32
    return %c0_i32, %arg1 : i32, i32
  }
  func.func @transform_3(%arg0: i32, %arg1: i32) -> (i32, i32) {
    %c0_i32 = arith.constant 0 : i32
    return %arg0, %arg1 : i32, i32
  }
}

module attributes {stable_mosaic.version = 11 : i64} {
  func.func @_gru_encoder_kernel(%arg0: i32, %arg1: memref<8x8x384xf32, #tpu.memory_space<vmem>>, %arg2: memref<128x384xbf16, #tpu.memory_space<vmem>>, %arg3: memref<1x384xf32, #tpu.memory_space<vmem>>, %arg4: memref<8x128xf32, #tpu.memory_space<vmem>>) attributes {dimension_semantics = [#tpu.dimension_semantics<parallel>], iteration_bounds = array<i64: 1>, scalar_prefetch = 0 : i64, scratch_operands = 0 : i64, tpu.core_type = #tpu.core_type<tc>, window_params = [{transform_indices = @transform_0, window_bounds = array<i64: 8, 8, 384>}, {pipeline_mode = #tpu.pipeline_mode<synchronous>, transform_indices = @transform_1, window_bounds = array<i64: 128, 384>}, {pipeline_mode = #tpu.pipeline_mode<synchronous>, transform_indices = @transform_2, window_bounds = array<i64: 1, 384>}, {transform_indices = @transform_3, window_bounds = array<i64: 8, 128>}]} {
    %c0 = arith.constant 0 : index
    %c0_0 = arith.constant 0 : index
    %0 = vector.load %arg2[%c0, %c0_0] : memref<128x384xbf16, #tpu.memory_space<vmem>>, vector<128x384xbf16>
    %c0_1 = arith.constant 0 : index
    %c0_2 = arith.constant 0 : index
    %1 = vector.load %arg3[%c0_1, %c0_2] : memref<1x384xf32, #tpu.memory_space<vmem>>, vector<1x384xf32>
    %2 = vector.shape_cast %1 : vector<1x384xf32> to vector<1x384xf32>
    %3 = vector.broadcast %2 : vector<1x384xf32> to vector<8x384xf32>
    %cst = arith.constant 0.000000e+00 : f32
    %4 = vector.broadcast %cst : f32 to vector<8x128xf32>
    %c0_i32 = arith.constant 0 : i32
    %5 = arith.index_cast %c0_i32 : i32 to index
    %c0_3 = arith.constant 0 : index
    %c0_4 = arith.constant 0 : index
    %6 = vector.load %arg1[%5, %c0_3, %c0_4] : memref<8x8x384xf32, #tpu.memory_space<vmem>>, vector<1x8x384xf32>
    %7 = vector.shape_cast %6 : vector<1x8x384xf32> to vector<8x384xf32>
    %8 = arith.truncf %4 : vector<8x128xf32> to vector<8x128xbf16>
    %cst_5 = arith.constant dense<0.000000e+00> : vector<8x384xf32>
    %9 = tpu.matmul %8, %0, %cst_5 {dimension_numbers = #tpu.dot_dimension_numbers<[1], [0], [0], [1], [0, 0, 1, 1], [], []>} : vector<8x128xbf16>, vector<128x384xbf16>, vector<8x384xf32> -> vector<8x384xf32>
    %10 = arith.addf %9, %3 : vector<8x384xf32>
    %11 = vector.extract_strided_slice %7 {offsets = [0, 0], sizes = [8, 128], strides = [1, 1]} : vector<8x384xf32> to vector<8x128xf32>
    %12 = vector.extract_strided_slice %10 {offsets = [0, 0], sizes = [8, 128], strides = [1, 1]} : vector<8x384xf32> to vector<8x128xf32>
    %13 = arith.addf %11, %12 : vector<8x128xf32>
    %14 = arith.negf %13 : vector<8x128xf32>
    %15 = math.exp %14 : vector<8x128xf32>
    %cst_6 = arith.constant 1.000000e+00 : f32
    %16 = vector.broadcast %cst_6 : f32 to vector<8x128xf32>
    %17 = arith.addf %16, %15 : vector<8x128xf32>
    %18 = arith.divf %16, %17 : vector<8x128xf32>
    %19 = vector.extract_strided_slice %7 {offsets = [0, 128], sizes = [8, 128], strides = [1, 1]} : vector<8x384xf32> to vector<8x128xf32>
    %20 = vector.extract_strided_slice %10 {offsets = [0, 128], sizes = [8, 128], strides = [1, 1]} : vector<8x384xf32> to vector<8x128xf32>
    %21 = arith.addf %19, %20 : vector<8x128xf32>
    %22 = arith.negf %21 : vector<8x128xf32>
    %23 = math.exp %22 : vector<8x128xf32>
    %cst_7 = arith.constant 1.000000e+00 : f32
    %24 = vector.broadcast %cst_7 : f32 to vector<8x128xf32>
    %25 = arith.addf %24, %23 : vector<8x128xf32>
    %26 = arith.divf %24, %25 : vector<8x128xf32>
    %27 = vector.extract_strided_slice %7 {offsets = [0, 256], sizes = [8, 128], strides = [1, 1]} : vector<8x384xf32> to vector<8x128xf32>
    %28 = vector.extract_strided_slice %10 {offsets = [0, 256], sizes = [8, 128], strides = [1, 1]} : vector<8x384xf32> to vector<8x128xf32>
    %29 = arith.mulf %18, %28 : vector<8x128xf32>
    %30 = arith.addf %27, %29 : vector<8x128xf32>
    %31 = math.tanh %30 : vector<8x128xf32>
    %cst_8 = arith.constant 1.000000e+00 : f32
    %32 = vector.broadcast %cst_8 : f32 to vector<8x128xf32>
    %33 = arith.subf %32, %26 : vector<8x128xf32>
    %34 = arith.mulf %33, %31 : vector<8x128xf32>
    %35 = arith.mulf %26, %4 : vector<8x128xf32>
    %36 = arith.addf %34, %35 : vector<8x128xf32>
    %c1_i32 = arith.constant 1 : i32
    %37 = arith.index_cast %c1_i32 : i32 to index
    %c0_9 = arith.constant 0 : index
    %c0_10 = arith.constant 0 : index
    %38 = vector.load %arg1[%37, %c0_9, %c0_10] : memref<8x8x384xf32, #tpu.memory_space<vmem>>, vector<1x8x384xf32>
    %39 = vector.shape_cast %38 : vector<1x8x384xf32> to vector<8x384xf32>
    %40 = arith.truncf %36 : vector<8x128xf32> to vector<8x128xbf16>
    %cst_11 = arith.constant dense<0.000000e+00> : vector<8x384xf32>
    %41 = tpu.matmul %40, %0, %cst_11 {dimension_numbers = #tpu.dot_dimension_numbers<[1], [0], [0], [1], [0, 0, 1, 1], [], []>} : vector<8x128xbf16>, vector<128x384xbf16>, vector<8x384xf32> -> vector<8x384xf32>
    %42 = arith.addf %41, %3 : vector<8x384xf32>
    %43 = vector.extract_strided_slice %39 {offsets = [0, 0], sizes = [8, 128], strides = [1, 1]} : vector<8x384xf32> to vector<8x128xf32>
    %44 = vector.extract_strided_slice %42 {offsets = [0, 0], sizes = [8, 128], strides = [1, 1]} : vector<8x384xf32> to vector<8x128xf32>
    %45 = arith.addf %43, %44 : vector<8x128xf32>
    %46 = arith.negf %45 : vector<8x128xf32>
    %47 = math.exp %46 : vector<8x128xf32>
    %cst_12 = arith.constant 1.000000e+00 : f32
    %48 = vector.broadcast %cst_12 : f32 to vector<8x128xf32>
    %49 = arith.addf %48, %47 : vector<8x128xf32>
    %50 = arith.divf %48, %49 : vector<8x128xf32>
    %51 = vector.extract_strided_slice %39 {offsets = [0, 128], sizes = [8, 128], strides = [1, 1]} : vector<8x384xf32> to vector<8x128xf32>
    %52 = vector.extract_strided_slice %42 {offsets = [0, 128], sizes = [8, 128], strides = [1, 1]} : vector<8x384xf32> to vector<8x128xf32>
    %53 = arith.addf %51, %52 : vector<8x128xf32>
    %54 = arith.negf %53 : vector<8x128xf32>
    %55 = math.exp %54 : vector<8x128xf32>
    %cst_13 = arith.constant 1.000000e+00 : f32
    %56 = vector.broadcast %cst_13 : f32 to vector<8x128xf32>
    %57 = arith.addf %56, %55 : vector<8x128xf32>
    %58 = arith.divf %56, %57 : vector<8x128xf32>
    %59 = vector.extract_strided_slice %39 {offsets = [0, 256], sizes = [8, 128], strides = [1, 1]} : vector<8x384xf32> to vector<8x128xf32>
    %60 = vector.extract_strided_slice %42 {offsets = [0, 256], sizes = [8, 128], strides = [1, 1]} : vector<8x384xf32> to vector<8x128xf32>
    %61 = arith.mulf %50, %60 : vector<8x128xf32>
    %62 = arith.addf %59, %61 : vector<8x128xf32>
    %63 = math.tanh %62 : vector<8x128xf32>
    %cst_14 = arith.constant 1.000000e+00 : f32
    %64 = vector.broadcast %cst_14 : f32 to vector<8x128xf32>
    %65 = arith.subf %64, %58 : vector<8x128xf32>
    %66 = arith.mulf %65, %63 : vector<8x128xf32>
    %67 = arith.mulf %58, %36 : vector<8x128xf32>
    %68 = arith.addf %66, %67 : vector<8x128xf32>
    %c2_i32 = arith.constant 2 : i32
    %69 = arith.index_cast %c2_i32 : i32 to index
    %c0_15 = arith.constant 0 : index
    %c0_16 = arith.constant 0 : index
    %70 = vector.load %arg1[%69, %c0_15, %c0_16] : memref<8x8x384xf32, #tpu.memory_space<vmem>>, vector<1x8x384xf32>
    %71 = vector.shape_cast %70 : vector<1x8x384xf32> to vector<8x384xf32>
    %72 = arith.truncf %68 : vector<8x128xf32> to vector<8x128xbf16>
    %cst_17 = arith.constant dense<0.000000e+00> : vector<8x384xf32>
    %73 = tpu.matmul %72, %0, %cst_17 {dimension_numbers = #tpu.dot_dimension_numbers<[1], [0], [0], [1], [0, 0, 1, 1], [], []>} : vector<8x128xbf16>, vector<128x384xbf16>, vector<8x384xf32> -> vector<8x384xf32>
    %74 = arith.addf %73, %3 : vector<8x384xf32>
    %75 = vector.extract_strided_slice %71 {offsets = [0, 0], sizes = [8, 128], strides = [1, 1]} : vector<8x384xf32> to vector<8x128xf32>
    %76 = vector.extract_strided_slice %74 {offsets = [0, 0], sizes = [8, 128], strides = [1, 1]} : vector<8x384xf32> to vector<8x128xf32>
    %77 = arith.addf %75, %76 : vector<8x128xf32>
    %78 = arith.negf %77 : vector<8x128xf32>
    %79 = math.exp %78 : vector<8x128xf32>
    %cst_18 = arith.constant 1.000000e+00 : f32
    %80 = vector.broadcast %cst_18 : f32 to vector<8x128xf32>
    %81 = arith.addf %80, %79 : vector<8x128xf32>
    %82 = arith.divf %80, %81 : vector<8x128xf32>
    %83 = vector.extract_strided_slice %71 {offsets = [0, 128], sizes = [8, 128], strides = [1, 1]} : vector<8x384xf32> to vector<8x128xf32>
    %84 = vector.extract_strided_slice %74 {offsets = [0, 128], sizes = [8, 128], strides = [1, 1]} : vector<8x384xf32> to vector<8x128xf32>
    %85 = arith.addf %83, %84 : vector<8x128xf32>
    %86 = arith.negf %85 : vector<8x128xf32>
    %87 = math.exp %86 : vector<8x128xf32>
    %cst_19 = arith.constant 1.000000e+00 : f32
    %88 = vector.broadcast %cst_19 : f32 to vector<8x128xf32>
    %89 = arith.addf %88, %87 : vector<8x128xf32>
    %90 = arith.divf %88, %89 : vector<8x128xf32>
    %91 = vector.extract_strided_slice %71 {offsets = [0, 256], sizes = [8, 128], strides = [1, 1]} : vector<8x384xf32> to vector<8x128xf32>
    %92 = vector.extract_strided_slice %74 {offsets = [0, 256], sizes = [8, 128], strides = [1, 1]} : vector<8x384xf32> to vector<8x128xf32>
    %93 = arith.mulf %82, %92 : vector<8x128xf32>
    %94 = arith.addf %91, %93 : vector<8x128xf32>
    %95 = math.tanh %94 : vector<8x128xf32>
    %cst_20 = arith.constant 1.000000e+00 : f32
    %96 = vector.broadcast %cst_20 : f32 to vector<8x128xf32>
    %97 = arith.subf %96, %90 : vector<8x128xf32>
    %98 = arith.mulf %97, %95 : vector<8x128xf32>
    %99 = arith.mulf %90, %68 : vector<8x128xf32>
    %100 = arith.addf %98, %99 : vector<8x128xf32>
    %c3_i32 = arith.constant 3 : i32
    %101 = arith.index_cast %c3_i32 : i32 to index
    %c0_21 = arith.constant 0 : index
    %c0_22 = arith.constant 0 : index
    %102 = vector.load %arg1[%101, %c0_21, %c0_22] : memref<8x8x384xf32, #tpu.memory_space<vmem>>, vector<1x8x384xf32>
    %103 = vector.shape_cast %102 : vector<1x8x384xf32> to vector<8x384xf32>
    %104 = arith.truncf %100 : vector<8x128xf32> to vector<8x128xbf16>
    %cst_23 = arith.constant dense<0.000000e+00> : vector<8x384xf32>
    %105 = tpu.matmul %104, %0, %cst_23 {dimension_numbers = #tpu.dot_dimension_numbers<[1], [0], [0], [1], [0, 0, 1, 1], [], []>} : vector<8x128xbf16>, vector<128x384xbf16>, vector<8x384xf32> -> vector<8x384xf32>
    %106 = arith.addf %105, %3 : vector<8x384xf32>
    %107 = vector.extract_strided_slice %103 {offsets = [0, 0], sizes = [8, 128], strides = [1, 1]} : vector<8x384xf32> to vector<8x128xf32>
    %108 = vector.extract_strided_slice %106 {offsets = [0, 0], sizes = [8, 128], strides = [1, 1]} : vector<8x384xf32> to vector<8x128xf32>
    %109 = arith.addf %107, %108 : vector<8x128xf32>
    %110 = arith.negf %109 : vector<8x128xf32>
    %111 = math.exp %110 : vector<8x128xf32>
    %cst_24 = arith.constant 1.000000e+00 : f32
    %112 = vector.broadcast %cst_24 : f32 to vector<8x128xf32>
    %113 = arith.addf %112, %111 : vector<8x128xf32>
    %114 = arith.divf %112, %113 : vector<8x128xf32>
    %115 = vector.extract_strided_slice %103 {offsets = [0, 128], sizes = [8, 128], strides = [1, 1]} : vector<8x384xf32> to vector<8x128xf32>
    %116 = vector.extract_strided_slice %106 {offsets = [0, 128], sizes = [8, 128], strides = [1, 1]} : vector<8x384xf32> to vector<8x128xf32>
    %117 = arith.addf %115, %116 : vector<8x128xf32>
    %118 = arith.negf %117 : vector<8x128xf32>
    %119 = math.exp %118 : vector<8x128xf32>
    %cst_25 = arith.constant 1.000000e+00 : f32
    %120 = vector.broadcast %cst_25 : f32 to vector<8x128xf32>
    %121 = arith.addf %120, %119 : vector<8x128xf32>
    %122 = arith.divf %120, %121 : vector<8x128xf32>
    %123 = vector.extract_strided_slice %103 {offsets = [0, 256], sizes = [8, 128], strides = [1, 1]} : vector<8x384xf32> to vector<8x128xf32>
    %124 = vector.extract_strided_slice %106 {offsets = [0, 256], sizes = [8, 128], strides = [1, 1]} : vector<8x384xf32> to vector<8x128xf32>
    %125 = arith.mulf %114, %124 : vector<8x128xf32>
    %126 = arith.addf %123, %125 : vector<8x128xf32>
    %127 = math.tanh %126 : vector<8x128xf32>
    %cst_26 = arith.constant 1.000000e+00 : f32
    %128 = vector.broadcast %cst_26 : f32 to vector<8x128xf32>
    %129 = arith.subf %128, %122 : vector<8x128xf32>
    %130 = arith.mulf %129, %127 : vector<8x128xf32>
    %131 = arith.mulf %122, %100 : vector<8x128xf32>
    %132 = arith.addf %130, %131 : vector<8x128xf32>
    %c4_i32 = arith.constant 4 : i32
    %133 = arith.index_cast %c4_i32 : i32 to index
    %c0_27 = arith.constant 0 : index
    %c0_28 = arith.constant 0 : index
    %134 = vector.load %arg1[%133, %c0_27, %c0_28] : memref<8x8x384xf32, #tpu.memory_space<vmem>>, vector<1x8x384xf32>
    %135 = vector.shape_cast %134 : vector<1x8x384xf32> to vector<8x384xf32>
    %136 = arith.truncf %132 : vector<8x128xf32> to vector<8x128xbf16>
    %cst_29 = arith.constant dense<0.000000e+00> : vector<8x384xf32>
    %137 = tpu.matmul %136, %0, %cst_29 {dimension_numbers = #tpu.dot_dimension_numbers<[1], [0], [0], [1], [0, 0, 1, 1], [], []>} : vector<8x128xbf16>, vector<128x384xbf16>, vector<8x384xf32> -> vector<8x384xf32>
    %138 = arith.addf %137, %3 : vector<8x384xf32>
    %139 = vector.extract_strided_slice %135 {offsets = [0, 0], sizes = [8, 128], strides = [1, 1]} : vector<8x384xf32> to vector<8x128xf32>
    %140 = vector.extract_strided_slice %138 {offsets = [0, 0], sizes = [8, 128], strides = [1, 1]} : vector<8x384xf32> to vector<8x128xf32>
    %141 = arith.addf %139, %140 : vector<8x128xf32>
    %142 = arith.negf %141 : vector<8x128xf32>
    %143 = math.exp %142 : vector<8x128xf32>
    %cst_30 = arith.constant 1.000000e+00 : f32
    %144 = vector.broadcast %cst_30 : f32 to vector<8x128xf32>
    %145 = arith.addf %144, %143 : vector<8x128xf32>
    %146 = arith.divf %144, %145 : vector<8x128xf32>
    %147 = vector.extract_strided_slice %135 {offsets = [0, 128], sizes = [8, 128], strides = [1, 1]} : vector<8x384xf32> to vector<8x128xf32>
    %148 = vector.extract_strided_slice %138 {offsets = [0, 128], sizes = [8, 128], strides = [1, 1]} : vector<8x384xf32> to vector<8x128xf32>
    %149 = arith.addf %147, %148 : vector<8x128xf32>
    %150 = arith.negf %149 : vector<8x128xf32>
    %151 = math.exp %150 : vector<8x128xf32>
    %cst_31 = arith.constant 1.000000e+00 : f32
    %152 = vector.broadcast %cst_31 : f32 to vector<8x128xf32>
    %153 = arith.addf %152, %151 : vector<8x128xf32>
    %154 = arith.divf %152, %153 : vector<8x128xf32>
    %155 = vector.extract_strided_slice %135 {offsets = [0, 256], sizes = [8, 128], strides = [1, 1]} : vector<8x384xf32> to vector<8x128xf32>
    %156 = vector.extract_strided_slice %138 {offsets = [0, 256], sizes = [8, 128], strides = [1, 1]} : vector<8x384xf32> to vector<8x128xf32>
    %157 = arith.mulf %146, %156 : vector<8x128xf32>
    %158 = arith.addf %155, %157 : vector<8x128xf32>
    %159 = math.tanh %158 : vector<8x128xf32>
    %cst_32 = arith.constant 1.000000e+00 : f32
    %160 = vector.broadcast %cst_32 : f32 to vector<8x128xf32>
    %161 = arith.subf %160, %154 : vector<8x128xf32>
    %162 = arith.mulf %161, %159 : vector<8x128xf32>
    %163 = arith.mulf %154, %132 : vector<8x128xf32>
    %164 = arith.addf %162, %163 : vector<8x128xf32>
    %c5_i32 = arith.constant 5 : i32
    %165 = arith.index_cast %c5_i32 : i32 to index
    %c0_33 = arith.constant 0 : index
    %c0_34 = arith.constant 0 : index
    %166 = vector.load %arg1[%165, %c0_33, %c0_34] : memref<8x8x384xf32, #tpu.memory_space<vmem>>, vector<1x8x384xf32>
    %167 = vector.shape_cast %166 : vector<1x8x384xf32> to vector<8x384xf32>
    %168 = arith.truncf %164 : vector<8x128xf32> to vector<8x128xbf16>
    %cst_35 = arith.constant dense<0.000000e+00> : vector<8x384xf32>
    %169 = tpu.matmul %168, %0, %cst_35 {dimension_numbers = #tpu.dot_dimension_numbers<[1], [0], [0], [1], [0, 0, 1, 1], [], []>} : vector<8x128xbf16>, vector<128x384xbf16>, vector<8x384xf32> -> vector<8x384xf32>
    %170 = arith.addf %169, %3 : vector<8x384xf32>
    %171 = vector.extract_strided_slice %167 {offsets = [0, 0], sizes = [8, 128], strides = [1, 1]} : vector<8x384xf32> to vector<8x128xf32>
    %172 = vector.extract_strided_slice %170 {offsets = [0, 0], sizes = [8, 128], strides = [1, 1]} : vector<8x384xf32> to vector<8x128xf32>
    %173 = arith.addf %171, %172 : vector<8x128xf32>
    %174 = arith.negf %173 : vector<8x128xf32>
    %175 = math.exp %174 : vector<8x128xf32>
    %cst_36 = arith.constant 1.000000e+00 : f32
    %176 = vector.broadcast %cst_36 : f32 to vector<8x128xf32>
    %177 = arith.addf %176, %175 : vector<8x128xf32>
    %178 = arith.divf %176, %177 : vector<8x128xf32>
    %179 = vector.extract_strided_slice %167 {offsets = [0, 128], sizes = [8, 128], strides = [1, 1]} : vector<8x384xf32> to vector<8x128xf32>
    %180 = vector.extract_strided_slice %170 {offsets = [0, 128], sizes = [8, 128], strides = [1, 1]} : vector<8x384xf32> to vector<8x128xf32>
    %181 = arith.addf %179, %180 : vector<8x128xf32>
    %182 = arith.negf %181 : vector<8x128xf32>
    %183 = math.exp %182 : vector<8x128xf32>
    %cst_37 = arith.constant 1.000000e+00 : f32
    %184 = vector.broadcast %cst_37 : f32 to vector<8x128xf32>
    %185 = arith.addf %184, %183 : vector<8x128xf32>
    %186 = arith.divf %184, %185 : vector<8x128xf32>
    %187 = vector.extract_strided_slice %167 {offsets = [0, 256], sizes = [8, 128], strides = [1, 1]} : vector<8x384xf32> to vector<8x128xf32>
    %188 = vector.extract_strided_slice %170 {offsets = [0, 256], sizes = [8, 128], strides = [1, 1]} : vector<8x384xf32> to vector<8x128xf32>
    %189 = arith.mulf %178, %188 : vector<8x128xf32>
    %190 = arith.addf %187, %189 : vector<8x128xf32>
    %191 = math.tanh %190 : vector<8x128xf32>
    %cst_38 = arith.constant 1.000000e+00 : f32
    %192 = vector.broadcast %cst_38 : f32 to vector<8x128xf32>
    %193 = arith.subf %192, %186 : vector<8x128xf32>
    %194 = arith.mulf %193, %191 : vector<8x128xf32>
    %195 = arith.mulf %186, %164 : vector<8x128xf32>
    %196 = arith.addf %194, %195 : vector<8x128xf32>
    %c6_i32 = arith.constant 6 : i32
    %197 = arith.index_cast %c6_i32 : i32 to index
    %c0_39 = arith.constant 0 : index
    %c0_40 = arith.constant 0 : index
    %198 = vector.load %arg1[%197, %c0_39, %c0_40] : memref<8x8x384xf32, #tpu.memory_space<vmem>>, vector<1x8x384xf32>
    %199 = vector.shape_cast %198 : vector<1x8x384xf32> to vector<8x384xf32>
    %200 = arith.truncf %196 : vector<8x128xf32> to vector<8x128xbf16>
    %cst_41 = arith.constant dense<0.000000e+00> : vector<8x384xf32>
    %201 = tpu.matmul %200, %0, %cst_41 {dimension_numbers = #tpu.dot_dimension_numbers<[1], [0], [0], [1], [0, 0, 1, 1], [], []>} : vector<8x128xbf16>, vector<128x384xbf16>, vector<8x384xf32> -> vector<8x384xf32>
    %202 = arith.addf %201, %3 : vector<8x384xf32>
    %203 = vector.extract_strided_slice %199 {offsets = [0, 0], sizes = [8, 128], strides = [1, 1]} : vector<8x384xf32> to vector<8x128xf32>
    %204 = vector.extract_strided_slice %202 {offsets = [0, 0], sizes = [8, 128], strides = [1, 1]} : vector<8x384xf32> to vector<8x128xf32>
    %205 = arith.addf %203, %204 : vector<8x128xf32>
    %206 = arith.negf %205 : vector<8x128xf32>
    %207 = math.exp %206 : vector<8x128xf32>
    %cst_42 = arith.constant 1.000000e+00 : f32
    %208 = vector.broadcast %cst_42 : f32 to vector<8x128xf32>
    %209 = arith.addf %208, %207 : vector<8x128xf32>
    %210 = arith.divf %208, %209 : vector<8x128xf32>
    %211 = vector.extract_strided_slice %199 {offsets = [0, 128], sizes = [8, 128], strides = [1, 1]} : vector<8x384xf32> to vector<8x128xf32>
    %212 = vector.extract_strided_slice %202 {offsets = [0, 128], sizes = [8, 128], strides = [1, 1]} : vector<8x384xf32> to vector<8x128xf32>
    %213 = arith.addf %211, %212 : vector<8x128xf32>
    %214 = arith.negf %213 : vector<8x128xf32>
    %215 = math.exp %214 : vector<8x128xf32>
    %cst_43 = arith.constant 1.000000e+00 : f32
    %216 = vector.broadcast %cst_43 : f32 to vector<8x128xf32>
    %217 = arith.addf %216, %215 : vector<8x128xf32>
    %218 = arith.divf %216, %217 : vector<8x128xf32>
    %219 = vector.extract_strided_slice %199 {offsets = [0, 256], sizes = [8, 128], strides = [1, 1]} : vector<8x384xf32> to vector<8x128xf32>
    %220 = vector.extract_strided_slice %202 {offsets = [0, 256], sizes = [8, 128], strides = [1, 1]} : vector<8x384xf32> to vector<8x128xf32>
    %221 = arith.mulf %210, %220 : vector<8x128xf32>
    %222 = arith.addf %219, %221 : vector<8x128xf32>
    %223 = math.tanh %222 : vector<8x128xf32>
    %cst_44 = arith.constant 1.000000e+00 : f32
    %224 = vector.broadcast %cst_44 : f32 to vector<8x128xf32>
    %225 = arith.subf %224, %218 : vector<8x128xf32>
    %226 = arith.mulf %225, %223 : vector<8x128xf32>
    %227 = arith.mulf %218, %196 : vector<8x128xf32>
    %228 = arith.addf %226, %227 : vector<8x128xf32>
    %c7_i32 = arith.constant 7 : i32
    %229 = arith.index_cast %c7_i32 : i32 to index
    %c0_45 = arith.constant 0 : index
    %c0_46 = arith.constant 0 : index
    %230 = vector.load %arg1[%229, %c0_45, %c0_46] : memref<8x8x384xf32, #tpu.memory_space<vmem>>, vector<1x8x384xf32>
    %231 = vector.shape_cast %230 : vector<1x8x384xf32> to vector<8x384xf32>
    %232 = arith.truncf %228 : vector<8x128xf32> to vector<8x128xbf16>
    %cst_47 = arith.constant dense<0.000000e+00> : vector<8x384xf32>
    %233 = tpu.matmul %232, %0, %cst_47 {dimension_numbers = #tpu.dot_dimension_numbers<[1], [0], [0], [1], [0, 0, 1, 1], [], []>} : vector<8x128xbf16>, vector<128x384xbf16>, vector<8x384xf32> -> vector<8x384xf32>
    %234 = arith.addf %233, %3 : vector<8x384xf32>
    %235 = vector.extract_strided_slice %231 {offsets = [0, 0], sizes = [8, 128], strides = [1, 1]} : vector<8x384xf32> to vector<8x128xf32>
    %236 = vector.extract_strided_slice %234 {offsets = [0, 0], sizes = [8, 128], strides = [1, 1]} : vector<8x384xf32> to vector<8x128xf32>
    %237 = arith.addf %235, %236 : vector<8x128xf32>
    %238 = arith.negf %237 : vector<8x128xf32>
    %239 = math.exp %238 : vector<8x128xf32>
    %cst_48 = arith.constant 1.000000e+00 : f32
    %240 = vector.broadcast %cst_48 : f32 to vector<8x128xf32>
    %241 = arith.addf %240, %239 : vector<8x128xf32>
    %242 = arith.divf %240, %241 : vector<8x128xf32>
    %243 = vector.extract_strided_slice %231 {offsets = [0, 128], sizes = [8, 128], strides = [1, 1]} : vector<8x384xf32> to vector<8x128xf32>
    %244 = vector.extract_strided_slice %234 {offsets = [0, 128], sizes = [8, 128], strides = [1, 1]} : vector<8x384xf32> to vector<8x128xf32>
    %245 = arith.addf %243, %244 : vector<8x128xf32>
    %246 = arith.negf %245 : vector<8x128xf32>
    %247 = math.exp %246 : vector<8x128xf32>
    %cst_49 = arith.constant 1.000000e+00 : f32
    %248 = vector.broadcast %cst_49 : f32 to vector<8x128xf32>
    %249 = arith.addf %248, %247 : vector<8x128xf32>
    %250 = arith.divf %248, %249 : vector<8x128xf32>
    %251 = vector.extract_strided_slice %231 {offsets = [0, 256], sizes = [8, 128], strides = [1, 1]} : vector<8x384xf32> to vector<8x128xf32>
    %252 = vector.extract_strided_slice %234 {offsets = [0, 256], sizes = [8, 128], strides = [1, 1]} : vector<8x384xf32> to vector<8x128xf32>
    %253 = arith.mulf %242, %252 : vector<8x128xf32>
    %254 = arith.addf %251, %253 : vector<8x128xf32>
    %255 = math.tanh %254 : vector<8x128xf32>
    %cst_50 = arith.constant 1.000000e+00 : f32
    %256 = vector.broadcast %cst_50 : f32 to vector<8x128xf32>
    %257 = arith.subf %256, %250 : vector<8x128xf32>
    %258 = arith.mulf %257, %255 : vector<8x128xf32>
    %259 = arith.mulf %250, %228 : vector<8x128xf32>
    %260 = arith.addf %258, %259 : vector<8x128xf32>
    %c8_i32 = arith.constant 8 : i32
    %c0_51 = arith.constant 0 : index
    %c0_52 = arith.constant 0 : index
    %261 = vector.load %arg4[%c0_51, %c0_52] : memref<8x128xf32, #tpu.memory_space<vmem>>, vector<8x128xf32>
    tpu.vector_store %arg4[%c0_51, %c0_52], %260 {strides = array<i32>} : memref<8x128xf32, #tpu.memory_space<vmem>>, vector<8x128xf32>,
    return
  }
  func.func @transform_0(%arg0: i32) -> (i32, i32, i32) {
    %c0_i32 = arith.constant 0 : i32
    %c0_i32_0 = arith.constant 0 : i32
    %c0_i32_1 = arith.constant 0 : i32
    return %c0_i32, %arg0, %c0_i32_0 : i32, i32, i32
  }
  func.func @transform_1(%arg0: i32) -> (i32, i32) {
    %c0_i32 = arith.constant 0 : i32
    %c0_i32_0 = arith.constant 0 : i32
    %c0_i32_1 = arith.constant 0 : i32
    return %c0_i32, %c0_i32_0 : i32, i32
  }
  func.func @transform_2(%arg0: i32) -> (i32, i32) {
    %c0_i32 = arith.constant 0 : i32
    %c0_i32_0 = arith.constant 0 : i32
    %c0_i32_1 = arith.constant 0 : i32
    return %c0_i32, %c0_i32_0 : i32, i32
  }
  func.func @transform_3(%arg0: i32) -> (i32, i32) {
    %c0_i32 = arith.constant 0 : i32
    %c0_i32_0 = arith.constant 0 : i32
    return %arg0, %c0_i32 : i32, i32
  }
}

module attributes {stable_mosaic.version = 11 : i64} {
  func.func @_gru_decoder_kernel(%arg0: i32, %arg1: memref<8x8x384xf32, #tpu.memory_space<vmem>>, %arg2: memref<128x384xbf16, #tpu.memory_space<vmem>>, %arg3: memref<1x384xf32, #tpu.memory_space<vmem>>, %arg4: memref<8x128xf32, #tpu.memory_space<vmem>>, %arg5: memref<128x128xbf16, #tpu.memory_space<vmem>>, %arg6: memref<1x128xf32, #tpu.memory_space<vmem>>, %arg7: memref<8x8x128xf32, #tpu.memory_space<vmem>>) attributes {dimension_semantics = [#tpu.dimension_semantics<parallel>], iteration_bounds = array<i64: 1>, scalar_prefetch = 0 : i64, scratch_operands = 0 : i64, tpu.core_type = #tpu.core_type<tc>, window_params = [{transform_indices = @transform_0, window_bounds = array<i64: 8, 8, 384>}, {pipeline_mode = #tpu.pipeline_mode<synchronous>, transform_indices = @transform_1, window_bounds = array<i64: 128, 384>}, {pipeline_mode = #tpu.pipeline_mode<synchronous>, transform_indices = @transform_2, window_bounds = array<i64: 1, 384>}, {transform_indices = @transform_3, window_bounds = array<i64: 8, 128>}, {pipeline_mode = #tpu.pipeline_mode<synchronous>, transform_indices = @transform_4, window_bounds = array<i64: 128, 128>}, {pipeline_mode = #tpu.pipeline_mode<synchronous>, transform_indices = @transform_5, window_bounds = array<i64: 1, 128>}, {transform_indices = @transform_6, window_bounds = array<i64: 8, 8, 128>}]} {
    %c0 = arith.constant 0 : index
    %c0_0 = arith.constant 0 : index
    %0 = vector.load %arg2[%c0, %c0_0] : memref<128x384xbf16, #tpu.memory_space<vmem>>, vector<128x384xbf16>
    %c0_1 = arith.constant 0 : index
    %c0_2 = arith.constant 0 : index
    %1 = vector.load %arg5[%c0_1, %c0_2] : memref<128x128xbf16, #tpu.memory_space<vmem>>, vector<128x128xbf16>
    %c0_3 = arith.constant 0 : index
    %c0_4 = arith.constant 0 : index
    %2 = vector.load %arg3[%c0_3, %c0_4] : memref<1x384xf32, #tpu.memory_space<vmem>>, vector<1x384xf32>
    %3 = vector.shape_cast %2 : vector<1x384xf32> to vector<1x384xf32>
    %4 = vector.broadcast %3 : vector<1x384xf32> to vector<8x384xf32>
    %c0_5 = arith.constant 0 : index
    %c0_6 = arith.constant 0 : index
    %5 = vector.load %arg6[%c0_5, %c0_6] : memref<1x128xf32, #tpu.memory_space<vmem>>, vector<1x128xf32>
    %6 = vector.shape_cast %5 : vector<1x128xf32> to vector<1x128xf32>
    %7 = vector.broadcast %6 : vector<1x128xf32> to vector<8x128xf32>
    %c0_7 = arith.constant 0 : index
    %c0_8 = arith.constant 0 : index
    %8 = vector.load %arg4[%c0_7, %c0_8] : memref<8x128xf32, #tpu.memory_space<vmem>>, vector<8x128xf32>
    %c0_i32 = arith.constant 0 : i32
    %9 = arith.index_cast %c0_i32 : i32 to index
    %c0_9 = arith.constant 0 : index
    %c0_10 = arith.constant 0 : index
    %10 = vector.load %arg1[%9, %c0_9, %c0_10] : memref<8x8x384xf32, #tpu.memory_space<vmem>>, vector<1x8x384xf32>
    %11 = vector.shape_cast %10 : vector<1x8x384xf32> to vector<8x384xf32>
    %12 = arith.truncf %8 : vector<8x128xf32> to vector<8x128xbf16>
    %cst = arith.constant dense<0.000000e+00> : vector<8x384xf32>
    %13 = tpu.matmul %12, %0, %cst {dimension_numbers = #tpu.dot_dimension_numbers<[1], [0], [0], [1], [0, 0, 1, 1], [], []>} : vector<8x128xbf16>, vector<128x384xbf16>, vector<8x384xf32> -> vector<8x384xf32>
    %14 = arith.addf %13, %4 : vector<8x384xf32>
    %15 = vector.extract_strided_slice %11 {offsets = [0, 0], sizes = [8, 128], strides = [1, 1]} : vector<8x384xf32> to vector<8x128xf32>
    %16 = vector.extract_strided_slice %14 {offsets = [0, 0], sizes = [8, 128], strides = [1, 1]} : vector<8x384xf32> to vector<8x128xf32>
    %17 = arith.addf %15, %16 : vector<8x128xf32>
    %18 = arith.negf %17 : vector<8x128xf32>
    %19 = math.exp %18 : vector<8x128xf32>
    %cst_11 = arith.constant 1.000000e+00 : f32
    %20 = vector.broadcast %cst_11 : f32 to vector<8x128xf32>
    %21 = arith.addf %20, %19 : vector<8x128xf32>
    %22 = arith.divf %20, %21 : vector<8x128xf32>
    %23 = vector.extract_strided_slice %11 {offsets = [0, 128], sizes = [8, 128], strides = [1, 1]} : vector<8x384xf32> to vector<8x128xf32>
    %24 = vector.extract_strided_slice %14 {offsets = [0, 128], sizes = [8, 128], strides = [1, 1]} : vector<8x384xf32> to vector<8x128xf32>
    %25 = arith.addf %23, %24 : vector<8x128xf32>
    %26 = arith.negf %25 : vector<8x128xf32>
    %27 = math.exp %26 : vector<8x128xf32>
    %cst_12 = arith.constant 1.000000e+00 : f32
    %28 = vector.broadcast %cst_12 : f32 to vector<8x128xf32>
    %29 = arith.addf %28, %27 : vector<8x128xf32>
    %30 = arith.divf %28, %29 : vector<8x128xf32>
    %31 = vector.extract_strided_slice %11 {offsets = [0, 256], sizes = [8, 128], strides = [1, 1]} : vector<8x384xf32> to vector<8x128xf32>
    %32 = vector.extract_strided_slice %14 {offsets = [0, 256], sizes = [8, 128], strides = [1, 1]} : vector<8x384xf32> to vector<8x128xf32>
    %33 = arith.mulf %22, %32 : vector<8x128xf32>
    %34 = arith.addf %31, %33 : vector<8x128xf32>
    %35 = math.tanh %34 : vector<8x128xf32>
    %cst_13 = arith.constant 1.000000e+00 : f32
    %36 = vector.broadcast %cst_13 : f32 to vector<8x128xf32>
    %37 = arith.subf %36, %30 : vector<8x128xf32>
    %38 = arith.mulf %37, %35 : vector<8x128xf32>
    %39 = arith.mulf %30, %8 : vector<8x128xf32>
    %40 = arith.addf %38, %39 : vector<8x128xf32>
    %41 = arith.truncf %40 : vector<8x128xf32> to vector<8x128xbf16>
    %cst_14 = arith.constant dense<0.000000e+00> : vector<8x128xf32>
    %42 = tpu.matmul %41, %1, %cst_14 {dimension_numbers = #tpu.dot_dimension_numbers<[1], [0], [0], [1], [0, 0, 1, 1], [], []>} : vector<8x128xbf16>, vector<128x128xbf16>, vector<8x128xf32> -> vector<8x128xf32>
    %43 = arith.addf %42, %7 : vector<8x128xf32>
    %44 = arith.index_cast %c0_i32 : i32 to index
    %c0_15 = arith.constant 0 : index
    %c0_16 = arith.constant 0 : index
    %45 = vector.load %arg7[%44, %c0_15, %c0_16] : memref<8x8x128xf32, #tpu.memory_space<vmem>>, vector<1x8x128xf32>
    %46 = vector.shape_cast %45 : vector<1x8x128xf32> to vector<8x128xf32>
    %47 = vector.shape_cast %43 : vector<8x128xf32> to vector<1x8x128xf32>
    tpu.vector_store %arg7[%44, %c0_15, %c0_16], %47 {strides = array<i32>} : memref<8x8x128xf32, #tpu.memory_space<vmem>>, vector<1x8x128xf32>,
    %c1_i32 = arith.constant 1 : i32
    %48 = arith.index_cast %c1_i32 : i32 to index
    %c0_17 = arith.constant 0 : index
    %c0_18 = arith.constant 0 : index
    %49 = vector.load %arg1[%48, %c0_17, %c0_18] : memref<8x8x384xf32, #tpu.memory_space<vmem>>, vector<1x8x384xf32>
    %50 = vector.shape_cast %49 : vector<1x8x384xf32> to vector<8x384xf32>
    %51 = arith.truncf %40 : vector<8x128xf32> to vector<8x128xbf16>
    %cst_19 = arith.constant dense<0.000000e+00> : vector<8x384xf32>
    %52 = tpu.matmul %51, %0, %cst_19 {dimension_numbers = #tpu.dot_dimension_numbers<[1], [0], [0], [1], [0, 0, 1, 1], [], []>} : vector<8x128xbf16>, vector<128x384xbf16>, vector<8x384xf32> -> vector<8x384xf32>
    %53 = arith.addf %52, %4 : vector<8x384xf32>
    %54 = vector.extract_strided_slice %50 {offsets = [0, 0], sizes = [8, 128], strides = [1, 1]} : vector<8x384xf32> to vector<8x128xf32>
    %55 = vector.extract_strided_slice %53 {offsets = [0, 0], sizes = [8, 128], strides = [1, 1]} : vector<8x384xf32> to vector<8x128xf32>
    %56 = arith.addf %54, %55 : vector<8x128xf32>
    %57 = arith.negf %56 : vector<8x128xf32>
    %58 = math.exp %57 : vector<8x128xf32>
    %cst_20 = arith.constant 1.000000e+00 : f32
    %59 = vector.broadcast %cst_20 : f32 to vector<8x128xf32>
    %60 = arith.addf %59, %58 : vector<8x128xf32>
    %61 = arith.divf %59, %60 : vector<8x128xf32>
    %62 = vector.extract_strided_slice %50 {offsets = [0, 128], sizes = [8, 128], strides = [1, 1]} : vector<8x384xf32> to vector<8x128xf32>
    %63 = vector.extract_strided_slice %53 {offsets = [0, 128], sizes = [8, 128], strides = [1, 1]} : vector<8x384xf32> to vector<8x128xf32>
    %64 = arith.addf %62, %63 : vector<8x128xf32>
    %65 = arith.negf %64 : vector<8x128xf32>
    %66 = math.exp %65 : vector<8x128xf32>
    %cst_21 = arith.constant 1.000000e+00 : f32
    %67 = vector.broadcast %cst_21 : f32 to vector<8x128xf32>
    %68 = arith.addf %67, %66 : vector<8x128xf32>
    %69 = arith.divf %67, %68 : vector<8x128xf32>
    %70 = vector.extract_strided_slice %50 {offsets = [0, 256], sizes = [8, 128], strides = [1, 1]} : vector<8x384xf32> to vector<8x128xf32>
    %71 = vector.extract_strided_slice %53 {offsets = [0, 256], sizes = [8, 128], strides = [1, 1]} : vector<8x384xf32> to vector<8x128xf32>
    %72 = arith.mulf %61, %71 : vector<8x128xf32>
    %73 = arith.addf %70, %72 : vector<8x128xf32>
    %74 = math.tanh %73 : vector<8x128xf32>
    %cst_22 = arith.constant 1.000000e+00 : f32
    %75 = vector.broadcast %cst_22 : f32 to vector<8x128xf32>
    %76 = arith.subf %75, %69 : vector<8x128xf32>
    %77 = arith.mulf %76, %74 : vector<8x128xf32>
    %78 = arith.mulf %69, %40 : vector<8x128xf32>
    %79 = arith.addf %77, %78 : vector<8x128xf32>
    %80 = arith.truncf %79 : vector<8x128xf32> to vector<8x128xbf16>
    %cst_23 = arith.constant dense<0.000000e+00> : vector<8x128xf32>
    %81 = tpu.matmul %80, %1, %cst_23 {dimension_numbers = #tpu.dot_dimension_numbers<[1], [0], [0], [1], [0, 0, 1, 1], [], []>} : vector<8x128xbf16>, vector<128x128xbf16>, vector<8x128xf32> -> vector<8x128xf32>
    %82 = arith.addf %81, %7 : vector<8x128xf32>
    %83 = arith.index_cast %c1_i32 : i32 to index
    %c0_24 = arith.constant 0 : index
    %c0_25 = arith.constant 0 : index
    %84 = vector.load %arg7[%83, %c0_24, %c0_25] : memref<8x8x128xf32, #tpu.memory_space<vmem>>, vector<1x8x128xf32>
    %85 = vector.shape_cast %84 : vector<1x8x128xf32> to vector<8x128xf32>
    %86 = vector.shape_cast %82 : vector<8x128xf32> to vector<1x8x128xf32>
    tpu.vector_store %arg7[%83, %c0_24, %c0_25], %86 {strides = array<i32>} : memref<8x8x128xf32, #tpu.memory_space<vmem>>, vector<1x8x128xf32>,
    %c2_i32 = arith.constant 2 : i32
    %87 = arith.index_cast %c2_i32 : i32 to index
    %c0_26 = arith.constant 0 : index
    %c0_27 = arith.constant 0 : index
    %88 = vector.load %arg1[%87, %c0_26, %c0_27] : memref<8x8x384xf32, #tpu.memory_space<vmem>>, vector<1x8x384xf32>
    %89 = vector.shape_cast %88 : vector<1x8x384xf32> to vector<8x384xf32>
    %90 = arith.truncf %79 : vector<8x128xf32> to vector<8x128xbf16>
    %cst_28 = arith.constant dense<0.000000e+00> : vector<8x384xf32>
    %91 = tpu.matmul %90, %0, %cst_28 {dimension_numbers = #tpu.dot_dimension_numbers<[1], [0], [0], [1], [0, 0, 1, 1], [], []>} : vector<8x128xbf16>, vector<128x384xbf16>, vector<8x384xf32> -> vector<8x384xf32>
    %92 = arith.addf %91, %4 : vector<8x384xf32>
    %93 = vector.extract_strided_slice %89 {offsets = [0, 0], sizes = [8, 128], strides = [1, 1]} : vector<8x384xf32> to vector<8x128xf32>
    %94 = vector.extract_strided_slice %92 {offsets = [0, 0], sizes = [8, 128], strides = [1, 1]} : vector<8x384xf32> to vector<8x128xf32>
    %95 = arith.addf %93, %94 : vector<8x128xf32>
    %96 = arith.negf %95 : vector<8x128xf32>
    %97 = math.exp %96 : vector<8x128xf32>
    %cst_29 = arith.constant 1.000000e+00 : f32
    %98 = vector.broadcast %cst_29 : f32 to vector<8x128xf32>
    %99 = arith.addf %98, %97 : vector<8x128xf32>
    %100 = arith.divf %98, %99 : vector<8x128xf32>
    %101 = vector.extract_strided_slice %89 {offsets = [0, 128], sizes = [8, 128], strides = [1, 1]} : vector<8x384xf32> to vector<8x128xf32>
    %102 = vector.extract_strided_slice %92 {offsets = [0, 128], sizes = [8, 128], strides = [1, 1]} : vector<8x384xf32> to vector<8x128xf32>
    %103 = arith.addf %101, %102 : vector<8x128xf32>
    %104 = arith.negf %103 : vector<8x128xf32>
    %105 = math.exp %104 : vector<8x128xf32>
    %cst_30 = arith.constant 1.000000e+00 : f32
    %106 = vector.broadcast %cst_30 : f32 to vector<8x128xf32>
    %107 = arith.addf %106, %105 : vector<8x128xf32>
    %108 = arith.divf %106, %107 : vector<8x128xf32>
    %109 = vector.extract_strided_slice %89 {offsets = [0, 256], sizes = [8, 128], strides = [1, 1]} : vector<8x384xf32> to vector<8x128xf32>
    %110 = vector.extract_strided_slice %92 {offsets = [0, 256], sizes = [8, 128], strides = [1, 1]} : vector<8x384xf32> to vector<8x128xf32>
    %111 = arith.mulf %100, %110 : vector<8x128xf32>
    %112 = arith.addf %109, %111 : vector<8x128xf32>
    %113 = math.tanh %112 : vector<8x128xf32>
    %cst_31 = arith.constant 1.000000e+00 : f32
    %114 = vector.broadcast %cst_31 : f32 to vector<8x128xf32>
    %115 = arith.subf %114, %108 : vector<8x128xf32>
    %116 = arith.mulf %115, %113 : vector<8x128xf32>
    %117 = arith.mulf %108, %79 : vector<8x128xf32>
    %118 = arith.addf %116, %117 : vector<8x128xf32>
    %119 = arith.truncf %118 : vector<8x128xf32> to vector<8x128xbf16>
    %cst_32 = arith.constant dense<0.000000e+00> : vector<8x128xf32>
    %120 = tpu.matmul %119, %1, %cst_32 {dimension_numbers = #tpu.dot_dimension_numbers<[1], [0], [0], [1], [0, 0, 1, 1], [], []>} : vector<8x128xbf16>, vector<128x128xbf16>, vector<8x128xf32> -> vector<8x128xf32>
    %121 = arith.addf %120, %7 : vector<8x128xf32>
    %122 = arith.index_cast %c2_i32 : i32 to index
    %c0_33 = arith.constant 0 : index
    %c0_34 = arith.constant 0 : index
    %123 = vector.load %arg7[%122, %c0_33, %c0_34] : memref<8x8x128xf32, #tpu.memory_space<vmem>>, vector<1x8x128xf32>
    %124 = vector.shape_cast %123 : vector<1x8x128xf32> to vector<8x128xf32>
    %125 = vector.shape_cast %121 : vector<8x128xf32> to vector<1x8x128xf32>
    tpu.vector_store %arg7[%122, %c0_33, %c0_34], %125 {strides = array<i32>} : memref<8x8x128xf32, #tpu.memory_space<vmem>>, vector<1x8x128xf32>,
    %c3_i32 = arith.constant 3 : i32
    %126 = arith.index_cast %c3_i32 : i32 to index
    %c0_35 = arith.constant 0 : index
    %c0_36 = arith.constant 0 : index
    %127 = vector.load %arg1[%126, %c0_35, %c0_36] : memref<8x8x384xf32, #tpu.memory_space<vmem>>, vector<1x8x384xf32>
    %128 = vector.shape_cast %127 : vector<1x8x384xf32> to vector<8x384xf32>
    %129 = arith.truncf %118 : vector<8x128xf32> to vector<8x128xbf16>
    %cst_37 = arith.constant dense<0.000000e+00> : vector<8x384xf32>
    %130 = tpu.matmul %129, %0, %cst_37 {dimension_numbers = #tpu.dot_dimension_numbers<[1], [0], [0], [1], [0, 0, 1, 1], [], []>} : vector<8x128xbf16>, vector<128x384xbf16>, vector<8x384xf32> -> vector<8x384xf32>
    %131 = arith.addf %130, %4 : vector<8x384xf32>
    %132 = vector.extract_strided_slice %128 {offsets = [0, 0], sizes = [8, 128], strides = [1, 1]} : vector<8x384xf32> to vector<8x128xf32>
    %133 = vector.extract_strided_slice %131 {offsets = [0, 0], sizes = [8, 128], strides = [1, 1]} : vector<8x384xf32> to vector<8x128xf32>
    %134 = arith.addf %132, %133 : vector<8x128xf32>
    %135 = arith.negf %134 : vector<8x128xf32>
    %136 = math.exp %135 : vector<8x128xf32>
    %cst_38 = arith.constant 1.000000e+00 : f32
    %137 = vector.broadcast %cst_38 : f32 to vector<8x128xf32>
    %138 = arith.addf %137, %136 : vector<8x128xf32>
    %139 = arith.divf %137, %138 : vector<8x128xf32>
    %140 = vector.extract_strided_slice %128 {offsets = [0, 128], sizes = [8, 128], strides = [1, 1]} : vector<8x384xf32> to vector<8x128xf32>
    %141 = vector.extract_strided_slice %131 {offsets = [0, 128], sizes = [8, 128], strides = [1, 1]} : vector<8x384xf32> to vector<8x128xf32>
    %142 = arith.addf %140, %141 : vector<8x128xf32>
    %143 = arith.negf %142 : vector<8x128xf32>
    %144 = math.exp %143 : vector<8x128xf32>
    %cst_39 = arith.constant 1.000000e+00 : f32
    %145 = vector.broadcast %cst_39 : f32 to vector<8x128xf32>
    %146 = arith.addf %145, %144 : vector<8x128xf32>
    %147 = arith.divf %145, %146 : vector<8x128xf32>
    %148 = vector.extract_strided_slice %128 {offsets = [0, 256], sizes = [8, 128], strides = [1, 1]} : vector<8x384xf32> to vector<8x128xf32>
    %149 = vector.extract_strided_slice %131 {offsets = [0, 256], sizes = [8, 128], strides = [1, 1]} : vector<8x384xf32> to vector<8x128xf32>
    %150 = arith.mulf %139, %149 : vector<8x128xf32>
    %151 = arith.addf %148, %150 : vector<8x128xf32>
    %152 = math.tanh %151 : vector<8x128xf32>
    %cst_40 = arith.constant 1.000000e+00 : f32
    %153 = vector.broadcast %cst_40 : f32 to vector<8x128xf32>
    %154 = arith.subf %153, %147 : vector<8x128xf32>
    %155 = arith.mulf %154, %152 : vector<8x128xf32>
    %156 = arith.mulf %147, %118 : vector<8x128xf32>
    %157 = arith.addf %155, %156 : vector<8x128xf32>
    %158 = arith.truncf %157 : vector<8x128xf32> to vector<8x128xbf16>
    %cst_41 = arith.constant dense<0.000000e+00> : vector<8x128xf32>
    %159 = tpu.matmul %158, %1, %cst_41 {dimension_numbers = #tpu.dot_dimension_numbers<[1], [0], [0], [1], [0, 0, 1, 1], [], []>} : vector<8x128xbf16>, vector<128x128xbf16>, vector<8x128xf32> -> vector<8x128xf32>
    %160 = arith.addf %159, %7 : vector<8x128xf32>
    %161 = arith.index_cast %c3_i32 : i32 to index
    %c0_42 = arith.constant 0 : index
    %c0_43 = arith.constant 0 : index
    %162 = vector.load %arg7[%161, %c0_42, %c0_43] : memref<8x8x128xf32, #tpu.memory_space<vmem>>, vector<1x8x128xf32>
    %163 = vector.shape_cast %162 : vector<1x8x128xf32> to vector<8x128xf32>
    %164 = vector.shape_cast %160 : vector<8x128xf32> to vector<1x8x128xf32>
    tpu.vector_store %arg7[%161, %c0_42, %c0_43], %164 {strides = array<i32>} : memref<8x8x128xf32, #tpu.memory_space<vmem>>, vector<1x8x128xf32>,
    %c4_i32 = arith.constant 4 : i32
    %165 = arith.index_cast %c4_i32 : i32 to index
    %c0_44 = arith.constant 0 : index
    %c0_45 = arith.constant 0 : index
    %166 = vector.load %arg1[%165, %c0_44, %c0_45] : memref<8x8x384xf32, #tpu.memory_space<vmem>>, vector<1x8x384xf32>
    %167 = vector.shape_cast %166 : vector<1x8x384xf32> to vector<8x384xf32>
    %168 = arith.truncf %157 : vector<8x128xf32> to vector<8x128xbf16>
    %cst_46 = arith.constant dense<0.000000e+00> : vector<8x384xf32>
    %169 = tpu.matmul %168, %0, %cst_46 {dimension_numbers = #tpu.dot_dimension_numbers<[1], [0], [0], [1], [0, 0, 1, 1], [], []>} : vector<8x128xbf16>, vector<128x384xbf16>, vector<8x384xf32> -> vector<8x384xf32>
    %170 = arith.addf %169, %4 : vector<8x384xf32>
    %171 = vector.extract_strided_slice %167 {offsets = [0, 0], sizes = [8, 128], strides = [1, 1]} : vector<8x384xf32> to vector<8x128xf32>
    %172 = vector.extract_strided_slice %170 {offsets = [0, 0], sizes = [8, 128], strides = [1, 1]} : vector<8x384xf32> to vector<8x128xf32>
    %173 = arith.addf %171, %172 : vector<8x128xf32>
    %174 = arith.negf %173 : vector<8x128xf32>
    %175 = math.exp %174 : vector<8x128xf32>
    %cst_47 = arith.constant 1.000000e+00 : f32
    %176 = vector.broadcast %cst_47 : f32 to vector<8x128xf32>
    %177 = arith.addf %176, %175 : vector<8x128xf32>
    %178 = arith.divf %176, %177 : vector<8x128xf32>
    %179 = vector.extract_strided_slice %167 {offsets = [0, 128], sizes = [8, 128], strides = [1, 1]} : vector<8x384xf32> to vector<8x128xf32>
    %180 = vector.extract_strided_slice %170 {offsets = [0, 128], sizes = [8, 128], strides = [1, 1]} : vector<8x384xf32> to vector<8x128xf32>
    %181 = arith.addf %179, %180 : vector<8x128xf32>
    %182 = arith.negf %181 : vector<8x128xf32>
    %183 = math.exp %182 : vector<8x128xf32>
    %cst_48 = arith.constant 1.000000e+00 : f32
    %184 = vector.broadcast %cst_48 : f32 to vector<8x128xf32>
    %185 = arith.addf %184, %183 : vector<8x128xf32>
    %186 = arith.divf %184, %185 : vector<8x128xf32>
    %187 = vector.extract_strided_slice %167 {offsets = [0, 256], sizes = [8, 128], strides = [1, 1]} : vector<8x384xf32> to vector<8x128xf32>
    %188 = vector.extract_strided_slice %170 {offsets = [0, 256], sizes = [8, 128], strides = [1, 1]} : vector<8x384xf32> to vector<8x128xf32>
    %189 = arith.mulf %178, %188 : vector<8x128xf32>
    %190 = arith.addf %187, %189 : vector<8x128xf32>
    %191 = math.tanh %190 : vector<8x128xf32>
    %cst_49 = arith.constant 1.000000e+00 : f32
    %192 = vector.broadcast %cst_49 : f32 to vector<8x128xf32>
    %193 = arith.subf %192, %186 : vector<8x128xf32>
    %194 = arith.mulf %193, %191 : vector<8x128xf32>
    %195 = arith.mulf %186, %157 : vector<8x128xf32>
    %196 = arith.addf %194, %195 : vector<8x128xf32>
    %197 = arith.truncf %196 : vector<8x128xf32> to vector<8x128xbf16>
    %cst_50 = arith.constant dense<0.000000e+00> : vector<8x128xf32>
    %198 = tpu.matmul %197, %1, %cst_50 {dimension_numbers = #tpu.dot_dimension_numbers<[1], [0], [0], [1], [0, 0, 1, 1], [], []>} : vector<8x128xbf16>, vector<128x128xbf16>, vector<8x128xf32> -> vector<8x128xf32>
    %199 = arith.addf %198, %7 : vector<8x128xf32>
    %200 = arith.index_cast %c4_i32 : i32 to index
    %c0_51 = arith.constant 0 : index
    %c0_52 = arith.constant 0 : index
    %201 = vector.load %arg7[%200, %c0_51, %c0_52] : memref<8x8x128xf32, #tpu.memory_space<vmem>>, vector<1x8x128xf32>
    %202 = vector.shape_cast %201 : vector<1x8x128xf32> to vector<8x128xf32>
    %203 = vector.shape_cast %199 : vector<8x128xf32> to vector<1x8x128xf32>
    tpu.vector_store %arg7[%200, %c0_51, %c0_52], %203 {strides = array<i32>} : memref<8x8x128xf32, #tpu.memory_space<vmem>>, vector<1x8x128xf32>,
    %c5_i32 = arith.constant 5 : i32
    %204 = arith.index_cast %c5_i32 : i32 to index
    %c0_53 = arith.constant 0 : index
    %c0_54 = arith.constant 0 : index
    %205 = vector.load %arg1[%204, %c0_53, %c0_54] : memref<8x8x384xf32, #tpu.memory_space<vmem>>, vector<1x8x384xf32>
    %206 = vector.shape_cast %205 : vector<1x8x384xf32> to vector<8x384xf32>
    %207 = arith.truncf %196 : vector<8x128xf32> to vector<8x128xbf16>
    %cst_55 = arith.constant dense<0.000000e+00> : vector<8x384xf32>
    %208 = tpu.matmul %207, %0, %cst_55 {dimension_numbers = #tpu.dot_dimension_numbers<[1], [0], [0], [1], [0, 0, 1, 1], [], []>} : vector<8x128xbf16>, vector<128x384xbf16>, vector<8x384xf32> -> vector<8x384xf32>
    %209 = arith.addf %208, %4 : vector<8x384xf32>
    %210 = vector.extract_strided_slice %206 {offsets = [0, 0], sizes = [8, 128], strides = [1, 1]} : vector<8x384xf32> to vector<8x128xf32>
    %211 = vector.extract_strided_slice %209 {offsets = [0, 0], sizes = [8, 128], strides = [1, 1]} : vector<8x384xf32> to vector<8x128xf32>
    %212 = arith.addf %210, %211 : vector<8x128xf32>
    %213 = arith.negf %212 : vector<8x128xf32>
    %214 = math.exp %213 : vector<8x128xf32>
    %cst_56 = arith.constant 1.000000e+00 : f32
    %215 = vector.broadcast %cst_56 : f32 to vector<8x128xf32>
    %216 = arith.addf %215, %214 : vector<8x128xf32>
    %217 = arith.divf %215, %216 : vector<8x128xf32>
    %218 = vector.extract_strided_slice %206 {offsets = [0, 128], sizes = [8, 128], strides = [1, 1]} : vector<8x384xf32> to vector<8x128xf32>
    %219 = vector.extract_strided_slice %209 {offsets = [0, 128], sizes = [8, 128], strides = [1, 1]} : vector<8x384xf32> to vector<8x128xf32>
    %220 = arith.addf %218, %219 : vector<8x128xf32>
    %221 = arith.negf %220 : vector<8x128xf32>
    %222 = math.exp %221 : vector<8x128xf32>
    %cst_57 = arith.constant 1.000000e+00 : f32
    %223 = vector.broadcast %cst_57 : f32 to vector<8x128xf32>
    %224 = arith.addf %223, %222 : vector<8x128xf32>
    %225 = arith.divf %223, %224 : vector<8x128xf32>
    %226 = vector.extract_strided_slice %206 {offsets = [0, 256], sizes = [8, 128], strides = [1, 1]} : vector<8x384xf32> to vector<8x128xf32>
    %227 = vector.extract_strided_slice %209 {offsets = [0, 256], sizes = [8, 128], strides = [1, 1]} : vector<8x384xf32> to vector<8x128xf32>
    %228 = arith.mulf %217, %227 : vector<8x128xf32>
    %229 = arith.addf %226, %228 : vector<8x128xf32>
    %230 = math.tanh %229 : vector<8x128xf32>
    %cst_58 = arith.constant 1.000000e+00 : f32
    %231 = vector.broadcast %cst_58 : f32 to vector<8x128xf32>
    %232 = arith.subf %231, %225 : vector<8x128xf32>
    %233 = arith.mulf %232, %230 : vector<8x128xf32>
    %234 = arith.mulf %225, %196 : vector<8x128xf32>
    %235 = arith.addf %233, %234 : vector<8x128xf32>
    %236 = arith.truncf %235 : vector<8x128xf32> to vector<8x128xbf16>
    %cst_59 = arith.constant dense<0.000000e+00> : vector<8x128xf32>
    %237 = tpu.matmul %236, %1, %cst_59 {dimension_numbers = #tpu.dot_dimension_numbers<[1], [0], [0], [1], [0, 0, 1, 1], [], []>} : vector<8x128xbf16>, vector<128x128xbf16>, vector<8x128xf32> -> vector<8x128xf32>
    %238 = arith.addf %237, %7 : vector<8x128xf32>
    %239 = arith.index_cast %c5_i32 : i32 to index
    %c0_60 = arith.constant 0 : index
    %c0_61 = arith.constant 0 : index
    %240 = vector.load %arg7[%239, %c0_60, %c0_61] : memref<8x8x128xf32, #tpu.memory_space<vmem>>, vector<1x8x128xf32>
    %241 = vector.shape_cast %240 : vector<1x8x128xf32> to vector<8x128xf32>
    %242 = vector.shape_cast %238 : vector<8x128xf32> to vector<1x8x128xf32>
    tpu.vector_store %arg7[%239, %c0_60, %c0_61], %242 {strides = array<i32>} : memref<8x8x128xf32, #tpu.memory_space<vmem>>, vector<1x8x128xf32>,
    %c6_i32 = arith.constant 6 : i32
    %243 = arith.index_cast %c6_i32 : i32 to index
    %c0_62 = arith.constant 0 : index
    %c0_63 = arith.constant 0 : index
    %244 = vector.load %arg1[%243, %c0_62, %c0_63] : memref<8x8x384xf32, #tpu.memory_space<vmem>>, vector<1x8x384xf32>
    %245 = vector.shape_cast %244 : vector<1x8x384xf32> to vector<8x384xf32>
    %246 = arith.truncf %235 : vector<8x128xf32> to vector<8x128xbf16>
    %cst_64 = arith.constant dense<0.000000e+00> : vector<8x384xf32>
    %247 = tpu.matmul %246, %0, %cst_64 {dimension_numbers = #tpu.dot_dimension_numbers<[1], [0], [0], [1], [0, 0, 1, 1], [], []>} : vector<8x128xbf16>, vector<128x384xbf16>, vector<8x384xf32> -> vector<8x384xf32>
    %248 = arith.addf %247, %4 : vector<8x384xf32>
    %249 = vector.extract_strided_slice %245 {offsets = [0, 0], sizes = [8, 128], strides = [1, 1]} : vector<8x384xf32> to vector<8x128xf32>
    %250 = vector.extract_strided_slice %248 {offsets = [0, 0], sizes = [8, 128], strides = [1, 1]} : vector<8x384xf32> to vector<8x128xf32>
    %251 = arith.addf %249, %250 : vector<8x128xf32>
    %252 = arith.negf %251 : vector<8x128xf32>
    %253 = math.exp %252 : vector<8x128xf32>
    %cst_65 = arith.constant 1.000000e+00 : f32
    %254 = vector.broadcast %cst_65 : f32 to vector<8x128xf32>
    %255 = arith.addf %254, %253 : vector<8x128xf32>
    %256 = arith.divf %254, %255 : vector<8x128xf32>
    %257 = vector.extract_strided_slice %245 {offsets = [0, 128], sizes = [8, 128], strides = [1, 1]} : vector<8x384xf32> to vector<8x128xf32>
    %258 = vector.extract_strided_slice %248 {offsets = [0, 128], sizes = [8, 128], strides = [1, 1]} : vector<8x384xf32> to vector<8x128xf32>
    %259 = arith.addf %257, %258 : vector<8x128xf32>
    %260 = arith.negf %259 : vector<8x128xf32>
    %261 = math.exp %260 : vector<8x128xf32>
    %cst_66 = arith.constant 1.000000e+00 : f32
    %262 = vector.broadcast %cst_66 : f32 to vector<8x128xf32>
    %263 = arith.addf %262, %261 : vector<8x128xf32>
    %264 = arith.divf %262, %263 : vector<8x128xf32>
    %265 = vector.extract_strided_slice %245 {offsets = [0, 256], sizes = [8, 128], strides = [1, 1]} : vector<8x384xf32> to vector<8x128xf32>
    %266 = vector.extract_strided_slice %248 {offsets = [0, 256], sizes = [8, 128], strides = [1, 1]} : vector<8x384xf32> to vector<8x128xf32>
    %267 = arith.mulf %256, %266 : vector<8x128xf32>
    %268 = arith.addf %265, %267 : vector<8x128xf32>
    %269 = math.tanh %268 : vector<8x128xf32>
    %cst_67 = arith.constant 1.000000e+00 : f32
    %270 = vector.broadcast %cst_67 : f32 to vector<8x128xf32>
    %271 = arith.subf %270, %264 : vector<8x128xf32>
    %272 = arith.mulf %271, %269 : vector<8x128xf32>
    %273 = arith.mulf %264, %235 : vector<8x128xf32>
    %274 = arith.addf %272, %273 : vector<8x128xf32>
    %275 = arith.truncf %274 : vector<8x128xf32> to vector<8x128xbf16>
    %cst_68 = arith.constant dense<0.000000e+00> : vector<8x128xf32>
    %276 = tpu.matmul %275, %1, %cst_68 {dimension_numbers = #tpu.dot_dimension_numbers<[1], [0], [0], [1], [0, 0, 1, 1], [], []>} : vector<8x128xbf16>, vector<128x128xbf16>, vector<8x128xf32> -> vector<8x128xf32>
    %277 = arith.addf %276, %7 : vector<8x128xf32>
    %278 = arith.index_cast %c6_i32 : i32 to index
    %c0_69 = arith.constant 0 : index
    %c0_70 = arith.constant 0 : index
    %279 = vector.load %arg7[%278, %c0_69, %c0_70] : memref<8x8x128xf32, #tpu.memory_space<vmem>>, vector<1x8x128xf32>
    %280 = vector.shape_cast %279 : vector<1x8x128xf32> to vector<8x128xf32>
    %281 = vector.shape_cast %277 : vector<8x128xf32> to vector<1x8x128xf32>
    tpu.vector_store %arg7[%278, %c0_69, %c0_70], %281 {strides = array<i32>} : memref<8x8x128xf32, #tpu.memory_space<vmem>>, vector<1x8x128xf32>,
    %c7_i32 = arith.constant 7 : i32
    %282 = arith.index_cast %c7_i32 : i32 to index
    %c0_71 = arith.constant 0 : index
    %c0_72 = arith.constant 0 : index
    %283 = vector.load %arg1[%282, %c0_71, %c0_72] : memref<8x8x384xf32, #tpu.memory_space<vmem>>, vector<1x8x384xf32>
    %284 = vector.shape_cast %283 : vector<1x8x384xf32> to vector<8x384xf32>
    %285 = arith.truncf %274 : vector<8x128xf32> to vector<8x128xbf16>
    %cst_73 = arith.constant dense<0.000000e+00> : vector<8x384xf32>
    %286 = tpu.matmul %285, %0, %cst_73 {dimension_numbers = #tpu.dot_dimension_numbers<[1], [0], [0], [1], [0, 0, 1, 1], [], []>} : vector<8x128xbf16>, vector<128x384xbf16>, vector<8x384xf32> -> vector<8x384xf32>
    %287 = arith.addf %286, %4 : vector<8x384xf32>
    %288 = vector.extract_strided_slice %284 {offsets = [0, 0], sizes = [8, 128], strides = [1, 1]} : vector<8x384xf32> to vector<8x128xf32>
    %289 = vector.extract_strided_slice %287 {offsets = [0, 0], sizes = [8, 128], strides = [1, 1]} : vector<8x384xf32> to vector<8x128xf32>
    %290 = arith.addf %288, %289 : vector<8x128xf32>
    %291 = arith.negf %290 : vector<8x128xf32>
    %292 = math.exp %291 : vector<8x128xf32>
    %cst_74 = arith.constant 1.000000e+00 : f32
    %293 = vector.broadcast %cst_74 : f32 to vector<8x128xf32>
    %294 = arith.addf %293, %292 : vector<8x128xf32>
    %295 = arith.divf %293, %294 : vector<8x128xf32>
    %296 = vector.extract_strided_slice %284 {offsets = [0, 128], sizes = [8, 128], strides = [1, 1]} : vector<8x384xf32> to vector<8x128xf32>
    %297 = vector.extract_strided_slice %287 {offsets = [0, 128], sizes = [8, 128], strides = [1, 1]} : vector<8x384xf32> to vector<8x128xf32>
    %298 = arith.addf %296, %297 : vector<8x128xf32>
    %299 = arith.negf %298 : vector<8x128xf32>
    %300 = math.exp %299 : vector<8x128xf32>
    %cst_75 = arith.constant 1.000000e+00 : f32
    %301 = vector.broadcast %cst_75 : f32 to vector<8x128xf32>
    %302 = arith.addf %301, %300 : vector<8x128xf32>
    %303 = arith.divf %301, %302 : vector<8x128xf32>
    %304 = vector.extract_strided_slice %284 {offsets = [0, 256], sizes = [8, 128], strides = [1, 1]} : vector<8x384xf32> to vector<8x128xf32>
    %305 = vector.extract_strided_slice %287 {offsets = [0, 256], sizes = [8, 128], strides = [1, 1]} : vector<8x384xf32> to vector<8x128xf32>
    %306 = arith.mulf %295, %305 : vector<8x128xf32>
    %307 = arith.addf %304, %306 : vector<8x128xf32>
    %308 = math.tanh %307 : vector<8x128xf32>
    %cst_76 = arith.constant 1.000000e+00 : f32
    %309 = vector.broadcast %cst_76 : f32 to vector<8x128xf32>
    %310 = arith.subf %309, %303 : vector<8x128xf32>
    %311 = arith.mulf %310, %308 : vector<8x128xf32>
    %312 = arith.mulf %303, %274 : vector<8x128xf32>
    %313 = arith.addf %311, %312 : vector<8x128xf32>
    %314 = arith.truncf %313 : vector<8x128xf32> to vector<8x128xbf16>
    %cst_77 = arith.constant dense<0.000000e+00> : vector<8x128xf32>
    %315 = tpu.matmul %314, %1, %cst_77 {dimension_numbers = #tpu.dot_dimension_numbers<[1], [0], [0], [1], [0, 0, 1, 1], [], []>} : vector<8x128xbf16>, vector<128x128xbf16>, vector<8x128xf32> -> vector<8x128xf32>
    %316 = arith.addf %315, %7 : vector<8x128xf32>
    %317 = arith.index_cast %c7_i32 : i32 to index
    %c0_78 = arith.constant 0 : index
    %c0_79 = arith.constant 0 : index
    %318 = vector.load %arg7[%317, %c0_78, %c0_79] : memref<8x8x128xf32, #tpu.memory_space<vmem>>, vector<1x8x128xf32>
    %319 = vector.shape_cast %318 : vector<1x8x128xf32> to vector<8x128xf32>
    %320 = vector.shape_cast %316 : vector<8x128xf32> to vector<1x8x128xf32>
    tpu.vector_store %arg7[%317, %c0_78, %c0_79], %320 {strides = array<i32>} : memref<8x8x128xf32, #tpu.memory_space<vmem>>, vector<1x8x128xf32>,
    %c8_i32 = arith.constant 8 : i32
    return
  }
  func.func @transform_0(%arg0: i32) -> (i32, i32, i32) {
    %c0_i32 = arith.constant 0 : i32
    %c0_i32_0 = arith.constant 0 : i32
    %c0_i32_1 = arith.constant 0 : i32
    return %c0_i32, %arg0, %c0_i32_0 : i32, i32, i32
  }
  func.func @transform_1(%arg0: i32) -> (i32, i32) {
    %c0_i32 = arith.constant 0 : i32
    %c0_i32_0 = arith.constant 0 : i32
    %c0_i32_1 = arith.constant 0 : i32
    return %c0_i32, %c0_i32_0 : i32, i32
  }
  func.func @transform_2(%arg0: i32) -> (i32, i32) {
    %c0_i32 = arith.constant 0 : i32
    %c0_i32_0 = arith.constant 0 : i32
    %c0_i32_1 = arith.constant 0 : i32
    return %c0_i32, %c0_i32_0 : i32, i32
  }
  func.func @transform_3(%arg0: i32) -> (i32, i32) {
    %c0_i32 = arith.constant 0 : i32
    %c0_i32_0 = arith.constant 0 : i32
    return %arg0, %c0_i32 : i32, i32
  }
  func.func @transform_4(%arg0: i32) -> (i32, i32) {
    %c0_i32 = arith.constant 0 : i32
    %c0_i32_0 = arith.constant 0 : i32
    %c0_i32_1 = arith.constant 0 : i32
    return %c0_i32, %c0_i32_0 : i32, i32
  }
  func.func @transform_5(%arg0: i32) -> (i32, i32) {
    %c0_i32 = arith.constant 0 : i32
    %c0_i32_0 = arith.constant 0 : i32
    %c0_i32_1 = arith.constant 0 : i32
    return %c0_i32, %c0_i32_0 : i32, i32
  }
  func.func @transform_6(%arg0: i32) -> (i32, i32, i32) {
    %c0_i32 = arith.constant 0 : i32
    %c0_i32_0 = arith.constant 0 : i32
    %c0_i32_1 = arith.constant 0 : i32
    return %c0_i32, %arg0, %c0_i32_0 : i32, i32, i32
  }
}

</mosaic_0001>

<bundles_post_ra>
// kernel: forward.4
= control target key start
LH: loop header
LB: loop body
LE: loop exit
PB: predicated region body
PF: predicated region fallthrough
CT: control target
= control target key end

     0   :  { %s848_s12 = smov 0   ;;  %s850_s13 = smov 0   ;;  %s987_s0 = inlined_call_operand.vmem [shape: bf16[64,128], index: 0, kind: input, shape index: {}]   ;;  %s988_s1 = inlined_call_operand.vmem [shape: bf16[128,384], index: 1, kind: input, shape index: {}]   ;;  %s989_s2 = inlined_call_operand.vmem [shape: f32[1,384], index: 2, kind: input, shape index: {}]   ;;  %s990_s3 = inlined_call_operand.vmem [shape: f32[64,384], index: 3, kind: output, shape index: {}]  }
   0x1   :  { %s852_s14 = smov 0   ;;  %s854_s15 = smov 0  }
   0x2   :  { %s856_s16 = smov 0  }
   0x3 LB: > { %s22_s17 = sadd.s32 1, %s822_s15  ;;  %s657_s18 = sadd.s32 4294967295, %s826_s16   ;;  %s826_s16 = sphi %s856_s16, %s13_s16   ;;  %s822_s15 = sphi %s854_s15, %s995_s15   ;;  %s818_s14 = sphi %s852_s14, %s994_s14   ;;  %s814_s13 = sphi %s850_s13, %s993_s13   ;;  %s810_s12 = sphi %s848_s12, %s992_s12  }
   0x4   : > { %p23_p0 = scmp.ge.s32.totalorder %s22_s17, 3  ;;  %p65_p1 = scmp.ne.s32.totalorder %s814_s13, %s810_s12 }
   0x5   : > { %p66_p2 = scmp.eq.s32.totalorder %s826_s16, 0  ;;  %p123_p4 = scmp.eq.s32.totalorder %s657_s18, 2 }
   0x6   : > { %s997_s17 = smov (%p23_p0, %s22_s17), 0  ;;  %s58_s20 = sadd.s32 1, %s814_s13 }
   0x7   : > { %p67_p3 = por %p66_p2, %p65_p1  ;;  %s55_s19 = ssub.s32 %s822_s15, %s997_s17 }
   0x8   : > { %p56_p5 = scmp.eq.s32.totalorder %s55_s19, 0  ;;  %p883_p6 = por %p123_p4, %p65_p1 }
   0x9   : > { %p661_p7 = scmp.ge.s32.totalorder %s826_s16, 3 }
   0xa   : > { %s888_s22 = scalar_select %p56_p5, %s814_s13, %s58_s20  }
   0xb   : > { %154 = sbr.rel (%p661_p7) target bundleno = 32 (0x20), region = 20 }
  0x12   : > { %157 = sbr.rel (!%p67_p3) target bundleno = 32 (0x20), region = 24  ;;  %s159_s23 = sand.u32 (%p67_p3), 1, %s814_s13  }
  0x13   : > { %s663_s24 = sshll.u32 (%p67_p3), %s822_s15, 2  ;;  %s662_s25 = sshll.u32 (%p67_p3), %s159_s23, 6 }
  0x14   : > { %s896_s28 = scalar_lea.vmem (%p67_p3), %s988_s1, %s663_s24  ;;  %s161_s29 = scalar_lea.vmem (%p67_p3), [#allocation2], %s662_s25 }
  0x15   : > { %v179_v0 = vld [vmem:[%s896_s28] sm:$0xf] (%p67_p3)  ;;  %v181_v1 = vld [vmem:[%s896_s28 + $0xc] sm:$0xf] (%p67_p3)  ;;  %v183_v2 = vld [vmem:[%s896_s28 + $0x18] sm:$0xf] (%p67_p3) }
  0x16   : > { %180 = vst [vmem:[%s161_s29] sm:$0xf] (%p67_p3), %v179_v0  ;;  %182 = vst [vmem:[%s161_s29 + $0x4] sm:$0xf] (%p67_p3), %v181_v1  ;;  %v185_v3 = vld [vmem:[%s896_s28 + $0x24] sm:$0xf] (%p67_p3) }
  0x17   : > { %v187_v4 = vld [vmem:[%s896_s28 + $0x30] sm:$0xf] (%p67_p3)  ;;  %184 = vst [vmem:[%s161_s29 + $0x8] sm:$0xf] (%p67_p3), %v183_v2  ;;  %186 = vst [vmem:[%s161_s29 + $0xc] sm:$0xf] (%p67_p3), %v185_v3 }
  0x18   : > { %188 = vst [vmem:[%s161_s29 + $0x10] sm:$0xf] (%p67_p3), %v187_v4  ;;  %v189_v5 = vld [vmem:[%s896_s28 + $0x3c] sm:$0xf] (%p67_p3)  ;;  %v191_v6 = vld [vmem:[%s896_s28 + $0x48] sm:$0xf] (%p67_p3) }
  0x19   : > { %v193_v7 = vld [vmem:[%s896_s28 + $0x54] sm:$0xf]  ;;  %190 = vst [vmem:[%s161_s29 + $0x14] sm:$0xf] %v189_v5  ;;  %192 = vst [vmem:[%s161_s29 + $0x18] sm:$0xf] %v191_v6 }
  0x1a   : > { %194 = vst [vmem:[%s161_s29 + $0x1c] sm:$0xf] %v193_v7  ;;  %v195_v8 = vld [vmem:[%s896_s28 + $0x60] sm:$0xf]  ;;  %v197_v9 = vld [vmem:[%s896_s28 + $0x6c] sm:$0xf] }
  0x1b   : > { %v199_v10 = vld [vmem:[%s896_s28 + $0x78] sm:$0xf]  ;;  %196 = vst [vmem:[%s161_s29 + $0x20] sm:$0xf] %v195_v8  ;;  %198 = vst [vmem:[%s161_s29 + $0x24] sm:$0xf] %v197_v9 }
  0x1c   : > { %200 = vst [vmem:[%s161_s29 + $0x28] sm:$0xf] %v199_v10  ;;  %v201_v11 = vld [vmem:[%s896_s28 + $0x84] sm:$0xf]  ;;  %v203_v12 = vld [vmem:[%s896_s28 + $0x90] sm:$0xf] }
  0x1d   : > { %v205_v13 = vld [vmem:[%s896_s28 + $0x9c] sm:$0xf]  ;;  %202 = vst [vmem:[%s161_s29 + $0x2c] sm:$0xf] %v201_v11  ;;  %204 = vst [vmem:[%s161_s29 + $0x30] sm:$0xf] %v203_v12 }
  0x1e   : > { %206 = vst [vmem:[%s161_s29 + $0x34] sm:$0xf] %v205_v13  ;;  %v207_v14 = vld [vmem:[%s896_s28 + $0xa8] sm:$0xf]  ;;  %v209_v15 = vld [vmem:[%s896_s28 + $0xb4] sm:$0xf] }
  0x1f   : > { %208 = vst [vmem:[%s161_s29 + $0x38] sm:$0xf] %v207_v14  ;;  %210 = vst [vmem:[%s161_s29 + $0x3c] sm:$0xf] %v209_v15 }
  0x20 PF: > { %p664_p8 = scmp.ge.s32.totalorder %s826_s16, 1  ;;  %p270_p9 = scmp.lt.s32.totalorder %s826_s16, 4 }
  0x22   : > { %p271_p10 = pnand %p664_p8, %p270_p9 }
  0x23   : > { %s277_s30 = sand.u32 (!%p271_p10), 1, %s810_s12   ;;  %v784_v16 = vld [vmem:[%s987_s0] sm:$0xff] (!%p271_p10)   ;;  %v785_v17 = vld [vmem:[%s987_s0 + $0x10] sm:$0xff] (!%p271_p10)   ;;  %v786_v26 = vld [vmem:[%s987_s0 + $0x8] sm:$0xff] (!%p271_p10)   ;;  %p313_p11 = scmp.lt.s32.totalorder (!%p271_p10), %s818_s14, 2 }
  0x24   : > { %274 = sbr.rel (%p271_p10) target bundleno = 298 (0x12a), region = 69  ;;  %s920_s6 = sshll.u32 (!%p271_p10), %s277_s30, 6  ;;  %712 = vmatprep.mubr.bf16.mxu0 (!%p271_p10), %v784_v16  ;;  %716 = vmatprep.mubr.bf16.mxu1 (!%p271_p10), %v785_v17  ;;  %v787_v27 = vld [vmem:[%s987_s0 + $0x18] sm:$0xff] (!%p271_p10)  }
  0x25   : > { %s926_s9 = scalar_lea.vmem (!%p271_p10), [#allocation2], %s920_s6  ;;  %s948_s25 = scalar_lea.vmem (!%p271_p10), [#allocation3], %s920_s6 }
  0x26   : > { %v776_v18 = vld [vmem:[%s926_s9] sm:$0xff] (!%p271_p10)   ;;  %v777_v19 = vld [vmem:[%s926_s9 + $0x8] sm:$0xff] (!%p271_p10)   ;;  %v778_v20 = vld [vmem:[%s926_s9 + $0x10] sm:$0xff] (!%p271_p10)  }
  0x27   : > { %696 = vmatprep.subr.bf16.mxu0 (!%p271_p10), %v776_v18  ;;  %720 = vmatprep.subr.bf16.mxu1 (!%p271_p10), %v776_v18  ;;  %v779_v21 = vld [vmem:[%s926_s9 + $0x18] sm:$0xff] (!%p271_p10)   ;;  %v780_v22 = vld [vmem:[%s926_s9 + $0x20] sm:$0xff] (!%p271_p10)   ;;  %v781_v23 = vld [vmem:[%s926_s9 + $0x28] sm:$0xff] (!%p271_p10)  }
  0x28   : > { %697 = vmatpush3.bf16.msra.mxu0 (!%p271_p10), %v776_v18  ;;  %728 = vmatpush3.bf16.msra.mxu1 (!%p271_p10), %v776_v18  ;;  %v782_v24 = vld [vmem:[%s926_s9 + $0x30] sm:$0xff] (!%p271_p10)   ;;  %v783_v25 = vld [vmem:[%s926_s9 + $0x38] sm:$0xff] (!%p271_p10)  }
  0x29   : > { %698 = vmatprep.subr.bf16.mxu0 (!%p271_p10), %v777_v19  ;;  %721 = vmatprep.subr.bf16.mxu1 (!%p271_p10), %v777_v19 }
  0x2b   : > { %s314_s19 = scalar_select %p313_p11, %s818_s14, 2 }
  0x2c   : > { %699 = vmatpush3.bf16.msra.mxu0 %v777_v19  ;;  %729 = vmatpush3.bf16.msra.mxu1 %v777_v19  ;;  %s681_s26 = sshll.u32 (%p883_p6), %s818_s14, 3 }
  0x2d   : > { %700 = vmatprep.subr.bf16.mxu0 %v778_v20  ;;  %722 = vmatprep.subr.bf16.mxu1 %v778_v20  ;;  %s315_s24 = scalar_lea.vmem %s989_s2, %s314_s19  ;;  %s505_s29 = scalar_lea.vmem (%p883_p6), %s990_s3, %s681_s26 }
  0x2e   : > { %v667_v28 = vld [vmem:[%s315_s24] ss:$0 sm:$0xff] }
  0x30   : > { %701 = vmatpush3.bf16.msra.mxu0 %v778_v20  ;;  %730 = vmatpush3.bf16.msra.mxu1 %v778_v20 }
  0x31   : > { %702 = vmatprep.subr.bf16.mxu0 %v779_v21  ;;  %723 = vmatprep.subr.bf16.mxu1 %v779_v21 }
  0x34   : > { %703 = vmatpush3.bf16.msra.mxu0 %v779_v21  ;;  %731 = vmatpush3.bf16.msra.mxu1 %v779_v21 }
  0x35   : > { %704 = vmatprep.subr.bf16.mxu0 %v780_v22  ;;  %724 = vmatprep.subr.bf16.mxu1 %v780_v22 }
  0x38   : > { %705 = vmatpush3.bf16.msra.mxu0 %v780_v22  ;;  %732 = vmatpush3.bf16.msra.mxu1 %v780_v22 }
  0x39   : > { %706 = vmatprep.subr.bf16.mxu0 %v781_v23  ;;  %725 = vmatprep.subr.bf16.mxu1 %v781_v23 }
  0x3c   : > { %707 = vmatpush3.bf16.msra.mxu0 %v781_v23  ;;  %733 = vmatpush3.bf16.msra.mxu1 %v781_v23 }
  0x3d   : > { %708 = vmatprep.subr.bf16.mxu0 %v782_v24  ;;  %726 = vmatprep.subr.bf16.mxu1 %v782_v24 }
  0x40   : > { %709 = vmatpush3.bf16.msra.mxu0 %v782_v24  ;;  %734 = vmatpush3.bf16.msra.mxu1 %v782_v24 }
  0x41   : > { %710 = vmatprep.subr.bf16.mxu0 %v783_v25  ;;  %727 = vmatprep.subr.bf16.mxu1 %v783_v25 }
  0x44   : > { %711 = vmatpush3.bf16.msra.mxu0 %v783_v25  ;;  %735 = vmatpush3.bf16.msra.mxu1 %v783_v25 }
  0x47   : > { %713 = vmatmul.mubr.bf16.vlgmr.msra.gmra.mrb[0].mxu0 %v786_v26  ;;  %717 = vmatmul.mubr.bf16.vlgmr.msra.gmra.mrb[0].mxu1 %v787_v27 }
 0x11a   : > { %v714_v29 = vpop.f32.mrb[0].mxu0  ;;  %v718_v30 = vpop.f32.mrb[0].mxu1  ;;  %500 = sbr.rel (!%p883_p6) target bundleno = 298 (0x12a), region = 77 }
 0x11b   : > { %v464_v31 = vadd.f32 %v714_v29, %v667_v28  ;;  %v480_v32 = vadd.f32 %v718_v30, %v667_v28  ;;  %v455_v33 = vpop.f32.mrb[1].mxu0  ;;  %v471_v34 = vpop.f32.mrb[1].mxu1 }
 0x11c   : > { %v456_v35 = vadd.f32 %v667_v28, %v455_v33  ;;  %v472_v36 = vadd.f32 %v667_v28, %v471_v34  ;;  %v715_v37 = vpop.f32.mrb[2].mxu0  ;;  %v719_v38 = vpop.f32.mrb[2].mxu1 }
 0x11d   : > { %488 = vst [vmem:[%s948_s25 + $0x10] sm:$0xff] %v464_v31  ;;  %492 = vst [vmem:[%s948_s25 + $0x30] sm:$0xff] %v480_v32  ;;  %v467_v39 = vadd.f32 %v715_v37, %v667_v28  ;;  %v483_v40 = vadd.f32 %v719_v38, %v667_v28  ;;  %v458_v41 = vpop.f32.mrb[3].mxu0  ;;  %v474_v42 = vpop.f32.mrb[3].mxu1 }
 0x11e   : > { %486 = vst [vmem:[%s948_s25] sm:$0xff] %v456_v35  ;;  %490 = vst [vmem:[%s948_s25 + $0x20] sm:$0xff] %v472_v36  ;;  %v459_v43 = vadd.f32 %v667_v28, %v458_v41  ;;  %v475_v44 = vadd.f32 %v667_v28, %v474_v42 }
 0x11f   : > { %489 = vst [vmem:[%s948_s25 + $0x18] sm:$0xff] %v467_v39  ;;  %493 = vst [vmem:[%s948_s25 + $0x38] sm:$0xff] %v483_v40 }
 0x120   : > { %487 = vst [vmem:[%s948_s25 + $0x8] sm:$0xff] %v459_v43  ;;  %491 = vst [vmem:[%s948_s25 + $0x28] sm:$0xff] %v475_v44 }
 0x124   : > { %v551_v47 = vld [vmem:[%s948_s25 + $0x10] sm:$0xff] }
 0x125   : > { %v547_v45 = vld [vmem:[%s948_s25] sm:$0xff]  ;;  %552 = vst [vmem:[%s505_s29 + $0x30] sm:$0xff] %v551_v47  ;;  %v559_v51 = vld [vmem:[%s948_s25 + $0x30] sm:$0xff] }
 0x126   : > { %v553_v48 = vld [vmem:[%s948_s25 + $0x18] sm:$0xff]  ;;  %v555_v49 = vld [vmem:[%s948_s25 + $0x20] sm:$0xff]  ;;  %548 = vst [vmem:[%s505_s29] sm:$0xff] %v547_v45  ;;  %560 = vst [vmem:[%s505_s29 + $0x90] sm:$0xff] %v559_v51 }
 0x127   : > { %v549_v46 = vld [vmem:[%s948_s25 + $0x8] sm:$0xff]  ;;  %554 = vst [vmem:[%s505_s29 + $0x48] sm:$0xff] %v553_v48  ;;  %556 = vst [vmem:[%s505_s29 + $0x60] sm:$0xff] %v555_v49  ;;  %v561_v52 = vld [vmem:[%s948_s25 + $0x38] sm:$0xff] }
 0x128   : > { %v557_v50 = vld [vmem:[%s948_s25 + $0x28] sm:$0xff]  ;;  %550 = vst [vmem:[%s505_s29 + $0x18] sm:$0xff] %v549_v46  ;;  %562 = vst [vmem:[%s505_s29 + $0xa8] sm:$0xff] %v561_v52 }
 0x129   : > { %558 = vst [vmem:[%s505_s29 + $0x78] sm:$0xff] %v557_v50 }
 0x12a PF: > { %s13_s16 = sadd.s32 1, %s826_s16   ;;  %s992_s12 = smov %s814_s13 }
 0x12b   : > { %p10_p12 = scmp.ge.s32.totalorder %s13_s16, 5   ;;  %s993_s13 = smov %s888_s22 }
 0x12c   : > { %s994_s14 = smov %s822_s15  ;;  %s995_s15 = smov %s997_s17 }
 0x12d   :  { %12 = sbr.rel (!%p10_p12) target bundleno = 3 (0x3), region = 152 }

// kernel: forward.5
= control target key start
LH: loop header
LB: loop body
LE: loop exit
PB: predicated region body
PF: predicated region fallthrough
CT: control target
= control target key end

     0   :  { %v1470_v1 = vmov 0.0   ;;  %v1471_v2 = vmov 0   ;;  %vm1472_vm0 = vmmov 0   ;;  %v49_v26 = vlaneseq  ;;  %s2055_s1 = inlined_call_operand.vmem [shape: bf16[128,384], index: 1, kind: input, shape index: {}]   ;;  %s2056_s2 = inlined_call_operand.vmem [shape: f32[1,384], index: 2, kind: input, shape index: {}]   ;;  %s2057_s0 = inlined_call_operand.vmem [shape: f32[8,8,384], index: 0, kind: input, shape index: {}]   ;;  %s2058_s3 = inlined_call_operand.vmem [shape: f32[8,128], index: 3, kind: output, shape index: {}]  }
   0x1   :  { %v1496_v0 = vld [vmem:[%s2055_s1 + $0x4] ss:$12 sps:$4 sm:$0xff]   ;;  %1184 = vmatprep.subr.bf16.mxu1 %v1470_v1  ;;  %227 = vmatprep.mubr.bf16.mxu0 %v1471_v2  ;;  %v1503_v3 = vld [vmem:[%s2055_s1] ss:$12 sps:$4 sm:$0xff]   ;;  %v1511_v4 = vld [vmem:[%s2055_s1 + $0x1c] ss:$12 sps:$4 sm:$0xff]  }
   0x2   :  { %1200 = vmatprep.mubr.msk.bf16.mxu1 %vm1472_vm0, %v1470_v1  ;;  %195 = vmatprep.subr.bf16.mxu0 %v1496_v0  ;;  %v1517_v5 = vld [vmem:[%s2055_s1 + $0x18] ss:$12 sps:$4 sm:$0xff]   ;;  %v1523_v6 = vld [vmem:[%s2055_s1 + $0x34] ss:$12 sps:$4 sm:$0xff]   ;;  %v1529_v7 = vld [vmem:[%s2055_s1 + $0x30] ss:$12 sps:$4 sm:$0xff]  }
   0x3   :  { %196 = vmatpush1.bf16.msra.mxu0 %v1503_v3  ;;  %v1535_v8 = vld [vmem:[%s2055_s1 + $0x4c] ss:$12 sps:$4 sm:$0xff]   ;;  %v1540_v9 = vld [vmem:[%s2055_s1 + $0x8] ss:$12 sps:$4 sm:$0xff]   ;;  %v1551_v11 = vld [vmem:[%s2055_s1 + $0x64] ss:$12 sps:$4 sm:$0xff]  }
   0x4   :  { %197 = vmatprep.subr.bf16.mxu0 %v1511_v4  ;;  %v1546_v10 = vld [vmem:[%s2055_s1 + $0x48] ss:$12 sps:$4 sm:$0xff]   ;;  %1185 = vmatpush3.bf16.msra.mxu1 %v1540_v9  ;;  %v1558_v12 = vld [vmem:[%s2055_s1 + $0x20] ss:$12 sps:$4 sm:$0xff]   ;;  %v1577_v15 = vld [vmem:[%s2055_s1 + $0x38] ss:$12 sps:$4 sm:$0xff]  }
   0x5   :  { %1186 = vmatprep.subr.bf16.mxu1 %v1470_v1  ;;  %v1564_v13 = vld [vmem:[%s2055_s1 + $0x60] ss:$12 sps:$4 sm:$0xff]   ;;  %v1570_v14 = vld [vmem:[%s2055_s1 + $0x7c] ss:$12 sps:$4 sm:$0xff]   ;;  %v1584_v16 = vld [vmem:[%s2055_s1 + $0x78] ss:$12 sps:$4 sm:$0xff]  }
   0x6   :  { %v1590_v17 = vld [vmem:[%s2055_s1 + $0x94] ss:$12 sps:$4 sm:$0xff]   ;;  %v1596_v18 = vld [vmem:[%s2055_s1 + $0x50] ss:$12 sps:$4 sm:$0xff]   ;;  %v1609_v20 = vld [vmem:[%s2055_s1 + $0xac] ss:$12 sps:$4 sm:$0xff]  }
   0x7   :  { %198 = vmatpush1.bf16.msra.mxu0 %v1517_v5  ;;  %v1603_v19 = vld [vmem:[%s2055_s1 + $0x90] ss:$12 sps:$4 sm:$0xff]   ;;  %v1615_v21 = vld [vmem:[%s2055_s1 + $0x68] ss:$12 sps:$4 sm:$0xff]   ;;  %v1629_v23 = vld [vmem:[%s2055_s1 + $0x80] ss:$12 sps:$4 sm:$0xff]  }
   0x8   :  { %199 = vmatprep.subr.bf16.mxu0 %v1523_v6  ;;  %1187 = vmatpush3.bf16.msra.mxu1 %v1558_v12  ;;  %v1622_v22 = vld [vmem:[%s2055_s1 + $0xa8] ss:$12 sps:$4 sm:$0xff]   ;;  %v1637_v24 = vld [vmem:[%s2055_s1 + $0x98] ss:$12 sps:$4 sm:$0xff]   ;;  %v1648_v25 = vld [vmem:[%s2055_s1 + $0xb0] ss:$12 sps:$4 sm:$0xff]  }
   0x9   :  { %1188 = vmatprep.subr.bf16.mxu1 %v1470_v1  ;;  %v50_v27 = vshrl.u32 %v49_v26, 7  ;;  %v47_v29 = vld [vmem:[%s2056_s2] sm:$0x7]  ;;  %v65_v40 = vld [vmem:[%s2057_s0 + $0x8] sm:$0xff]  ;;  %v66_v57 = vld [vmem:[%s2057_s0 + $0x10] sm:$0xff] }
   0xa   :  { %v64_v33 = vld [vmem:[%s2057_s0] sm:$0xff] }
   0xb   :  { %200 = vmatpush1.bf16.msra.mxu0 %v1529_v7  ;;  %v51_v28 = vsub.s32 0, %v50_v27  ;;  %v55_v30 = vsub.s32 1, %v50_v27  ;;  %v59_v51 = vsub.s32 2, %v50_v27 }
   0xc   :  { %201 = vmatprep.subr.bf16.mxu0 %v1535_v8  ;;  %1189 = vmatpush3.bf16.msra.mxu1 %v1577_v15 }
   0xd   :  { %1190 = vmatprep.subr.bf16.mxu1 %v1470_v1  ;;  %v1690_v31 = vrot.slane %v47_v29, %v51_v28  ;;  %v1692_v32 = vrot.slane %v47_v29, %v55_v30  ;;  %v1702_v52 = vrot.slane %v47_v29, %v59_v51  ;;  %v1077_v29 = vld [vmem:[%s2057_s0 + $0x18] sm:$0xff] }
   0xf   :  { %202 = vmatpush1.bf16.msra.mxu0 %v1546_v10 }
  0x10   :  { %203 = vmatprep.subr.bf16.mxu0 %v1551_v11  ;;  %1191 = vmatpush3.bf16.msra.mxu1 %v1596_v18 }
  0x11   :  { %1192 = vmatprep.subr.bf16.mxu1 %v1470_v1 }
  0x13   :  { %204 = vmatpush1.bf16.msra.mxu0 %v1564_v13 }
  0x14   :  { %205 = vmatprep.subr.bf16.mxu0 %v1570_v14  ;;  %1193 = vmatpush3.bf16.msra.mxu1 %v1615_v21 }
  0x15   :  { %1194 = vmatprep.subr.bf16.mxu1 %v1470_v1 }
  0x17   :  { %206 = vmatpush1.bf16.msra.mxu0 %v1584_v16 }
  0x18   :  { %207 = vmatprep.subr.bf16.mxu0 %v1590_v17  ;;  %1195 = vmatpush3.bf16.msra.mxu1 %v1629_v23 }
  0x19   :  { %1196 = vmatprep.subr.bf16.mxu1 %v1470_v1 }
  0x1b   :  { %208 = vmatpush1.bf16.msra.mxu0 %v1603_v19 }
  0x1c   :  { %209 = vmatprep.subr.bf16.mxu0 %v1609_v20  ;;  %1197 = vmatpush3.bf16.msra.mxu1 %v1637_v24 }
  0x1d   :  { %1198 = vmatprep.subr.bf16.mxu1 %v1470_v1 }
  0x1f   :  { %210 = vmatpush1.bf16.msra.mxu0 %v1622_v22 }
  0x20   :  { %302 = vmatprep.subr.bf16.mxu0 %v1496_v0  ;;  %1199 = vmatpush3.bf16.msra.mxu1 %v1648_v25 }
  0x21   :  { %1204 = vmatprep.subr.bf16.mxu1 %v1470_v1 }
  0x22   :  { %228 = vmatmul.mubr.bf16.vlgmr.msra.gmra.mrb[0].mxu0 %v1471_v2 }
  0x23   :  { %303 = vmatpush1.bf16.msra.mxu0 %v1503_v3  ;;  %334 = vmatprep.mubr.bf16.mxu0 %v1471_v2 }
  0x24   :  { %304 = vmatprep.subr.bf16.mxu0 %v1511_v4  ;;  %1201 = vmatmul.mubr.bf16.vlgmr.msra.gmra.mrb[0].mxu1 %v1471_v2 }
  0x25   :  { %1205 = vmatpush3.bf16.msra.mxu1 %v1540_v9  ;;  %1220 = vmatprep.mubr.msk.bf16.mxu1 %vm1472_vm0, %v1470_v1 }
  0x26   :  { %1206 = vmatprep.subr.bf16.mxu1 %v1470_v1 }
  0x27   :  { %305 = vmatpush1.bf16.msra.mxu0 %v1517_v5 }
  0x28   :  { %306 = vmatprep.subr.bf16.mxu0 %v1523_v6 }
  0x29   :  { %1207 = vmatpush3.bf16.msra.mxu1 %v1558_v12 }
  0x2a   :  { %1208 = vmatprep.subr.bf16.mxu1 %v1470_v1 }
  0x2b   :  { %307 = vmatpush1.bf16.msra.mxu0 %v1529_v7 }
  0x2c   :  { %308 = vmatprep.subr.bf16.mxu0 %v1535_v8 }
  0x2d   :  { %1209 = vmatpush3.bf16.msra.mxu1 %v1577_v15 }
  0x2e   :  { %1210 = vmatprep.subr.bf16.mxu1 %v1470_v1 }
  0x2f   :  { %309 = vmatpush1.bf16.msra.mxu0 %v1546_v10 }
  0x30   :  { %310 = vmatprep.subr.bf16.mxu0 %v1551_v11 }
  0x31   :  { %1211 = vmatpush3.bf16.msra.mxu1 %v1596_v18 }
  0x32   :  { %1212 = vmatprep.subr.bf16.mxu1 %v1470_v1 }
  0x33   :  { %311 = vmatpush1.bf16.msra.mxu0 %v1564_v13 }
  0x34   :  { %312 = vmatprep.subr.bf16.mxu0 %v1570_v14 }
  0x35   :  { %1213 = vmatpush3.bf16.msra.mxu1 %v1615_v21 }
  0x36   :  { %1214 = vmatprep.subr.bf16.mxu1 %v1470_v1 }
  0x37   :  { %313 = vmatpush1.bf16.msra.mxu0 %v1584_v16 }
  0x38   :  { %314 = vmatprep.subr.bf16.mxu0 %v1590_v17 }
  0x39   :  { %1215 = vmatpush3.bf16.msra.mxu1 %v1629_v23 }
  0x3a   :  { %1216 = vmatprep.subr.bf16.mxu1 %v1470_v1 }
  0x3b   :  { %315 = vmatpush1.bf16.msra.mxu0 %v1603_v19 }
  0x3c   :  { %316 = vmatprep.subr.bf16.mxu0 %v1609_v20 }
  0x3d   :  { %1217 = vmatpush3.bf16.msra.mxu1 %v1637_v24 }
  0x3e   :  { %1218 = vmatprep.subr.bf16.mxu1 %v1470_v1 }
  0x3f   :  { %317 = vmatpush1.bf16.msra.mxu0 %v1622_v22 }
  0x40   :  { %409 = vmatprep.subr.bf16.mxu0 %v1496_v0 }
  0x41   :  { %1219 = vmatpush3.bf16.msra.mxu1 %v1648_v25 }
  0x42   :  { %1224 = vmatprep.subr.bf16.mxu1 %v1470_v1 }
  0xf5   :  { %v229_v34 = vpop.f32.mrb[0].mxu0 }
  0xf6   :  { %v230_v35 = vadd.f32 %v229_v34, %v1690_v31  ;;  %v231_v36 = vpop.f32.mrb[1].mxu0 }
  0xf7   :  { %v232_v37 = vadd.f32 %v231_v36, %v1692_v32  ;;  %v233_v38 = vpop.f32.mrb[2].mxu0  ;;  %v270_v44 = vpop.f32.mrb[0].mxu1 }
  0xf8   :  { %v276_v39 = vadd.f32 %v230_v35, %v64_v33  ;;  %v234_v41 = vpop.f32.mrb[3].mxu0  ;;  %v1202_v46 = vpop.f32.mrb[1].mxu1  ;;  %v271_v55 = vadd.f32 %v270_v44, %v1702_v52 }
  0xf9   :  { %v283_v43 = vadd.f32 %v232_v37, %v65_v40  ;;  %v273_v47 = vpop.f32.mrb[2].mxu1  ;;  %v1078_v41 = vld [vmem:[%s2057_s0 + $0x20] sm:$0xff] }
  0xfa   :  { %v1075_v42 = vmul.f32 -1.442695, %v276_v39  ;;  %v1203_v48 = vpop.f32.mrb[3].mxu1 }
  0xfb   :  { %v1076_v45 = vmul.f32 -1.442695, %v283_v43 }
  0xfc   :  { %1379 = vpow2.f32 %v1075_v42 }
  0xfd   :  { %1381 = vpow2.f32 %v1076_v45 }
 0x106   :  { %v1380_v49 = vpop.eup %1379 }
 0x107   :  { %v280_v50 = vadd.f32 1.0, %v1380_v49  ;;  %v1382_v53 = vpop.eup %1381 }
 0x108   :  { %v287_v54 = vadd.f32 1.0, %v1382_v53 }
 0x109   :  { %1383 = vrcp.f32 %v280_v50 }
 0x10a   :  { %1385 = vrcp.f32 %v287_v54  ;;  %v1079_v54 = vld [vmem:[%s2057_s0 + $0x28] sm:$0xff] }
 0x113   :  { %v1384_v56 = vpop.eup %1383 }
 0x114   :  { %v290_v58 = vmul.f32 %v1384_v56, %v271_v55  ;;  %v1386_v60 = vpop.eup %1385 }
 0x115   :  { %v293_v61 = vsub.f32 1.0, %v1386_v60  ;;  %v295_v26 = vmul.f32 0.0, %v1386_v60 }
 0x116   :  { %v291_v59 = vadd.f32 %v290_v58, %v66_v57 }
 0x118   :  { %1387 = vtanh.f32 %v291_v59 }
 0x122   :  { %v1388_v62 = vpop.eup %1387 }
 0x123   :  { %v294_v63 = vmul.f32 %v1388_v62, %v293_v61 }
 0x125   :  { %v1708_v27 = vadd.f32 %v295_v26, %v294_v63  ;;  %v1082_v26 = vld [vmem:[%s2057_s0 + $0x30] sm:$0xff] }
 0x127   :  { %v301_v28 = vpack.c.bf16 %v1708_v27, %v1708_v27 }
 0x129   :  { %335 = vmatmul.mubr.bf16.vlgmr.msra.gmra.mrb[4].mxu0 %v301_v28  ;;  %1221 = vmatmul.mubr.bf16.vlgmr.msra.gmra.mrb[4].mxu1 %v301_v28 }
 0x12a   :  { %410 = vmatpush1.bf16.msra.mxu0 %v1503_v3  ;;  %1225 = vmatpush3.bf16.msra.mxu1 %v1540_v9 }
 0x12b   :  { %411 = vmatprep.subr.bf16.mxu0 %v1511_v4  ;;  %1226 = vmatprep.subr.bf16.mxu1 %v1470_v1 }
 0x12c   :  { %441 = vmatprep.mubr.bf16.mxu0 %v1471_v2  ;;  %1240 = vmatprep.mubr.msk.bf16.mxu1 %vm1472_vm0, %v1470_v1 }
 0x12e   :  { %412 = vmatpush1.bf16.msra.mxu0 %v1517_v5  ;;  %1227 = vmatpush3.bf16.msra.mxu1 %v1558_v12 }
 0x12f   :  { %413 = vmatprep.subr.bf16.mxu0 %v1523_v6  ;;  %1228 = vmatprep.subr.bf16.mxu1 %v1470_v1 }
 0x132   :  { %414 = vmatpush1.bf16.msra.mxu0 %v1529_v7  ;;  %1229 = vmatpush3.bf16.msra.mxu1 %v1577_v15 }
 0x133   :  { %415 = vmatprep.subr.bf16.mxu0 %v1535_v8  ;;  %1230 = vmatprep.subr.bf16.mxu1 %v1470_v1 }
 0x136   :  { %416 = vmatpush1.bf16.msra.mxu0 %v1546_v10  ;;  %1231 = vmatpush3.bf16.msra.mxu1 %v1596_v18 }
 0x137   :  { %417 = vmatprep.subr.bf16.mxu0 %v1551_v11  ;;  %1232 = vmatprep.subr.bf16.mxu1 %v1470_v1 }
 0x13a   :  { %418 = vmatpush1.bf16.msra.mxu0 %v1564_v13  ;;  %1233 = vmatpush3.bf16.msra.mxu1 %v1615_v21 }
 0x13b   :  { %419 = vmatprep.subr.bf16.mxu0 %v1570_v14  ;;  %1234 = vmatprep.subr.bf16.mxu1 %v1470_v1 }
 0x13e   :  { %420 = vmatpush1.bf16.msra.mxu0 %v1584_v16  ;;  %1235 = vmatpush3.bf16.msra.mxu1 %v1629_v23 }
 0x13f   :  { %421 = vmatprep.subr.bf16.mxu0 %v1590_v17  ;;  %1236 = vmatprep.subr.bf16.mxu1 %v1470_v1 }
 0x142   :  { %422 = vmatpush1.bf16.msra.mxu0 %v1603_v19  ;;  %1237 = vmatpush3.bf16.msra.mxu1 %v1637_v24 }
 0x143   :  { %423 = vmatprep.subr.bf16.mxu0 %v1609_v20  ;;  %1238 = vmatprep.subr.bf16.mxu1 %v1470_v1 }
 0x146   :  { %424 = vmatpush1.bf16.msra.mxu0 %v1622_v22  ;;  %1239 = vmatpush3.bf16.msra.mxu1 %v1648_v25 }
 0x147   :  { %516 = vmatprep.subr.bf16.mxu0 %v1496_v0  ;;  %1244 = vmatprep.subr.bf16.mxu1 %v1470_v1 }
 0x1fc   :  { %v336_v30 = vpop.f32.mrb[4].mxu0  ;;  %v377_v33 = vpop.f32.mrb[4].mxu1 }
 0x1fd   :  { %v337_v34 = vadd.f32 %v336_v30, %v1690_v31  ;;  %v338_v35 = vpop.f32.mrb[5].mxu0  ;;  %v1222_v36 = vpop.f32.mrb[5].mxu1  ;;  %v378_v51 = vadd.f32 %v377_v33, %v1702_v52 }
 0x1fe   :  { %v339_v37 = vadd.f32 %v338_v35, %v1692_v32  ;;  %v340_v38 = vpop.f32.mrb[6].mxu0  ;;  %v380_v39 = vpop.f32.mrb[6].mxu1 }
 0x1ff   :  { %v383_v40 = vadd.f32 %v1077_v29, %v337_v34  ;;  %v341_v42 = vpop.f32.mrb[7].mxu0  ;;  %v1223_v43 = vpop.f32.mrb[7].mxu1  ;;  %v1083_v38 = vld [vmem:[%s2057_s0 + $0x38] sm:$0xff] }
 0x200   :  { %v390_v45 = vadd.f32 %v1078_v41, %v339_v37 }
 0x201   :  { %v1080_v44 = vmul.f32 -1.442695, %v383_v40 }
 0x202   :  { %v1081_v46 = vmul.f32 -1.442695, %v390_v45 }
 0x203   :  { %1389 = vpow2.f32 %v1080_v44 }
 0x204   :  { %1391 = vpow2.f32 %v1081_v46 }
 0x20d   :  { %v1390_v47 = vpop.eup %1389 }
 0x20e   :  { %v387_v48 = vadd.f32 1.0, %v1390_v47  ;;  %v1392_v49 = vpop.eup %1391 }
 0x20f   :  { %v394_v50 = vadd.f32 1.0, %v1392_v49 }
 0x210   :  { %1393 = vrcp.f32 %v387_v48 }
 0x211   :  { %1395 = vrcp.f32 %v394_v50  ;;  %v1084_v50 = vld [vmem:[%s2057_s0 + $0x40] sm:$0xff] }
 0x21a   :  { %v1394_v53 = vpop.eup %1393 }
 0x21b   :  { %v397_v55 = vmul.f32 %v1394_v53, %v378_v51  ;;  %v1396_v57 = vpop.eup %1395 }
 0x21c   :  { %v400_v58 = vsub.f32 1.0, %v1396_v57  ;;  %v402_v61 = vmul.f32 %v1396_v57, %v1708_v27 }
 0x21d   :  { %v398_v56 = vadd.f32 %v1079_v54, %v397_v55 }
 0x21f   :  { %1397 = vtanh.f32 %v398_v56 }
 0x229   :  { %v1398_v59 = vpop.eup %1397 }
 0x22a   :  { %v401_v60 = vmul.f32 %v1398_v59, %v400_v58 }
 0x22c   :  { %v1760_v62 = vadd.f32 %v402_v61, %v401_v60  ;;  %v1087_v61 = vld [vmem:[%s2057_s0 + $0x48] sm:$0xff] }
 0x22e   :  { %v408_v63 = vpack.c.bf16 %v1760_v62, %v1760_v62 }
 0x230   :  { %442 = vmatmul.mubr.bf16.vlgmr.msra.gmra.mrb[8].mxu0 %v408_v63  ;;  %1241 = vmatmul.mubr.bf16.vlgmr.msra.gmra.mrb[8].mxu1 %v408_v63 }
 0x231   :  { %517 = vmatpush1.bf16.msra.mxu0 %v1503_v3  ;;  %1245 = vmatpush3.bf16.msra.mxu1 %v1540_v9 }
 0x232   :  { %518 = vmatprep.subr.bf16.mxu0 %v1511_v4  ;;  %1246 = vmatprep.subr.bf16.mxu1 %v1470_v1 }
 0x233   :  { %548 = vmatprep.mubr.bf16.mxu0 %v1471_v2  ;;  %1260 = vmatprep.mubr.msk.bf16.mxu1 %vm1472_vm0, %v1470_v1 }
 0x235   :  { %519 = vmatpush1.bf16.msra.mxu0 %v1517_v5  ;;  %1247 = vmatpush3.bf16.msra.mxu1 %v1558_v12 }
 0x236   :  { %520 = vmatprep.subr.bf16.mxu0 %v1523_v6  ;;  %1248 = vmatprep.subr.bf16.mxu1 %v1470_v1 }
 0x239   :  { %521 = vmatpush1.bf16.msra.mxu0 %v1529_v7  ;;  %1249 = vmatpush3.bf16.msra.mxu1 %v1577_v15 }
 0x23a   :  { %522 = vmatprep.subr.bf16.mxu0 %v1535_v8  ;;  %1250 = vmatprep.subr.bf16.mxu1 %v1470_v1 }
 0x23d   :  { %523 = vmatpush1.bf16.msra.mxu0 %v1546_v10  ;;  %1251 = vmatpush3.bf16.msra.mxu1 %v1596_v18 }
 0x23e   :  { %524 = vmatprep.subr.bf16.mxu0 %v1551_v11  ;;  %1252 = vmatprep.subr.bf16.mxu1 %v1470_v1 }
 0x241   :  { %525 = vmatpush1.bf16.msra.mxu0 %v1564_v13  ;;  %1253 = vmatpush3.bf16.msra.mxu1 %v1615_v21 }
 0x242   :  { %526 = vmatprep.subr.bf16.mxu0 %v1570_v14  ;;  %1254 = vmatprep.subr.bf16.mxu1 %v1470_v1 }
 0x245   :  { %527 = vmatpush1.bf16.msra.mxu0 %v1584_v16  ;;  %1255 = vmatpush3.bf16.msra.mxu1 %v1629_v23 }
 0x246   :  { %528 = vmatprep.subr.bf16.mxu0 %v1590_v17  ;;  %1256 = vmatprep.subr.bf16.mxu1 %v1470_v1 }
 0x249   :  { %529 = vmatpush1.bf16.msra.mxu0 %v1603_v19  ;;  %1257 = vmatpush3.bf16.msra.mxu1 %v1637_v24 }
 0x24a   :  { %530 = vmatprep.subr.bf16.mxu0 %v1609_v20  ;;  %1258 = vmatprep.subr.bf16.mxu1 %v1470_v1 }
 0x24d   :  { %531 = vmatpush1.bf16.msra.mxu0 %v1622_v22  ;;  %1259 = vmatpush3.bf16.msra.mxu1 %v1648_v25 }
 0x24e   :  { %623 = vmatprep.subr.bf16.mxu0 %v1496_v0  ;;  %1264 = vmatprep.subr.bf16.mxu1 %v1470_v1 }
 0x303   :  { %v443_v27 = vpop.f32.mrb[8].mxu0  ;;  %v484_v28 = vpop.f32.mrb[8].mxu1 }
 0x304   :  { %v444_v29 = vadd.f32 %v443_v27, %v1690_v31  ;;  %v445_v30 = vpop.f32.mrb[9].mxu0  ;;  %v1242_v33 = vpop.f32.mrb[9].mxu1  ;;  %v485_v48 = vadd.f32 %v484_v28, %v1702_v52 }
 0x305   :  { %v446_v34 = vadd.f32 %v445_v30, %v1692_v32  ;;  %v447_v35 = vpop.f32.mrb[10].mxu0  ;;  %v487_v36 = vpop.f32.mrb[10].mxu1 }
 0x306   :  { %v490_v37 = vadd.f32 %v1082_v26, %v444_v29  ;;  %v448_v39 = vpop.f32.mrb[11].mxu0  ;;  %v1243_v40 = vpop.f32.mrb[11].mxu1  ;;  %v1088_v35 = vld [vmem:[%s2057_s0 + $0x50] sm:$0xff] }
 0x307   :  { %v497_v42 = vadd.f32 %v1083_v38, %v446_v34 }
 0x308   :  { %v1085_v41 = vmul.f32 -1.442695, %v490_v37 }
 0x309   :  { %v1086_v43 = vmul.f32 -1.442695, %v497_v42 }
 0x30a   :  { %1399 = vpow2.f32 %v1085_v41 }
 0x30b   :  { %1401 = vpow2.f32 %v1086_v43 }
 0x314   :  { %v1400_v44 = vpop.eup %1399 }
 0x315   :  { %v494_v45 = vadd.f32 1.0, %v1400_v44  ;;  %v1402_v46 = vpop.eup %1401 }
 0x316   :  { %v501_v47 = vadd.f32 1.0, %v1402_v46 }
 0x317   :  { %1403 = vrcp.f32 %v494_v45 }
 0x318   :  { %1405 = vrcp.f32 %v501_v47  ;;  %v1089_v47 = vld [vmem:[%s2057_s0 + $0x58] sm:$0xff] }
 0x321   :  { %v1404_v49 = vpop.eup %1403 }
 0x322   :  { %v504_v51 = vmul.f32 %v1404_v49, %v485_v48  ;;  %v1406_v54 = vpop.eup %1405 }
 0x323   :  { %v507_v55 = vsub.f32 1.0, %v1406_v54  ;;  %v509_v58 = vmul.f32 %v1406_v54, %v1760_v62 }
 0x324   :  { %v505_v53 = vadd.f32 %v1084_v50, %v504_v51 }
 0x326   :  { %1407 = vtanh.f32 %v505_v53 }
 0x330   :  { %v1408_v56 = vpop.eup %1407 }
 0x331   :  { %v508_v57 = vmul.f32 %v1408_v56, %v507_v55 }
 0x333   :  { %v1812_v59 = vadd.f32 %v509_v58, %v508_v57  ;;  %v1092_v58 = vld [vmem:[%s2057_s0 + $0x60] sm:$0xff] }
 0x335   :  { %v515_v60 = vpack.c.bf16 %v1812_v59, %v1812_v59 }
 0x337   :  { %549 = vmatmul.mubr.bf16.vlgmr.msra.gmra.mrb[12].mxu0 %v515_v60  ;;  %1261 = vmatmul.mubr.bf16.vlgmr.msra.gmra.mrb[12].mxu1 %v515_v60 }
 0x338   :  { %624 = vmatpush1.bf16.msra.mxu0 %v1503_v3  ;;  %1265 = vmatpush3.bf16.msra.mxu1 %v1540_v9 }
 0x339   :  { %625 = vmatprep.subr.bf16.mxu0 %v1511_v4  ;;  %1266 = vmatprep.subr.bf16.mxu1 %v1470_v1 }
 0x33a   :  { %655 = vmatprep.mubr.bf16.mxu0 %v1471_v2  ;;  %1280 = vmatprep.mubr.msk.bf16.mxu1 %vm1472_vm0, %v1470_v1 }
 0x33c   :  { %626 = vmatpush1.bf16.msra.mxu0 %v1517_v5  ;;  %1267 = vmatpush3.bf16.msra.mxu1 %v1558_v12 }
 0x33d   :  { %627 = vmatprep.subr.bf16.mxu0 %v1523_v6  ;;  %1268 = vmatprep.subr.bf16.mxu1 %v1470_v1 }
 0x340   :  { %628 = vmatpush1.bf16.msra.mxu0 %v1529_v7  ;;  %1269 = vmatpush3.bf16.msra.mxu1 %v1577_v15 }
 0x341   :  { %629 = vmatprep.subr.bf16.mxu0 %v1535_v8  ;;  %1270 = vmatprep.subr.bf16.mxu1 %v1470_v1 }
 0x344   :  { %630 = vmatpush1.bf16.msra.mxu0 %v1546_v10  ;;  %1271 = vmatpush3.bf16.msra.mxu1 %v1596_v18 }
 0x345   :  { %631 = vmatprep.subr.bf16.mxu0 %v1551_v11  ;;  %1272 = vmatprep.subr.bf16.mxu1 %v1470_v1 }
 0x348   :  { %632 = vmatpush1.bf16.msra.mxu0 %v1564_v13  ;;  %1273 = vmatpush3.bf16.msra.mxu1 %v1615_v21 }
 0x349   :  { %633 = vmatprep.subr.bf16.mxu0 %v1570_v14  ;;  %1274 = vmatprep.subr.bf16.mxu1 %v1470_v1 }
 0x34c   :  { %634 = vmatpush1.bf16.msra.mxu0 %v1584_v16  ;;  %1275 = vmatpush3.bf16.msra.mxu1 %v1629_v23 }
 0x34d   :  { %635 = vmatprep.subr.bf16.mxu0 %v1590_v17  ;;  %1276 = vmatprep.subr.bf16.mxu1 %v1470_v1 }
 0x350   :  { %636 = vmatpush1.bf16.msra.mxu0 %v1603_v19  ;;  %1277 = vmatpush3.bf16.msra.mxu1 %v1637_v24 }
 0x351   :  { %637 = vmatprep.subr.bf16.mxu0 %v1609_v20  ;;  %1278 = vmatprep.subr.bf16.mxu1 %v1470_v1 }
 0x354   :  { %638 = vmatpush1.bf16.msra.mxu0 %v1622_v22  ;;  %1279 = vmatpush3.bf16.msra.mxu1 %v1648_v25 }
 0x355   :  { %730 = vmatprep.subr.bf16.mxu0 %v1496_v0  ;;  %1284 = vmatprep.subr.bf16.mxu1 %v1470_v1 }
 0x40a   :  { %v550_v62 = vpop.f32.mrb[12].mxu0  ;;  %v591_v63 = vpop.f32.mrb[12].mxu1 }
 0x40b   :  { %v551_v26 = vadd.f32 %v550_v62, %v1690_v31  ;;  %v552_v27 = vpop.f32.mrb[13].mxu0  ;;  %v1262_v28 = vpop.f32.mrb[13].mxu1  ;;  %v592_v45 = vadd.f32 %v591_v63, %v1702_v52 }
 0x40c   :  { %v553_v29 = vadd.f32 %v552_v27, %v1692_v32  ;;  %v554_v30 = vpop.f32.mrb[14].mxu0  ;;  %v594_v33 = vpop.f32.mrb[14].mxu1 }
 0x40d   :  { %v597_v34 = vadd.f32 %v1087_v61, %v551_v26  ;;  %v555_v36 = vpop.f32.mrb[15].mxu0  ;;  %v1263_v37 = vpop.f32.mrb[15].mxu1  ;;  %v1093_v30 = vld [vmem:[%s2057_s0 + $0x68] sm:$0xff] }
 0x40e   :  { %v604_v39 = vadd.f32 %v1088_v35, %v553_v29 }
 0x40f   :  { %v1090_v38 = vmul.f32 -1.442695, %v597_v34 }
 0x410   :  { %v1091_v40 = vmul.f32 -1.442695, %v604_v39 }
 0x411   :  { %1409 = vpow2.f32 %v1090_v38 }
 0x412   :  { %1411 = vpow2.f32 %v1091_v40 }
 0x41b   :  { %v1410_v41 = vpop.eup %1409 }
 0x41c   :  { %v601_v42 = vadd.f32 1.0, %v1410_v41  ;;  %v1412_v43 = vpop.eup %1411 }
 0x41d   :  { %v608_v44 = vadd.f32 1.0, %v1412_v43 }
 0x41e   :  { %1413 = vrcp.f32 %v601_v42 }
 0x41f   :  { %1415 = vrcp.f32 %v608_v44  ;;  %v1094_v44 = vld [vmem:[%s2057_s0 + $0x70] sm:$0xff] }
 0x428   :  { %v1414_v46 = vpop.eup %1413 }
 0x429   :  { %v611_v48 = vmul.f32 %v1414_v46, %v592_v45  ;;  %v1416_v50 = vpop.eup %1415 }
 0x42a   :  { %v614_v51 = vsub.f32 1.0, %v1416_v50  ;;  %v616_v55 = vmul.f32 %v1416_v50, %v1812_v59 }
 0x42b   :  { %v612_v49 = vadd.f32 %v1089_v47, %v611_v48 }
 0x42d   :  { %1417 = vtanh.f32 %v612_v49 }
 0x437   :  { %v1418_v53 = vpop.eup %1417 }
 0x438   :  { %v615_v54 = vmul.f32 %v1418_v53, %v614_v51 }
 0x43a   :  { %v1864_v56 = vadd.f32 %v616_v55, %v615_v54 }
 0x43c   :  { %v622_v57 = vpack.c.bf16 %v1864_v56, %v1864_v56 }
 0x43e   :  { %656 = vmatmul.mubr.bf16.vlgmr.msra.gmra.mrb[16].mxu0 %v622_v57  ;;  %1281 = vmatmul.mubr.bf16.vlgmr.msra.gmra.mrb[16].mxu1 %v622_v57 }
 0x43f   :  { %731 = vmatpush1.bf16.msra.mxu0 %v1503_v3  ;;  %1285 = vmatpush3.bf16.msra.mxu1 %v1540_v9 }
 0x440   :  { %732 = vmatprep.subr.bf16.mxu0 %v1511_v4  ;;  %1286 = vmatprep.subr.bf16.mxu1 %v1470_v1 }
 0x441   :  { %762 = vmatprep.mubr.bf16.mxu0 %v1471_v2  ;;  %1300 = vmatprep.mubr.msk.bf16.mxu1 %vm1472_vm0, %v1470_v1 }
 0x443   :  { %733 = vmatpush1.bf16.msra.mxu0 %v1517_v5  ;;  %1287 = vmatpush3.bf16.msra.mxu1 %v1558_v12 }
 0x444   :  { %734 = vmatprep.subr.bf16.mxu0 %v1523_v6  ;;  %1288 = vmatprep.subr.bf16.mxu1 %v1470_v1 }
 0x447   :  { %735 = vmatpush1.bf16.msra.mxu0 %v1529_v7  ;;  %1289 = vmatpush3.bf16.msra.mxu1 %v1577_v15 }
 0x448   :  { %736 = vmatprep.subr.bf16.mxu0 %v1535_v8  ;;  %1290 = vmatprep.subr.bf16.mxu1 %v1470_v1 }
 0x44b   :  { %737 = vmatpush1.bf16.msra.mxu0 %v1546_v10  ;;  %1291 = vmatpush3.bf16.msra.mxu1 %v1596_v18 }
 0x44c   :  { %738 = vmatprep.subr.bf16.mxu0 %v1551_v11  ;;  %1292 = vmatprep.subr.bf16.mxu1 %v1470_v1 }
 0x44f   :  { %739 = vmatpush1.bf16.msra.mxu0 %v1564_v13  ;;  %1293 = vmatpush3.bf16.msra.mxu1 %v1615_v21 }
 0x450   :  { %740 = vmatprep.subr.bf16.mxu0 %v1570_v14  ;;  %1294 = vmatprep.subr.bf16.mxu1 %v1470_v1 }
 0x453   :  { %741 = vmatpush1.bf16.msra.mxu0 %v1584_v16  ;;  %1295 = vmatpush3.bf16.msra.mxu1 %v1629_v23 }
 0x454   :  { %742 = vmatprep.subr.bf16.mxu0 %v1590_v17  ;;  %1296 = vmatprep.subr.bf16.mxu1 %v1470_v1 }
 0x457   :  { %743 = vmatpush1.bf16.msra.mxu0 %v1603_v19  ;;  %1297 = vmatpush3.bf16.msra.mxu1 %v1637_v24 }
 0x458   :  { %744 = vmatprep.subr.bf16.mxu0 %v1609_v20  ;;  %1298 = vmatprep.subr.bf16.mxu1 %v1470_v1 }
 0x45b   :  { %745 = vmatpush1.bf16.msra.mxu0 %v1622_v22  ;;  %1299 = vmatpush3.bf16.msra.mxu1 %v1648_v25 }
 0x45c   :  { %837 = vmatprep.subr.bf16.mxu0 %v1496_v0  ;;  %1304 = vmatprep.subr.bf16.mxu1 %v1470_v1 }
 0x511   :  { %v657_v59 = vpop.f32.mrb[16].mxu0  ;;  %v698_v60 = vpop.f32.mrb[16].mxu1 }
 0x512   :  { %v658_v61 = vadd.f32 %v657_v59, %v1690_v31  ;;  %v659_v62 = vpop.f32.mrb[17].mxu0  ;;  %v1282_v63 = vpop.f32.mrb[17].mxu1  ;;  %v699_v42 = vadd.f32 %v698_v60, %v1702_v52 }
 0x513   :  { %v660_v26 = vadd.f32 %v659_v62, %v1692_v32  ;;  %v661_v27 = vpop.f32.mrb[18].mxu0  ;;  %v701_v28 = vpop.f32.mrb[18].mxu1 }
 0x514   :  { %v704_v29 = vadd.f32 %v1092_v58, %v658_v61  ;;  %v662_v33 = vpop.f32.mrb[19].mxu0  ;;  %v1283_v34 = vpop.f32.mrb[19].mxu1  ;;  %v1099_v27 = vld [vmem:[%s2057_s0 + $0x88] sm:$0xff] }
 0x515   :  { %v711_v36 = vadd.f32 %v1093_v30, %v660_v26 }
 0x516   :  { %v1095_v35 = vmul.f32 -1.442695, %v704_v29 }
 0x517   :  { %v1096_v37 = vmul.f32 -1.442695, %v711_v36 }
 0x518   :  { %1419 = vpow2.f32 %v1095_v35 }
 0x519   :  { %1421 = vpow2.f32 %v1096_v37 }
 0x522   :  { %v1420_v38 = vpop.eup %1419 }
 0x523   :  { %v708_v39 = vadd.f32 1.0, %v1420_v38  ;;  %v1422_v40 = vpop.eup %1421 }
 0x524   :  { %v715_v41 = vadd.f32 1.0, %v1422_v40  ;;  %v1460_v40 = vld [vmem:[%s2055_s1 + $0x8] ss:$12 sps:$4 sm:$0xff]  }
 0x525   :  { %1423 = vrcp.f32 %v708_v39  ;;  %v1459_v39 = vld [vmem:[%s2055_s1] ss:$12 sps:$4 sm:$0xff]  }
 0x526   :  { %1425 = vrcp.f32 %v715_v41  ;;  %v1461_v41 = vld [vmem:[%s2055_s1 + $0x1c] ss:$12 sps:$4 sm:$0xff]  }
 0x52f   :  { %v1424_v43 = vpop.eup %1423 }
 0x530   :  { %v718_v45 = vmul.f32 %v1424_v43, %v699_v42  ;;  %v1426_v47 = vpop.eup %1425  ;;  %v1462_v42 = vld [vmem:[%s2055_s1 + $0x18] ss:$12 sps:$4 sm:$0xff]   ;;  %v1463_v43 = vld [vmem:[%s2055_s1 + $0x34] ss:$12 sps:$4 sm:$0xff]  }
 0x531   :  { %v721_v48 = vsub.f32 1.0, %v1426_v47  ;;  %v723_v51 = vmul.f32 %v1426_v47, %v1864_v56 }
 0x532   :  { %v719_v46 = vadd.f32 %v1094_v44, %v718_v45  ;;  %v1465_v44 = vld [vmem:[%s2055_s1 + $0x4c] ss:$12 sps:$4 sm:$0xff]   ;;  %v1467_v45 = vld [vmem:[%s2055_s1 + $0x64] ss:$12 sps:$4 sm:$0xff]  }
 0x534   :  { %1427 = vtanh.f32 %v719_v46  ;;  %v1469_v46 = vld [vmem:[%s2055_s1 + $0x7c] ss:$12 sps:$4 sm:$0xff]  }
 0x53e   :  { %v1428_v49 = vpop.eup %1427 }
 0x53f   :  { %v722_v50 = vmul.f32 %v1428_v49, %v721_v48 }
 0x541   :  { %v1916_v53 = vadd.f32 %v723_v51, %v722_v50 }
 0x543   :  { %v729_v54 = vpack.c.bf16 %v1916_v53, %v1916_v53 }
 0x545   :  { %763 = vmatmul.mubr.bf16.vlgmr.msra.gmra.mrb[20].mxu0 %v729_v54  ;;  %1301 = vmatmul.mubr.bf16.vlgmr.msra.gmra.mrb[20].mxu1 %v729_v54 }
 0x546   :  { %838 = vmatpush1.bf16.msra.mxu0 %v1503_v3  ;;  %1305 = vmatpush3.bf16.msra.mxu1 %v1540_v9  ;;  %v1097_v3 = vld [vmem:[%s2057_s0 + $0x78] sm:$0xff] }
 0x547   :  { %839 = vmatprep.subr.bf16.mxu0 %v1511_v4  ;;  %1306 = vmatprep.subr.bf16.mxu1 %v1470_v1 }
 0x548   :  { %869 = vmatprep.mubr.bf16.mxu0 %v1471_v2  ;;  %1320 = vmatprep.mubr.msk.bf16.mxu1 %vm1472_vm0, %v1470_v1 }
 0x54a   :  { %840 = vmatpush1.bf16.msra.mxu0 %v1517_v5  ;;  %1307 = vmatpush3.bf16.msra.mxu1 %v1558_v12 }
 0x54b   :  { %841 = vmatprep.subr.bf16.mxu0 %v1523_v6  ;;  %1308 = vmatprep.subr.bf16.mxu1 %v1470_v1 }
 0x54e   :  { %842 = vmatpush1.bf16.msra.mxu0 %v1529_v7  ;;  %1309 = vmatpush3.bf16.msra.mxu1 %v1577_v15 }
 0x54f   :  { %843 = vmatprep.subr.bf16.mxu0 %v1535_v8  ;;  %1310 = vmatprep.subr.bf16.mxu1 %v1470_v1 }
 0x552   :  { %844 = vmatpush1.bf16.msra.mxu0 %v1546_v10  ;;  %1311 = vmatpush3.bf16.msra.mxu1 %v1596_v18 }
 0x553   :  { %845 = vmatprep.subr.bf16.mxu0 %v1551_v11  ;;  %1312 = vmatprep.subr.bf16.mxu1 %v1470_v1 }
 0x556   :  { %846 = vmatpush1.bf16.msra.mxu0 %v1564_v13  ;;  %1313 = vmatpush3.bf16.msra.mxu1 %v1615_v21 }
 0x557   :  { %847 = vmatprep.subr.bf16.mxu0 %v1570_v14  ;;  %1314 = vmatprep.subr.bf16.mxu1 %v1470_v1 }
 0x55a   :  { %848 = vmatpush1.bf16.msra.mxu0 %v1584_v16  ;;  %1315 = vmatpush3.bf16.msra.mxu1 %v1629_v23 }
 0x55b   :  { %849 = vmatprep.subr.bf16.mxu0 %v1590_v17  ;;  %1316 = vmatprep.subr.bf16.mxu1 %v1470_v1 }
 0x55e   :  { %850 = vmatpush1.bf16.msra.mxu0 %v1603_v19  ;;  %1317 = vmatpush3.bf16.msra.mxu1 %v1637_v24 }
 0x55f   :  { %851 = vmatprep.subr.bf16.mxu0 %v1609_v20  ;;  %1318 = vmatprep.subr.bf16.mxu1 %v1470_v1 }
 0x562   :  { %852 = vmatpush1.bf16.msra.mxu0 %v1622_v22  ;;  %1319 = vmatpush3.bf16.msra.mxu1 %v1648_v25 }
 0x563   :  { %944 = vmatprep.subr.bf16.mxu0 %v1496_v0  ;;  %1324 = vmatprep.subr.bf16.mxu1 %v1470_v1  ;;  %v1098_v0 = vld [vmem:[%s2057_s0 + $0x80] sm:$0xff] }
 0x618   :  { %v764_v4 = vpop.f32.mrb[20].mxu0  ;;  %v805_v5 = vpop.f32.mrb[20].mxu1 }
 0x619   :  { %v765_v6 = vadd.f32 %v764_v4, %v1690_v31  ;;  %v766_v7 = vpop.f32.mrb[21].mxu0  ;;  %v1302_v8 = vpop.f32.mrb[21].mxu1  ;;  %v806_v63 = vadd.f32 %v805_v5, %v1702_v52 }
 0x61a   :  { %v767_v9 = vadd.f32 %v766_v7, %v1692_v32  ;;  %v768_v10 = vpop.f32.mrb[22].mxu0  ;;  %v808_v11 = vpop.f32.mrb[22].mxu1  ;;  %v1104_v7 = vld [vmem:[%s2057_s0 + $0xa0] sm:$0xff] }
 0x61b   :  { %v811_v13 = vadd.f32 %v1097_v3, %v765_v6  ;;  %v769_v14 = vpop.f32.mrb[23].mxu0  ;;  %v1303_v55 = vpop.f32.mrb[23].mxu1 }
 0x61c   :  { %v818_v57 = vadd.f32 %v1098_v0, %v767_v9 }
 0x61d   :  { %v1100_v56 = vmul.f32 -1.442695, %v811_v13 }
 0x61e   :  { %v1101_v58 = vmul.f32 -1.442695, %v818_v57  ;;  %v1107_v57 = vld [vmem:[%s2057_s0 + $0xa8] sm:$0xff] }
 0x61f   :  { %1429 = vpow2.f32 %v1100_v56 }
 0x620   :  { %1431 = vpow2.f32 %v1101_v58 }
 0x629   :  { %v1430_v59 = vpop.eup %1429 }
 0x62a   :  { %v815_v60 = vadd.f32 1.0, %v1430_v59  ;;  %v1432_v61 = vpop.eup %1431 }
 0x62b   :  { %v822_v62 = vadd.f32 1.0, %v1432_v61 }
 0x62c   :  { %1433 = vrcp.f32 %v815_v60 }
 0x62d   :  { %1435 = vrcp.f32 %v822_v62 }
 0x636   :  { %v1434_v26 = vpop.eup %1433 }
 0x637   :  { %v825_v28 = vmul.f32 %v1434_v26, %v806_v63  ;;  %v1436_v30 = vpop.eup %1435 }
 0x638   :  { %v828_v33 = vsub.f32 1.0, %v1436_v30  ;;  %v830_v36 = vmul.f32 %v1436_v30, %v1916_v53 }
 0x639   :  { %v826_v29 = vadd.f32 %v1099_v27, %v825_v28 }
 0x63b   :  { %1437 = vtanh.f32 %v826_v29  ;;  %v1108_v29 = vld [vmem:[%s2057_s0 + $0xb0] sm:$0xff] }
 0x645   :  { %v1438_v34 = vpop.eup %1437 }
 0x646   :  { %v829_v35 = vmul.f32 %v1438_v34, %v828_v33 }
 0x648   :  { %v1968_v37 = vadd.f32 %v830_v36, %v829_v35 }
 0x64a   :  { %v836_v38 = vpack.c.bf16 %v1968_v37, %v1968_v37 }
 0x64c   :  { %870 = vmatmul.mubr.bf16.vlgmr.msra.gmra.mrb[24].mxu0 %v836_v38  ;;  %1321 = vmatmul.mubr.bf16.vlgmr.msra.gmra.mrb[24].mxu1 %v836_v38 }
 0x64d   :  { %945 = vmatpush1.bf16.msra.mxu0 %v1459_v39  ;;  %1325 = vmatpush3.bf16.msra.mxu1 %v1460_v40 }
 0x64e   :  { %946 = vmatprep.subr.bf16.mxu0 %v1461_v41  ;;  %1326 = vmatprep.subr.bf16.mxu1 %v1470_v1  ;;  %v1109_v41 = vld [vmem:[%s2057_s0 + $0xb8] sm:$0xff] }
 0x64f   :  { %976 = vmatprep.mubr.bf16.mxu0 %v1471_v2  ;;  %1340 = vmatprep.mubr.msk.bf16.mxu1 %vm1472_vm0, %v1470_v1  ;;  %v1464_v2 = vld [vmem:[%s2055_s1 + $0x30] ss:$12 sps:$4 sm:$0xff]  }
 0x651   :  { %947 = vmatpush1.bf16.msra.mxu0 %v1462_v42  ;;  %1327 = vmatpush3.bf16.msra.mxu1 %v1558_v12  ;;  %v1466_v12 = vld [vmem:[%s2055_s1 + $0x48] ss:$12 sps:$4 sm:$0xff]  }
 0x652   :  { %948 = vmatprep.subr.bf16.mxu0 %v1463_v43  ;;  %1328 = vmatprep.subr.bf16.mxu1 %v1470_v1 }
 0x655   :  { %949 = vmatpush1.bf16.msra.mxu0 %v1464_v2  ;;  %1329 = vmatpush3.bf16.msra.mxu1 %v1577_v15  ;;  %v1468_v15 = vld [vmem:[%s2055_s1 + $0x60] ss:$12 sps:$4 sm:$0xff]  }
 0x656   :  { %950 = vmatprep.subr.bf16.mxu0 %v1465_v44  ;;  %1330 = vmatprep.subr.bf16.mxu1 %v1470_v1 }
 0x659   :  { %951 = vmatpush1.bf16.msra.mxu0 %v1466_v12  ;;  %1331 = vmatpush3.bf16.msra.mxu1 %v1596_v18 }
 0x65a   :  { %952 = vmatprep.subr.bf16.mxu0 %v1467_v45  ;;  %1332 = vmatprep.subr.bf16.mxu1 %v1470_v1 }
 0x65d   :  { %953 = vmatpush1.bf16.msra.mxu0 %v1468_v15  ;;  %1333 = vmatpush3.bf16.msra.mxu1 %v1615_v21 }
 0x65e   :  { %954 = vmatprep.subr.bf16.mxu0 %v1469_v46  ;;  %1334 = vmatprep.subr.bf16.mxu1 %v1470_v1 }
 0x661   :  { %955 = vmatpush1.bf16.msra.mxu0 %v1584_v16  ;;  %1335 = vmatpush3.bf16.msra.mxu1 %v1629_v23  ;;  %v1102_v16 = vld [vmem:[%s2057_s0 + $0x90] sm:$0xff] }
 0x662   :  { %956 = vmatprep.subr.bf16.mxu0 %v1590_v17  ;;  %1336 = vmatprep.subr.bf16.mxu1 %v1470_v1 }
 0x665   :  { %957 = vmatpush1.bf16.msra.mxu0 %v1603_v19  ;;  %1337 = vmatpush3.bf16.msra.mxu1 %v1637_v24 }
 0x666   :  { %958 = vmatprep.subr.bf16.mxu0 %v1609_v20  ;;  %1338 = vmatprep.subr.bf16.mxu1 %v1470_v1  ;;  %v1103_v1 = vld [vmem:[%s2057_s0 + $0x98] sm:$0xff] }
 0x669   :  { %959 = vmatpush1.bf16.msra.mxu0 %v1622_v22  ;;  %1339 = vmatpush3.bf16.msra.mxu1 %v1648_v25 }
 0x71f   :  { %v871_v18 = vpop.f32.mrb[24].mxu0  ;;  %v912_v17 = vpop.f32.mrb[24].mxu1 }
 0x720   :  { %v872_v21 = vadd.f32 %v871_v18, %v1690_v31  ;;  %v873_v23 = vpop.f32.mrb[25].mxu0  ;;  %v1322_v19 = vpop.f32.mrb[25].mxu1  ;;  %v913_v5 = vadd.f32 %v912_v17, %v1702_v52 }
 0x721   :  { %v874_v24 = vadd.f32 %v873_v23, %v1692_v32  ;;  %v875_v47 = vpop.f32.mrb[26].mxu0  ;;  %v915_v20 = vpop.f32.mrb[26].mxu1 }
 0x722   :  { %v918_v48 = vadd.f32 %v1102_v16, %v872_v21  ;;  %v876_v22 = vpop.f32.mrb[27].mxu0  ;;  %v1323_v25 = vpop.f32.mrb[27].mxu1 }
 0x723   :  { %v925_v50 = vadd.f32 %v1103_v1, %v874_v24 }
 0x724   :  { %v1105_v49 = vmul.f32 -1.442695, %v918_v48 }
 0x725   :  { %v1106_v51 = vmul.f32 -1.442695, %v925_v50 }
 0x726   :  { %1439 = vpow2.f32 %v1105_v49 }
 0x727   :  { %1441 = vpow2.f32 %v1106_v51 }
 0x730   :  { %v1440_v53 = vpop.eup %1439 }
 0x731   :  { %v922_v54 = vadd.f32 1.0, %v1440_v53  ;;  %v1442_v3 = vpop.eup %1441 }
 0x732   :  { %v929_v4 = vadd.f32 1.0, %v1442_v3 }
 0x733   :  { %1443 = vrcp.f32 %v922_v54 }
 0x734   :  { %1445 = vrcp.f32 %v929_v4 }
 0x73d   :  { %v1444_v6 = vpop.eup %1443 }
 0x73e   :  { %v932_v8 = vmul.f32 %v1444_v6, %v913_v5  ;;  %v1446_v10 = vpop.eup %1445 }
 0x73f   :  { %v935_v11 = vsub.f32 1.0, %v1446_v10  ;;  %v937_v14 = vmul.f32 %v1446_v10, %v1968_v37 }
 0x740   :  { %v933_v9 = vadd.f32 %v1104_v7, %v932_v8 }
 0x742   :  { %1447 = vtanh.f32 %v933_v9 }
 0x74c   :  { %v1448_v13 = vpop.eup %1447 }
 0x74d   :  { %v936_v0 = vmul.f32 %v1448_v13, %v935_v11 }
 0x74f   :  { %v938_v55 = vadd.f32 %v937_v14, %v936_v0 }
 0x751   :  { %v943_v56 = vpack.c.bf16 %v938_v55, %v938_v55 }
 0x753   :  { %977 = vmatmul.mubr.bf16.vlgmr.msra.gmra.mrb[28].mxu0 %v943_v56  ;;  %1341 = vmatmul.mubr.bf16.vlgmr.msra.gmra.mrb[28].mxu1 %v943_v56 }
 0x826   :  { %v978_v58 = vpop.f32.mrb[28].mxu0  ;;  %v1019_v59 = vpop.f32.mrb[28].mxu1 }
 0x827   :  { %v979_v60 = vadd.f32 %v978_v58, %v1690_v31  ;;  %v980_v61 = vpop.f32.mrb[29].mxu0  ;;  %v1342_v62 = vpop.f32.mrb[29].mxu1 }
 0x828   :  { %v981_v63 = vadd.f32 %v980_v61, %v1692_v32  ;;  %v982_v26 = vpop.f32.mrb[30].mxu0  ;;  %v1022_v27 = vpop.f32.mrb[30].mxu1  ;;  %v1020_v32 = vadd.f32 %v1019_v59, %v1702_v52 }
 0x829   :  { %v1025_v28 = vadd.f32 %v1107_v57, %v979_v60  ;;  %v983_v30 = vpop.f32.mrb[31].mxu0  ;;  %v1343_v33 = vpop.f32.mrb[31].mxu1 }
 0x82a   :  { %v1032_v35 = vadd.f32 %v1108_v29, %v981_v63 }
 0x82b   :  { %v1110_v34 = vmul.f32 -1.442695, %v1025_v28 }
 0x82c   :  { %v1111_v36 = vmul.f32 -1.442695, %v1032_v35 }
 0x82d   :  { %1449 = vpow2.f32 %v1110_v34 }
 0x82e   :  { %1451 = vpow2.f32 %v1111_v36 }
 0x837   :  { %v1450_v37 = vpop.eup %1449 }
 0x838   :  { %v1029_v31 = vadd.f32 1.0, %v1450_v37  ;;  %v1452_v38 = vpop.eup %1451 }
 0x839   :  { %v1036_v39 = vadd.f32 1.0, %v1452_v38 }
 0x83a   :  { %1453 = vrcp.f32 %v1029_v31 }
 0x83b   :  { %1455 = vrcp.f32 %v1036_v39 }
 0x844   :  { %v1454_v40 = vpop.eup %1453 }
 0x845   :  { %v1039_v42 = vmul.f32 %v1454_v40, %v1020_v32  ;;  %v1456_v2 = vpop.eup %1455 }
 0x846   :  { %v1042_v44 = vsub.f32 1.0, %v1456_v2  ;;  %v1044_v15 = vmul.f32 %v1456_v2, %v938_v55 }
 0x847   :  { %v1040_v43 = vadd.f32 %v1109_v41, %v1039_v42 }
 0x849   :  { %1457 = vtanh.f32 %v1040_v43 }
 0x853   :  { %v1458_v12 = vpop.eup %1457 }
 0x854   :  { %v1043_v45 = vmul.f32 %v1458_v12, %v1042_v44 }
 0x856   :  { %v1045_v46 = vadd.f32 %v1044_v15, %v1043_v45 }
 0x858   :  { %1046 = vst [vmem:[%s2058_s3] sm:$0xff] %v1045_v46 }

// kernel: forward.7
= control target key start
LH: loop header
LB: loop body
LE: loop exit
PB: predicated region body
PF: predicated region fallthrough
CT: control target
= control target key end

     0   :  { %v2165_v1 = vmov 0.0   ;;  %v2166_v2 = vmov 0   ;;  %vm2167_vm0 = vmmov 0   ;;  %v74_v36 = vlaneseq  ;;  %s3133_s1 = inlined_call_operand.vmem [shape: bf16[128,384], index: 1, kind: input, shape index: {}]   ;;  %s3134_s3 = inlined_call_operand.vmem [shape: f32[8,128], index: 3, kind: input, shape index: {}]   ;;  %s3135_s4 = inlined_call_operand.vmem [shape: bf16[128,128], index: 4, kind: input, shape index: {}]   ;;  %s3136_s2 = inlined_call_operand.vmem [shape: f32[1,384], index: 2, kind: input, shape index: {}]   ;;  %s3137_s0 = inlined_call_operand.vmem [shape: f32[8,8,384], index: 0, kind: input, shape index: {}]   ;;  %s3138_s5 = inlined_call_operand.vmem [shape: f32[1,128], index: 5, kind: input, shape index: {}]   ;;  %s3139_s6 = inlined_call_operand.vmem [shape: f32[8,8,128], index: 6, kind: output, shape index: {}]  }
   0x1   :  { %v2206_v0 = vld [vmem:[%s3133_s1 + $0x4] ss:$12 sps:$4 sm:$0xff]   ;;  %1689 = vmatprep.subr.bf16.mxu1 %v2165_v1  ;;  %261 = vmatprep.mubr.bf16.mxu0 %v2166_v2  ;;  %v2213_v3 = vld [vmem:[%s3133_s1] ss:$12 sps:$4 sm:$0xff]   ;;  %v2221_v4 = vld [vmem:[%s3133_s1 + $0x1c] ss:$12 sps:$4 sm:$0xff]  }
   0x2   :  { %1705 = vmatprep.mubr.msk.bf16.mxu1 %vm2167_vm0, %v2165_v1  ;;  %229 = vmatprep.subr.bf16.mxu0 %v2206_v0  ;;  %v2227_v5 = vld [vmem:[%s3133_s1 + $0x18] ss:$12 sps:$4 sm:$0xff]   ;;  %v2233_v6 = vld [vmem:[%s3133_s1 + $0x34] ss:$12 sps:$4 sm:$0xff]   ;;  %v2239_v7 = vld [vmem:[%s3133_s1 + $0x30] ss:$12 sps:$4 sm:$0xff]  }
   0x3   :  { %230 = vmatpush1.bf16.msra.mxu0 %v2213_v3  ;;  %v2245_v8 = vld [vmem:[%s3133_s1 + $0x4c] ss:$12 sps:$4 sm:$0xff]   ;;  %v2250_v9 = vld [vmem:[%s3133_s1 + $0x8] ss:$12 sps:$4 sm:$0xff]   ;;  %v2262_v11 = vld [vmem:[%s3133_s1 + $0x64] ss:$12 sps:$4 sm:$0xff]  }
   0x4   :  { %231 = vmatprep.subr.bf16.mxu0 %v2221_v4  ;;  %v2256_v10 = vld [vmem:[%s3133_s1 + $0x48] ss:$12 sps:$4 sm:$0xff]   ;;  %1690 = vmatpush3.bf16.msra.mxu1 %v2250_v9  ;;  %v2268_v12 = vld [vmem:[%s3133_s1 + $0x20] ss:$12 sps:$4 sm:$0xff]   ;;  %v2287_v15 = vld [vmem:[%s3133_s1 + $0x38] ss:$12 sps:$4 sm:$0xff]  }
   0x5   :  { %1691 = vmatprep.subr.bf16.mxu1 %v2165_v1  ;;  %v2274_v13 = vld [vmem:[%s3133_s1 + $0x60] ss:$12 sps:$4 sm:$0xff]   ;;  %v2280_v14 = vld [vmem:[%s3133_s1 + $0x7c] ss:$12 sps:$4 sm:$0xff]   ;;  %v2294_v16 = vld [vmem:[%s3133_s1 + $0x78] ss:$12 sps:$4 sm:$0xff]  }
   0x6   :  { %v2300_v17 = vld [vmem:[%s3133_s1 + $0x94] ss:$12 sps:$4 sm:$0xff]   ;;  %v2306_v18 = vld [vmem:[%s3133_s1 + $0x50] ss:$12 sps:$4 sm:$0xff]   ;;  %v2319_v20 = vld [vmem:[%s3133_s1 + $0xac] ss:$12 sps:$4 sm:$0xff]  }
   0x7   :  { %232 = vmatpush1.bf16.msra.mxu0 %v2227_v5  ;;  %v2313_v19 = vld [vmem:[%s3133_s1 + $0x90] ss:$12 sps:$4 sm:$0xff]   ;;  %v2325_v21 = vld [vmem:[%s3133_s1 + $0x68] ss:$12 sps:$4 sm:$0xff]   ;;  %v2337_v23 = vld [vmem:[%s3134_s3] sm:$0xff]  ;;  %v75_v37 = vshrl.u32 %v74_v36, 7 }
   0x8   :  { %233 = vmatprep.subr.bf16.mxu0 %v2233_v6  ;;  %1692 = vmatpush3.bf16.msra.mxu1 %v2268_v12  ;;  %v2332_v22 = vld [vmem:[%s3133_s1 + $0xa8] ss:$12 sps:$4 sm:$0xff]   ;;  %v2344_v24 = vld [vmem:[%s3133_s1 + $0x80] ss:$12 sps:$4 sm:$0xff]   ;;  %v100_v25 = vpack.c.bf16 %v2337_v23, %v2337_v23  ;;  %v2354_v26 = vld [vmem:[%s3133_s1 + $0x98] ss:$12 sps:$4 sm:$0xff]  }
   0x9   :  { %1693 = vmatprep.subr.bf16.mxu1 %v2165_v1  ;;  %v2364_v27 = vld [vmem:[%s3133_s1 + $0xb0] ss:$12 sps:$4 sm:$0xff]   ;;  %v2389_v28 = vld [vmem:[%s3135_s4] sm:$0xff]   ;;  %v2396_v29 = vld [vmem:[%s3135_s4 + $0x8] sm:$0xff]   ;;  %v76_v38 = vsub.s32 0, %v75_v37  ;;  %v80_v40 = vsub.s32 1, %v75_v37 }
   0xa   :  { %v2403_v30 = vld [vmem:[%s3135_s4 + $0x10] sm:$0xff]   ;;  %v2410_v31 = vld [vmem:[%s3135_s4 + $0x18] sm:$0xff]   ;;  %v2417_v32 = vld [vmem:[%s3135_s4 + $0x20] sm:$0xff]   ;;  %v84_v61 = vsub.s32 2, %v75_v37 }
   0xb   :  { %234 = vmatpush1.bf16.msra.mxu0 %v2239_v7  ;;  %v2423_v33 = vld [vmem:[%s3135_s4 + $0x28] sm:$0xff]   ;;  %v2430_v34 = vld [vmem:[%s3135_s4 + $0x30] sm:$0xff]   ;;  %v2437_v35 = vld [vmem:[%s3135_s4 + $0x38] sm:$0xff]  }
   0xc   :  { %235 = vmatprep.subr.bf16.mxu0 %v2245_v8  ;;  %1694 = vmatpush3.bf16.msra.mxu1 %v2287_v15  ;;  %v72_v39 = vld [vmem:[%s3136_s2] sm:$0x7]  ;;  %v98_v50 = vld [vmem:[%s3137_s0 + $0x8] sm:$0xff] }
   0xd   :  { %1695 = vmatprep.subr.bf16.mxu1 %v2165_v1  ;;  %v2445_v41 = vrot.slane %v72_v39, %v76_v38  ;;  %v2447_v42 = vrot.slane %v72_v39, %v80_v40  ;;  %v97_v43 = vld [vmem:[%s3137_s0] sm:$0xff]  ;;  %v2457_v62 = vrot.slane %v72_v39, %v84_v61  ;;  %v99_v40 = vld [vmem:[%s3137_s0 + $0x10] sm:$0xff] }
   0xf   :  { %236 = vmatpush1.bf16.msra.mxu0 %v2256_v10 }
  0x10   :  { %237 = vmatprep.subr.bf16.mxu0 %v2262_v11  ;;  %1696 = vmatpush3.bf16.msra.mxu1 %v2306_v18 }
  0x11   :  { %1697 = vmatprep.subr.bf16.mxu1 %v2165_v1 }
  0x13   :  { %238 = vmatpush1.bf16.msra.mxu0 %v2274_v13 }
  0x14   :  { %239 = vmatprep.subr.bf16.mxu0 %v2280_v14  ;;  %1698 = vmatpush3.bf16.msra.mxu1 %v2325_v21 }
  0x15   :  { %1699 = vmatprep.subr.bf16.mxu1 %v2165_v1 }
  0x17   :  { %240 = vmatpush1.bf16.msra.mxu0 %v2294_v16 }
  0x18   :  { %241 = vmatprep.subr.bf16.mxu0 %v2300_v17  ;;  %1700 = vmatpush3.bf16.msra.mxu1 %v2344_v24 }
  0x19   :  { %1701 = vmatprep.subr.bf16.mxu1 %v2165_v1 }
  0x1b   :  { %242 = vmatpush1.bf16.msra.mxu0 %v2313_v19 }
  0x1c   :  { %243 = vmatprep.subr.bf16.mxu0 %v2319_v20  ;;  %1702 = vmatpush3.bf16.msra.mxu1 %v2354_v26 }
  0x1d   :  { %1703 = vmatprep.subr.bf16.mxu1 %v2165_v1 }
  0x1f   :  { %244 = vmatpush1.bf16.msra.mxu0 %v2332_v22 }
  0x20   :  { %1709 = vmatprep.subr.bf16.mxu0 %v2165_v1  ;;  %1704 = vmatpush3.bf16.msra.mxu1 %v2364_v27 }
  0x21   :  { %425 = vmatprep.subr.bf16.mxu1 %v2206_v0 }
  0x22   :  { %262 = vmatmul.mubr.bf16.vlgmr.msra.gmra.mrb[0].mxu0 %v100_v25 }
  0x23   :  { %1725 = vmatprep.mubr.msk.bf16.mxu0 %vm2167_vm0, %v2165_v1  ;;  %1706 = vmatmul.mubr.bf16.vlgmr.msra.gmra.mrb[0].mxu1 %v100_v25 }
  0x24   :  { %426 = vmatpush1.bf16.msra.mxu1 %v2213_v3  ;;  %457 = vmatprep.mubr.bf16.mxu1 %v2166_v2 }
  0x25   :  { %427 = vmatprep.subr.bf16.mxu1 %v2221_v4  ;;  %1710 = vmatpush3.bf16.msra.mxu0 %v2389_v28 }
  0x26   :  { %1711 = vmatprep.subr.bf16.mxu0 %v2165_v1 }
  0x28   :  { %428 = vmatpush1.bf16.msra.mxu1 %v2227_v5 }
  0x29   :  { %429 = vmatprep.subr.bf16.mxu1 %v2233_v6  ;;  %1712 = vmatpush3.bf16.msra.mxu0 %v2396_v29 }
  0x2a   :  { %1713 = vmatprep.subr.bf16.mxu0 %v2165_v1 }
  0x2c   :  { %430 = vmatpush1.bf16.msra.mxu1 %v2239_v7 }
  0x2d   :  { %431 = vmatprep.subr.bf16.mxu1 %v2245_v8  ;;  %1714 = vmatpush3.bf16.msra.mxu0 %v2403_v30 }
  0x2e   :  { %1715 = vmatprep.subr.bf16.mxu0 %v2165_v1 }
  0x30   :  { %432 = vmatpush1.bf16.msra.mxu1 %v2256_v10 }
  0x31   :  { %433 = vmatprep.subr.bf16.mxu1 %v2262_v11  ;;  %1716 = vmatpush3.bf16.msra.mxu0 %v2410_v31 }
  0x32   :  { %1717 = vmatprep.subr.bf16.mxu0 %v2165_v1 }
  0x34   :  { %434 = vmatpush1.bf16.msra.mxu1 %v2274_v13 }
  0x35   :  { %435 = vmatprep.subr.bf16.mxu1 %v2280_v14  ;;  %1718 = vmatpush3.bf16.msra.mxu0 %v2417_v32 }
  0x36   :  { %1719 = vmatprep.subr.bf16.mxu0 %v2165_v1 }
  0x38   :  { %436 = vmatpush1.bf16.msra.mxu1 %v2294_v16 }
  0x39   :  { %437 = vmatprep.subr.bf16.mxu1 %v2300_v17  ;;  %1720 = vmatpush3.bf16.msra.mxu0 %v2423_v33 }
  0x3a   :  { %1721 = vmatprep.subr.bf16.mxu0 %v2165_v1 }
  0x3c   :  { %438 = vmatpush1.bf16.msra.mxu1 %v2313_v19 }
  0x3d   :  { %439 = vmatprep.subr.bf16.mxu1 %v2319_v20  ;;  %1722 = vmatpush3.bf16.msra.mxu0 %v2430_v34 }
  0x3e   :  { %1723 = vmatprep.subr.bf16.mxu0 %v2165_v1 }
  0x40   :  { %440 = vmatpush1.bf16.msra.mxu1 %v2332_v22 }
  0x41   :  { %1749 = vmatprep.subr.bf16.mxu1 %v2165_v1  ;;  %1724 = vmatpush3.bf16.msra.mxu0 %v2437_v35 }
  0x42   :  { %1729 = vmatprep.subr.bf16.mxu0 %v2165_v1 }
  0xf5   :  { %v263_v44 = vpop.f32.mrb[0].mxu0 }
  0xf6   :  { %v264_v45 = vadd.f32 %v263_v44, %v2445_v41  ;;  %v265_v46 = vpop.f32.mrb[1].mxu0  ;;  %v304_v54 = vpop.f32.mrb[0].mxu1 }
  0xf7   :  { %v266_v47 = vadd.f32 %v265_v46, %v2447_v42  ;;  %v267_v48 = vpop.f32.mrb[2].mxu0  ;;  %v1707_v56 = vpop.f32.mrb[1].mxu1  ;;  %v305_v36 = vadd.f32 %v304_v54, %v2457_v62 }
  0xf8   :  { %v310_v49 = vadd.f32 %v264_v45, %v97_v43  ;;  %v268_v51 = vpop.f32.mrb[3].mxu0  ;;  %v307_v57 = vpop.f32.mrb[2].mxu1 }
  0xf9   :  { %v317_v53 = vadd.f32 %v266_v47, %v98_v50  ;;  %v1708_v58 = vpop.f32.mrb[3].mxu1  ;;  %v1503_v51 = vld [vmem:[%s3137_s0 + $0x18] sm:$0xff] }
  0xfa   :  { %v1493_v52 = vmul.f32 -1.442695, %v310_v49 }
  0xfb   :  { %v1494_v55 = vmul.f32 -1.442695, %v317_v53 }
  0xfc   :  { %2052 = vpow2.f32 %v1493_v52 }
  0xfd   :  { %2054 = vpow2.f32 %v1494_v55 }
 0x106   :  { %v2053_v59 = vpop.eup %2052 }
 0x107   :  { %v314_v60 = vadd.f32 1.0, %v2053_v59  ;;  %v2055_v63 = vpop.eup %2054 }
 0x108   :  { %v321_v25 = vadd.f32 1.0, %v2055_v63 }
 0x109   :  { %2056 = vrcp.f32 %v314_v60 }
 0x10a   :  { %2058 = vrcp.f32 %v321_v25 }
 0x113   :  { %v2057_v38 = vpop.eup %2056 }
 0x114   :  { %v324_v43 = vmul.f32 %v2057_v38, %v305_v36  ;;  %v2059_v45 = vpop.eup %2058  ;;  %v1504_v36 = vld [vmem:[%s3137_s0 + $0x20] sm:$0xff] }
 0x115   :  { %v327_v46 = vsub.f32 1.0, %v2059_v45  ;;  %v329_v39 = vmul.f32 %v2059_v45, %v2337_v23  ;;  %v2524_v23 = vld [vmem:[%s3138_s5] ss:$0 sm:$0xff] }
 0x116   :  { %v325_v44 = vadd.f32 %v324_v43, %v99_v40 }
 0x118   :  { %2060 = vtanh.f32 %v325_v44 }
 0x122   :  { %v2061_v47 = vpop.eup %2060 }
 0x123   :  { %v328_v37 = vmul.f32 %v2061_v47, %v327_v46 }
 0x125   :  { %v2464_v48 = vadd.f32 %v329_v39, %v328_v37 }
 0x127   :  { %v331_v49 = vpack.c.bf16 %v2464_v48, %v2464_v48 }
 0x129   :  { %1726 = vmatmul.mubr.bf16.vlgmr.msra.gmra.mrb[4].mxu0 %v331_v49  ;;  %458 = vmatmul.mubr.bf16.vlgmr.msra.gmra.mrb[4].mxu1 %v331_v49 }
 0x12a   :  { %1730 = vmatpush3.bf16.msra.mxu0 %v2250_v9  ;;  %1745 = vmatprep.mubr.msk.bf16.mxu0 %vm2167_vm0, %v2165_v1 }
 0x12b   :  { %1731 = vmatprep.subr.bf16.mxu0 %v2165_v1  ;;  %1750 = vmatpush3.bf16.msra.mxu1 %v2389_v28 }
 0x12c   :  { %1751 = vmatprep.subr.bf16.mxu1 %v2165_v1  ;;  %1765 = vmatprep.mubr.msk.bf16.mxu1 %vm2167_vm0, %v2165_v1 }
 0x12e   :  { %1732 = vmatpush3.bf16.msra.mxu0 %v2268_v12 }
 0x12f   :  { %1733 = vmatprep.subr.bf16.mxu0 %v2165_v1  ;;  %1752 = vmatpush3.bf16.msra.mxu1 %v2396_v29 }
 0x130   :  { %1753 = vmatprep.subr.bf16.mxu1 %v2165_v1 }
 0x132   :  { %1734 = vmatpush3.bf16.msra.mxu0 %v2287_v15 }
 0x133   :  { %1735 = vmatprep.subr.bf16.mxu0 %v2165_v1  ;;  %1754 = vmatpush3.bf16.msra.mxu1 %v2403_v30 }
 0x134   :  { %1755 = vmatprep.subr.bf16.mxu1 %v2165_v1 }
 0x136   :  { %1736 = vmatpush3.bf16.msra.mxu0 %v2306_v18 }
 0x137   :  { %1737 = vmatprep.subr.bf16.mxu0 %v2165_v1  ;;  %1756 = vmatpush3.bf16.msra.mxu1 %v2410_v31 }
 0x138   :  { %1757 = vmatprep.subr.bf16.mxu1 %v2165_v1 }
 0x13a   :  { %1738 = vmatpush3.bf16.msra.mxu0 %v2325_v21 }
 0x13b   :  { %1739 = vmatprep.subr.bf16.mxu0 %v2165_v1  ;;  %1758 = vmatpush3.bf16.msra.mxu1 %v2417_v32 }
 0x13c   :  { %1759 = vmatprep.subr.bf16.mxu1 %v2165_v1 }
 0x13e   :  { %1740 = vmatpush3.bf16.msra.mxu0 %v2344_v24 }
 0x13f   :  { %1741 = vmatprep.subr.bf16.mxu0 %v2165_v1  ;;  %1760 = vmatpush3.bf16.msra.mxu1 %v2423_v33 }
 0x140   :  { %1761 = vmatprep.subr.bf16.mxu1 %v2165_v1 }
 0x142   :  { %1742 = vmatpush3.bf16.msra.mxu0 %v2354_v26 }
 0x143   :  { %1743 = vmatprep.subr.bf16.mxu0 %v2165_v1  ;;  %1762 = vmatpush3.bf16.msra.mxu1 %v2430_v34 }
 0x144   :  { %1763 = vmatprep.subr.bf16.mxu1 %v2165_v1 }
 0x146   :  { %1744 = vmatpush3.bf16.msra.mxu0 %v2364_v27 }
 0x147   :  { %574 = vmatprep.subr.bf16.mxu0 %v2206_v0  ;;  %1764 = vmatpush3.bf16.msra.mxu1 %v2437_v35 }
 0x148   :  { %1769 = vmatprep.subr.bf16.mxu1 %v2165_v1 }
 0x149   :  { %1746 = vmatmul.mubr.bf16.vlgmr.msra.gmra.mrb[8].mxu0 %v331_v49 }
 0x14a   :  { %575 = vmatpush1.bf16.msra.mxu0 %v2213_v3  ;;  %606 = vmatprep.mubr.bf16.mxu0 %v2166_v2 }
 0x14b   :  { %576 = vmatprep.subr.bf16.mxu0 %v2221_v4 }
 0x14e   :  { %577 = vmatpush1.bf16.msra.mxu0 %v2227_v5 }
 0x14f   :  { %578 = vmatprep.subr.bf16.mxu0 %v2233_v6 }
 0x152   :  { %579 = vmatpush1.bf16.msra.mxu0 %v2239_v7 }
 0x153   :  { %580 = vmatprep.subr.bf16.mxu0 %v2245_v8 }
 0x156   :  { %581 = vmatpush1.bf16.msra.mxu0 %v2256_v10 }
 0x157   :  { %582 = vmatprep.subr.bf16.mxu0 %v2262_v11 }
 0x15a   :  { %583 = vmatpush1.bf16.msra.mxu0 %v2274_v13 }
 0x15b   :  { %584 = vmatprep.subr.bf16.mxu0 %v2280_v14 }
 0x15e   :  { %585 = vmatpush1.bf16.msra.mxu0 %v2294_v16 }
 0x15f   :  { %586 = vmatprep.subr.bf16.mxu0 %v2300_v17 }
 0x162   :  { %587 = vmatpush1.bf16.msra.mxu0 %v2313_v19 }
 0x163   :  { %588 = vmatprep.subr.bf16.mxu0 %v2319_v20 }
 0x166   :  { %589 = vmatpush1.bf16.msra.mxu0 %v2332_v22 }
 0x167   :  { %1789 = vmatprep.subr.bf16.mxu0 %v2165_v1 }
 0x1fc   :  { %v414_v50 = vpop.f32.mrb[4].mxu0  ;;  %v459_v52 = vpop.f32.mrb[4].mxu1 }
 0x1fd   :  { %v415_v53 = vadd.f32 %v2524_v23, %v414_v50  ;;  %v460_v54 = vadd.f32 %v459_v52, %v2445_v41  ;;  %v1727_v55 = vpop.f32.mrb[5].mxu0  ;;  %v461_v56 = vpop.f32.mrb[5].mxu1  ;;  %v1505_v50 = vld [vmem:[%s3137_s0 + $0x28] sm:$0xff] }
 0x1fe   :  { %v417_v57 = vpop.f32.mrb[6].mxu0  ;;  %v463_v58 = vpop.f32.mrb[6].mxu1  ;;  %v462_v25 = vadd.f32 %v461_v56, %v2447_v42 }
 0x1ff   :  { %420 = vst [vmem:[%s3139_s6] sm:$0xff] %v415_v53  ;;  %v506_v59 = vadd.f32 %v1503_v51, %v460_v54  ;;  %v1728_v60 = vpop.f32.mrb[7].mxu0  ;;  %v464_v61 = vpop.f32.mrb[7].mxu1 }
 0x200   :  { %v513_v38 = vadd.f32 %v1504_v36, %v462_v25 }
 0x201   :  { %v1506_v63 = vmul.f32 -1.442695, %v506_v59 }
 0x202   :  { %v1507_v40 = vmul.f32 -1.442695, %v513_v38 }
 0x203   :  { %2062 = vpow2.f32 %v1506_v63  ;;  %v1509_v63 = vld [vmem:[%s3137_s0 + $0x30] sm:$0xff] }
 0x204   :  { %2064 = vpow2.f32 %v1507_v40 }
 0x20d   :  { %v2063_v43 = vpop.eup %2062 }
 0x20e   :  { %v510_v44 = vadd.f32 1.0, %v2063_v43  ;;  %v2065_v45 = vpop.eup %2064 }
 0x20f   :  { %v517_v46 = vadd.f32 1.0, %v2065_v45 }
 0x210   :  { %2066 = vrcp.f32 %v510_v44 }
 0x211   :  { %2068 = vrcp.f32 %v517_v46 }
 0x21a   :  { %v2067_v49 = vpop.eup %2066 }
 0x21b   :  { %v2069_v55 = vpop.eup %2068 }
 0x21c   :  { %v500_v47 = vpop.f32.mrb[8].mxu0  ;;  %v523_v56 = vsub.f32 1.0, %v2069_v55  ;;  %v525_v59 = vmul.f32 %v2069_v55, %v2464_v48 }
 0x21d   :  { %v501_v37 = vadd.f32 %v500_v47, %v2457_v62  ;;  %v1747_v39 = vpop.f32.mrb[9].mxu0 }
 0x21e   :  { %v503_v51 = vpop.f32.mrb[10].mxu0 }
 0x21f   :  { %v520_v52 = vmul.f32 %v2067_v49, %v501_v37  ;;  %v1748_v53 = vpop.f32.mrb[11].mxu0 }
 0x221   :  { %v521_v54 = vadd.f32 %v1505_v50, %v520_v52  ;;  %v1510_v50 = vld [vmem:[%s3137_s0 + $0x38] sm:$0xff] }
 0x223   :  { %2070 = vtanh.f32 %v521_v54 }
 0x22d   :  { %v2071_v57 = vpop.eup %2070 }
 0x22e   :  { %v524_v58 = vmul.f32 %v2071_v57, %v523_v56 }
 0x230   :  { %v2543_v60 = vadd.f32 %v525_v59, %v524_v58 }
 0x232   :  { %v527_v61 = vpack.c.bf16 %v2543_v60, %v2543_v60 }
 0x234   :  { %1766 = vmatmul.mubr.bf16.vlgmr.msra.gmra.mrb[8].mxu1 %v527_v61  ;;  %607 = vmatmul.mubr.bf16.vlgmr.msra.gmra.mrb[12].mxu0 %v527_v61 }
 0x235   :  { %1770 = vmatpush3.bf16.msra.mxu1 %v2250_v9  ;;  %1785 = vmatprep.mubr.msk.bf16.mxu1 %vm2167_vm0, %v2165_v1 }
 0x236   :  { %1771 = vmatprep.subr.bf16.mxu1 %v2165_v1  ;;  %1790 = vmatpush3.bf16.msra.mxu0 %v2389_v28 }
 0x237   :  { %1791 = vmatprep.subr.bf16.mxu0 %v2165_v1  ;;  %1805 = vmatprep.mubr.msk.bf16.mxu0 %vm2167_vm0, %v2165_v1 }
 0x239   :  { %1772 = vmatpush3.bf16.msra.mxu1 %v2268_v12 }
 0x23a   :  { %1773 = vmatprep.subr.bf16.mxu1 %v2165_v1  ;;  %1792 = vmatpush3.bf16.msra.mxu0 %v2396_v29 }
 0x23b   :  { %1793 = vmatprep.subr.bf16.mxu0 %v2165_v1 }
 0x23d   :  { %1774 = vmatpush3.bf16.msra.mxu1 %v2287_v15 }
 0x23e   :  { %1775 = vmatprep.subr.bf16.mxu1 %v2165_v1  ;;  %1794 = vmatpush3.bf16.msra.mxu0 %v2403_v30 }
 0x23f   :  { %1795 = vmatprep.subr.bf16.mxu0 %v2165_v1 }
 0x241   :  { %1776 = vmatpush3.bf16.msra.mxu1 %v2306_v18 }
 0x242   :  { %1777 = vmatprep.subr.bf16.mxu1 %v2165_v1  ;;  %1796 = vmatpush3.bf16.msra.mxu0 %v2410_v31 }
 0x243   :  { %1797 = vmatprep.subr.bf16.mxu0 %v2165_v1 }
 0x245   :  { %1778 = vmatpush3.bf16.msra.mxu1 %v2325_v21 }
 0x246   :  { %1779 = vmatprep.subr.bf16.mxu1 %v2165_v1  ;;  %1798 = vmatpush3.bf16.msra.mxu0 %v2417_v32 }
 0x247   :  { %1799 = vmatprep.subr.bf16.mxu0 %v2165_v1 }
 0x249   :  { %1780 = vmatpush3.bf16.msra.mxu1 %v2344_v24 }
 0x24a   :  { %1781 = vmatprep.subr.bf16.mxu1 %v2165_v1  ;;  %1800 = vmatpush3.bf16.msra.mxu0 %v2423_v33 }
 0x24b   :  { %1801 = vmatprep.subr.bf16.mxu0 %v2165_v1 }
 0x24d   :  { %1782 = vmatpush3.bf16.msra.mxu1 %v2354_v26 }
 0x24e   :  { %1783 = vmatprep.subr.bf16.mxu1 %v2165_v1  ;;  %1802 = vmatpush3.bf16.msra.mxu0 %v2430_v34 }
 0x24f   :  { %1803 = vmatprep.subr.bf16.mxu0 %v2165_v1 }
 0x251   :  { %1784 = vmatpush3.bf16.msra.mxu1 %v2364_v27 }
 0x252   :  { %723 = vmatprep.subr.bf16.mxu1 %v2206_v0  ;;  %1804 = vmatpush3.bf16.msra.mxu0 %v2437_v35 }
 0x253   :  { %1809 = vmatprep.subr.bf16.mxu0 %v2165_v1 }
 0x254   :  { %1786 = vmatmul.mubr.bf16.vlgmr.msra.gmra.mrb[12].mxu1 %v527_v61 }
 0x255   :  { %724 = vmatpush1.bf16.msra.mxu1 %v2213_v3  ;;  %755 = vmatprep.mubr.bf16.mxu1 %v2166_v2 }
 0x256   :  { %725 = vmatprep.subr.bf16.mxu1 %v2221_v4 }
 0x259   :  { %726 = vmatpush1.bf16.msra.mxu1 %v2227_v5 }
 0x25a   :  { %727 = vmatprep.subr.bf16.mxu1 %v2233_v6 }
 0x25d   :  { %728 = vmatpush1.bf16.msra.mxu1 %v2239_v7 }
 0x25e   :  { %729 = vmatprep.subr.bf16.mxu1 %v2245_v8 }
 0x261   :  { %730 = vmatpush1.bf16.msra.mxu1 %v2256_v10 }
 0x262   :  { %731 = vmatprep.subr.bf16.mxu1 %v2262_v11 }
 0x265   :  { %732 = vmatpush1.bf16.msra.mxu1 %v2274_v13 }
 0x266   :  { %733 = vmatprep.subr.bf16.mxu1 %v2280_v14 }
 0x269   :  { %734 = vmatpush1.bf16.msra.mxu1 %v2294_v16 }
 0x26a   :  { %735 = vmatprep.subr.bf16.mxu1 %v2300_v17 }
 0x26d   :  { %736 = vmatpush1.bf16.msra.mxu1 %v2313_v19 }
 0x26e   :  { %737 = vmatprep.subr.bf16.mxu1 %v2319_v20 }
 0x271   :  { %738 = vmatpush1.bf16.msra.mxu1 %v2332_v22 }
 0x272   :  { %1829 = vmatprep.subr.bf16.mxu1 %v2165_v1 }
 0x307   :  { %v562_v48 = vpop.f32.mrb[8].mxu1  ;;  %v608_v25 = vpop.f32.mrb[12].mxu0 }
 0x308   :  { %v563_v36 = vadd.f32 %v2524_v23, %v562_v48  ;;  %v609_v38 = vadd.f32 %v608_v25, %v2445_v41  ;;  %v1767_v40 = vpop.f32.mrb[9].mxu1  ;;  %v610_v43 = vpop.f32.mrb[13].mxu0  ;;  %v1511_v48 = vld [vmem:[%s3137_s0 + $0x40] sm:$0xff] }
 0x309   :  { %v565_v44 = vpop.f32.mrb[10].mxu1  ;;  %v612_v45 = vpop.f32.mrb[14].mxu0  ;;  %v611_v49 = vadd.f32 %v610_v43, %v2447_v42 }
 0x30a   :  { %1508 = vst [vmem:[%s3139_s6 + $0x8] sm:$0xff] %v563_v36  ;;  %v655_v46 = vadd.f32 %v1509_v63, %v609_v38  ;;  %v1768_v47 = vpop.f32.mrb[11].mxu1  ;;  %v613_v37 = vpop.f32.mrb[15].mxu0 }
 0x30b   :  { %v662_v51 = vadd.f32 %v1510_v50, %v611_v49 }
 0x30c   :  { %v1512_v39 = vmul.f32 -1.442695, %v655_v46 }
 0x30d   :  { %v1513_v52 = vmul.f32 -1.442695, %v662_v51 }
 0x30e   :  { %2072 = vpow2.f32 %v1512_v39 }
 0x30f   :  { %2074 = vpow2.f32 %v1513_v52 }
 0x318   :  { %v2073_v53 = vpop.eup %2072 }
 0x319   :  { %v659_v54 = vadd.f32 1.0, %v2073_v53  ;;  %v2075_v55 = vpop.eup %2074 }
 0x31a   :  { %v666_v56 = vadd.f32 1.0, %v2075_v55 }
 0x31b   :  { %2076 = vrcp.f32 %v659_v54  ;;  %v1516_v54 = vld [vmem:[%s3137_s0 + $0x50] sm:$0xff] }
 0x31c   :  { %2078 = vrcp.f32 %v666_v56 }
 0x325   :  { %v2077_v61 = vpop.eup %2076 }
 0x326   :  { %v2079_v40 = vpop.eup %2078 }
 0x327   :  { %v649_v57 = vpop.f32.mrb[12].mxu1  ;;  %v672_v43 = vsub.f32 1.0, %v2079_v40  ;;  %v674_v46 = vmul.f32 %v2079_v40, %v2543_v60 }
 0x328   :  { %v650_v58 = vadd.f32 %v649_v57, %v2457_v62  ;;  %v1787_v59 = vpop.f32.mrb[13].mxu1 }
 0x329   :  { %v652_v63 = vpop.f32.mrb[14].mxu1 }
 0x32a   :  { %v669_v25 = vmul.f32 %v2077_v61, %v650_v58  ;;  %v1788_v36 = vpop.f32.mrb[15].mxu1 }
 0x32c   :  { %v670_v38 = vadd.f32 %v1511_v48, %v669_v25 }
 0x32e   :  { %2080 = vtanh.f32 %v670_v38  ;;  %v1517_v38 = vld [vmem:[%s3137_s0 + $0x58] sm:$0xff] }
 0x338   :  { %v2081_v44 = vpop.eup %2080 }
 0x339   :  { %v673_v45 = vmul.f32 %v2081_v44, %v672_v43 }
 0x33b   :  { %v2617_v47 = vadd.f32 %v674_v46, %v673_v45 }
 0x33d   :  { %v676_v37 = vpack.c.bf16 %v2617_v47, %v2617_v47 }
 0x33f   :  { %1806 = vmatmul.mubr.bf16.vlgmr.msra.gmra.mrb[16].mxu0 %v676_v37  ;;  %756 = vmatmul.mubr.bf16.vlgmr.msra.gmra.mrb[16].mxu1 %v676_v37 }
 0x340   :  { %1810 = vmatpush3.bf16.msra.mxu0 %v2250_v9  ;;  %1825 = vmatprep.mubr.msk.bf16.mxu0 %vm2167_vm0, %v2165_v1 }
 0x341   :  { %1811 = vmatprep.subr.bf16.mxu0 %v2165_v1  ;;  %1830 = vmatpush3.bf16.msra.mxu1 %v2389_v28 }
 0x342   :  { %1831 = vmatprep.subr.bf16.mxu1 %v2165_v1  ;;  %1845 = vmatprep.mubr.msk.bf16.mxu1 %vm2167_vm0, %v2165_v1 }
 0x344   :  { %1812 = vmatpush3.bf16.msra.mxu0 %v2268_v12 }
 0x345   :  { %1813 = vmatprep.subr.bf16.mxu0 %v2165_v1  ;;  %1832 = vmatpush3.bf16.msra.mxu1 %v2396_v29 }
 0x346   :  { %1833 = vmatprep.subr.bf16.mxu1 %v2165_v1 }
 0x348   :  { %1814 = vmatpush3.bf16.msra.mxu0 %v2287_v15 }
 0x349   :  { %1815 = vmatprep.subr.bf16.mxu0 %v2165_v1  ;;  %1834 = vmatpush3.bf16.msra.mxu1 %v2403_v30 }
 0x34a   :  { %1835 = vmatprep.subr.bf16.mxu1 %v2165_v1 }
 0x34c   :  { %1816 = vmatpush3.bf16.msra.mxu0 %v2306_v18 }
 0x34d   :  { %1817 = vmatprep.subr.bf16.mxu0 %v2165_v1  ;;  %1836 = vmatpush3.bf16.msra.mxu1 %v2410_v31 }
 0x34e   :  { %1837 = vmatprep.subr.bf16.mxu1 %v2165_v1 }
 0x350   :  { %1818 = vmatpush3.bf16.msra.mxu0 %v2325_v21 }
 0x351   :  { %1819 = vmatprep.subr.bf16.mxu0 %v2165_v1  ;;  %1838 = vmatpush3.bf16.msra.mxu1 %v2417_v32 }
 0x352   :  { %1839 = vmatprep.subr.bf16.mxu1 %v2165_v1 }
 0x354   :  { %1820 = vmatpush3.bf16.msra.mxu0 %v2344_v24 }
 0x355   :  { %1821 = vmatprep.subr.bf16.mxu0 %v2165_v1  ;;  %1840 = vmatpush3.bf16.msra.mxu1 %v2423_v33 }
 0x356   :  { %1841 = vmatprep.subr.bf16.mxu1 %v2165_v1 }
 0x358   :  { %1822 = vmatpush3.bf16.msra.mxu0 %v2354_v26 }
 0x359   :  { %1823 = vmatprep.subr.bf16.mxu0 %v2165_v1  ;;  %1842 = vmatpush3.bf16.msra.mxu1 %v2430_v34 }
 0x35a   :  { %1843 = vmatprep.subr.bf16.mxu1 %v2165_v1 }
 0x35c   :  { %1824 = vmatpush3.bf16.msra.mxu0 %v2364_v27 }
 0x35d   :  { %872 = vmatprep.subr.bf16.mxu0 %v2206_v0  ;;  %1844 = vmatpush3.bf16.msra.mxu1 %v2437_v35 }
 0x35e   :  { %1849 = vmatprep.subr.bf16.mxu1 %v2165_v1 }
 0x35f   :  { %1826 = vmatmul.mubr.bf16.vlgmr.msra.gmra.mrb[20].mxu0 %v676_v37 }
 0x360   :  { %873 = vmatpush1.bf16.msra.mxu0 %v2213_v3  ;;  %904 = vmatprep.mubr.bf16.mxu0 %v2166_v2  ;;  %v1515_v3 = vld [vmem:[%s3137_s0 + $0x48] sm:$0xff] }
 0x361   :  { %874 = vmatprep.subr.bf16.mxu0 %v2221_v4 }
 0x364   :  { %875 = vmatpush1.bf16.msra.mxu0 %v2227_v5 }
 0x365   :  { %876 = vmatprep.subr.bf16.mxu0 %v2233_v6 }
 0x368   :  { %877 = vmatpush1.bf16.msra.mxu0 %v2239_v7 }
 0x369   :  { %878 = vmatprep.subr.bf16.mxu0 %v2245_v8 }
 0x36c   :  { %879 = vmatpush1.bf16.msra.mxu0 %v2256_v10 }
 0x36d   :  { %880 = vmatprep.subr.bf16.mxu0 %v2262_v11 }
 0x370   :  { %881 = vmatpush1.bf16.msra.mxu0 %v2274_v13 }
 0x371   :  { %882 = vmatprep.subr.bf16.mxu0 %v2280_v14 }
 0x374   :  { %883 = vmatpush1.bf16.msra.mxu0 %v2294_v16 }
 0x375   :  { %884 = vmatprep.subr.bf16.mxu0 %v2300_v17 }
 0x378   :  { %885 = vmatpush1.bf16.msra.mxu0 %v2313_v19 }
 0x379   :  { %886 = vmatprep.subr.bf16.mxu0 %v2319_v20 }
 0x37c   :  { %887 = vmatpush1.bf16.msra.mxu0 %v2332_v22 }
 0x37d   :  { %1869 = vmatprep.subr.bf16.mxu0 %v2165_v1 }
 0x412   :  { %v711_v0 = vpop.f32.mrb[16].mxu0  ;;  %v757_v4 = vpop.f32.mrb[16].mxu1 }
 0x413   :  { %v712_v5 = vadd.f32 %v2524_v23, %v711_v0  ;;  %v758_v6 = vadd.f32 %v757_v4, %v2445_v41  ;;  %v1807_v7 = vpop.f32.mrb[17].mxu0  ;;  %v759_v8 = vpop.f32.mrb[17].mxu1 }
 0x414   :  { %v714_v60 = vpop.f32.mrb[18].mxu0  ;;  %v761_v39 = vpop.f32.mrb[18].mxu1  ;;  %v760_v53 = vadd.f32 %v759_v8, %v2447_v42 }
 0x415   :  { %1514 = vst [vmem:[%s3139_s6 + $0x10] sm:$0xff] %v712_v5  ;;  %v804_v49 = vadd.f32 %v1515_v3, %v758_v6  ;;  %v1808_v50 = vpop.f32.mrb[19].mxu0  ;;  %v762_v51 = vpop.f32.mrb[19].mxu1  ;;  %v1522_v39 = vld [vmem:[%s3137_s0 + $0x68] sm:$0xff] }
 0x416   :  { %v811_v55 = vadd.f32 %v1516_v54, %v760_v53 }
 0x417   :  { %v1518_v52 = vmul.f32 -1.442695, %v804_v49 }
 0x418   :  { %v1519_v56 = vmul.f32 -1.442695, %v811_v55 }
 0x419   :  { %2082 = vpow2.f32 %v1518_v52 }
 0x41a   :  { %2084 = vpow2.f32 %v1519_v56 }
 0x423   :  { %v2083_v57 = vpop.eup %2082 }
 0x424   :  { %v808_v58 = vadd.f32 1.0, %v2083_v57  ;;  %v2085_v59 = vpop.eup %2084 }
 0x425   :  { %v815_v61 = vadd.f32 1.0, %v2085_v59  ;;  %v1523_v59 = vld [vmem:[%s3137_s0 + $0x70] sm:$0xff] }
 0x426   :  { %2086 = vrcp.f32 %v808_v58 }
 0x427   :  { %2088 = vrcp.f32 %v815_v61 }
 0x430   :  { %v2087_v36 = vpop.eup %2086 }
 0x431   :  { %v2089_v46 = vpop.eup %2088 }
 0x432   :  { %v798_v48 = vpop.f32.mrb[20].mxu0  ;;  %v821_v37 = vsub.f32 1.0, %v2089_v46  ;;  %v823_v4 = vmul.f32 %v2089_v46, %v2617_v47 }
 0x433   :  { %v799_v63 = vadd.f32 %v798_v48, %v2457_v62  ;;  %v1827_v25 = vpop.f32.mrb[21].mxu0 }
 0x434   :  { %v801_v40 = vpop.f32.mrb[22].mxu0 }
 0x435   :  { %v818_v43 = vmul.f32 %v2087_v36, %v799_v63  ;;  %v1828_v44 = vpop.f32.mrb[23].mxu0 }
 0x437   :  { %v819_v45 = vadd.f32 %v1517_v38, %v818_v43 }
 0x439   :  { %2090 = vtanh.f32 %v819_v45 }
 0x443   :  { %v2091_v0 = vpop.eup %2090 }
 0x444   :  { %v822_v3 = vmul.f32 %v2091_v0, %v821_v37  ;;  %v2807_v37 = vld [vmem:[%s3133_s1 + $0x8] ss:$12 sps:$4 sm:$0xff]   ;;  %v2820_v0 = vld [vmem:[%s3133_s1 + $0x20] ss:$12 sps:$4 sm:$0xff]  }
 0x446   :  { %v2691_v5 = vadd.f32 %v823_v4, %v822_v3  ;;  %v2838_v3 = vld [vmem:[%s3133_s1 + $0x50] ss:$12 sps:$4 sm:$0xff]  }
 0x447   :  { %v2908_v4 = vld [vmem:[%s3133_s1 + $0x7c] ss:$12 sps:$4 sm:$0xff]  }
 0x448   :  { %v825_v6 = vpack.c.bf16 %v2691_v5, %v2691_v5 }
 0x44a   :  { %1846 = vmatmul.mubr.bf16.vlgmr.msra.gmra.mrb[20].mxu1 %v825_v6  ;;  %905 = vmatmul.mubr.bf16.vlgmr.msra.gmra.mrb[24].mxu0 %v825_v6 }
 0x44b   :  { %1850 = vmatpush3.bf16.msra.mxu1 %v2250_v9  ;;  %1865 = vmatprep.mubr.msk.bf16.mxu1 %vm2167_vm0, %v2165_v1  ;;  %v2731_v9 = vld [vmem:[%s3133_s1 + $0x4] ss:$12 sps:$4 sm:$0xff]  }
 0x44c   :  { %1851 = vmatprep.subr.bf16.mxu1 %v2165_v1  ;;  %1870 = vmatpush3.bf16.msra.mxu0 %v2389_v28 }
 0x44d   :  { %1871 = vmatprep.subr.bf16.mxu0 %v2165_v1  ;;  %1885 = vmatprep.mubr.msk.bf16.mxu0 %vm2167_vm0, %v2165_v1 }
 0x44f   :  { %1852 = vmatpush3.bf16.msra.mxu1 %v2268_v12  ;;  %v2739_v12 = vld [vmem:[%s3133_s1] ss:$12 sps:$4 sm:$0xff]  }
 0x450   :  { %1853 = vmatprep.subr.bf16.mxu1 %v2165_v1  ;;  %1872 = vmatpush3.bf16.msra.mxu0 %v2396_v29 }
 0x451   :  { %1873 = vmatprep.subr.bf16.mxu0 %v2165_v1 }
 0x453   :  { %1854 = vmatpush3.bf16.msra.mxu1 %v2287_v15  ;;  %v2746_v15 = vld [vmem:[%s3133_s1 + $0x1c] ss:$12 sps:$4 sm:$0xff]  }
 0x454   :  { %1855 = vmatprep.subr.bf16.mxu1 %v2165_v1  ;;  %1874 = vmatpush3.bf16.msra.mxu0 %v2403_v30 }
 0x455   :  { %1875 = vmatprep.subr.bf16.mxu0 %v2165_v1 }
 0x457   :  { %1856 = vmatpush3.bf16.msra.mxu1 %v2306_v18  ;;  %v2752_v18 = vld [vmem:[%s3133_s1 + $0x18] ss:$12 sps:$4 sm:$0xff]  }
 0x458   :  { %1857 = vmatprep.subr.bf16.mxu1 %v2165_v1  ;;  %1876 = vmatpush3.bf16.msra.mxu0 %v2410_v31 }
 0x459   :  { %1877 = vmatprep.subr.bf16.mxu0 %v2165_v1 }
 0x45b   :  { %1858 = vmatpush3.bf16.msra.mxu1 %v2325_v21  ;;  %v2758_v21 = vld [vmem:[%s3133_s1 + $0x34] ss:$12 sps:$4 sm:$0xff]  }
 0x45c   :  { %1859 = vmatprep.subr.bf16.mxu1 %v2165_v1  ;;  %1878 = vmatpush3.bf16.msra.mxu0 %v2417_v32 }
 0x45d   :  { %1879 = vmatprep.subr.bf16.mxu0 %v2165_v1 }
 0x45f   :  { %1860 = vmatpush3.bf16.msra.mxu1 %v2344_v24  ;;  %v2764_v24 = vld [vmem:[%s3133_s1 + $0x30] ss:$12 sps:$4 sm:$0xff]  }
 0x460   :  { %1861 = vmatprep.subr.bf16.mxu1 %v2165_v1  ;;  %1880 = vmatpush3.bf16.msra.mxu0 %v2423_v33 }
 0x461   :  { %1881 = vmatprep.subr.bf16.mxu0 %v2165_v1 }
 0x463   :  { %1862 = vmatpush3.bf16.msra.mxu1 %v2354_v26  ;;  %v2770_v26 = vld [vmem:[%s3133_s1 + $0x4c] ss:$12 sps:$4 sm:$0xff]  }
 0x464   :  { %1863 = vmatprep.subr.bf16.mxu1 %v2165_v1  ;;  %1882 = vmatpush3.bf16.msra.mxu0 %v2430_v34 }
 0x465   :  { %1883 = vmatprep.subr.bf16.mxu0 %v2165_v1 }
 0x467   :  { %1864 = vmatpush3.bf16.msra.mxu1 %v2364_v27 }
 0x468   :  { %1021 = vmatprep.subr.bf16.mxu1 %v2731_v9  ;;  %1884 = vmatpush3.bf16.msra.mxu0 %v2437_v35 }
 0x469   :  { %1889 = vmatprep.subr.bf16.mxu0 %v2165_v1 }
 0x46a   :  { %1866 = vmatmul.mubr.bf16.vlgmr.msra.gmra.mrb[24].mxu1 %v825_v6  ;;  %v2920_v6 = vld [vmem:[%s3133_s1 + $0x94] ss:$12 sps:$4 sm:$0xff]  }
 0x46b   :  { %1022 = vmatpush1.bf16.msra.mxu1 %v2739_v12  ;;  %1053 = vmatprep.mubr.bf16.mxu1 %v2166_v2 }
 0x46c   :  { %1023 = vmatprep.subr.bf16.mxu1 %v2746_v15 }
 0x46f   :  { %1024 = vmatpush1.bf16.msra.mxu1 %v2752_v18 }
 0x470   :  { %1025 = vmatprep.subr.bf16.mxu1 %v2758_v21 }
 0x473   :  { %1026 = vmatpush1.bf16.msra.mxu1 %v2764_v24 }
 0x474   :  { %1027 = vmatprep.subr.bf16.mxu1 %v2770_v26 }
 0x477   :  { %1028 = vmatpush1.bf16.msra.mxu1 %v2256_v10  ;;  %v1521_v10 = vld [vmem:[%s3137_s0 + $0x60] sm:$0xff] }
 0x478   :  { %1029 = vmatprep.subr.bf16.mxu1 %v2262_v11 }
 0x47b   :  { %1030 = vmatpush1.bf16.msra.mxu1 %v2274_v13 }
 0x47c   :  { %1031 = vmatprep.subr.bf16.mxu1 %v2280_v14 }
 0x47f   :  { %1032 = vmatpush1.bf16.msra.mxu1 %v2294_v16 }
 0x480   :  { %1033 = vmatprep.subr.bf16.mxu1 %v2300_v17 }
 0x483   :  { %1034 = vmatpush1.bf16.msra.mxu1 %v2313_v19 }
 0x484   :  { %1035 = vmatprep.subr.bf16.mxu1 %v2319_v20 }
 0x487   :  { %1036 = vmatpush1.bf16.msra.mxu1 %v2332_v22 }
 0x488   :  { %1909 = vmatprep.subr.bf16.mxu1 %v2165_v1 }
 0x51d   :  { %v860_v27 = vpop.f32.mrb[20].mxu1  ;;  %v906_v11 = vpop.f32.mrb[24].mxu0 }
 0x51e   :  { %v861_v13 = vadd.f32 %v2524_v23, %v860_v27  ;;  %v907_v14 = vadd.f32 %v906_v11, %v2445_v41  ;;  %v1847_v16 = vpop.f32.mrb[21].mxu1  ;;  %v908_v17 = vpop.f32.mrb[25].mxu0  ;;  %v2926_v27 = vld [vmem:[%s3133_s1 + $0x90] ss:$12 sps:$4 sm:$0xff]   ;;  %v2938_v11 = vld [vmem:[%s3133_s1 + $0xa8] ss:$12 sps:$4 sm:$0xff]  }
 0x51f   :  { %v863_v47 = vpop.f32.mrb[22].mxu1  ;;  %v910_v19 = vpop.f32.mrb[26].mxu0  ;;  %v909_v60 = vadd.f32 %v908_v17, %v2447_v42 }
 0x520   :  { %1520 = vst [vmem:[%s3139_s6 + $0x18] sm:$0xff] %v861_v13  ;;  %v953_v20 = vadd.f32 %v1521_v10, %v907_v14  ;;  %v1848_v22 = vpop.f32.mrb[23].mxu1  ;;  %v911_v7 = vpop.f32.mrb[27].mxu0  ;;  %v2932_v10 = vld [vmem:[%s3133_s1 + $0xac] ss:$12 sps:$4 sm:$0xff]  }
 0x521   :  { %v960_v49 = vadd.f32 %v1522_v39, %v909_v60  ;;  %v1527_v14 = vld [vmem:[%s3137_s0 + $0x78] sm:$0xff] }
 0x522   :  { %v1524_v8 = vmul.f32 -1.442695, %v953_v20 }
 0x523   :  { %v1525_v50 = vmul.f32 -1.442695, %v960_v49 }
 0x524   :  { %2092 = vpow2.f32 %v1524_v8 }
 0x525   :  { %2094 = vpow2.f32 %v1525_v50 }
 0x52e   :  { %v2093_v51 = vpop.eup %2092 }
 0x52f   :  { %v957_v52 = vadd.f32 1.0, %v2093_v51  ;;  %v2095_v53 = vpop.eup %2094  ;;  %v1528_v51 = vld [vmem:[%s3137_s0 + $0x80] sm:$0xff] }
 0x530   :  { %v964_v54 = vadd.f32 1.0, %v2095_v53 }
 0x531   :  { %2096 = vrcp.f32 %v957_v52 }
 0x532   :  { %2098 = vrcp.f32 %v964_v54 }
 0x53b   :  { %v2097_v58 = vpop.eup %2096 }
 0x53c   :  { %v2099_v36 = vpop.eup %2098 }
 0x53d   :  { %v947_v55 = vpop.f32.mrb[24].mxu1  ;;  %v970_v38 = vsub.f32 1.0, %v2099_v36  ;;  %v972_v44 = vmul.f32 %v2099_v36, %v2691_v5  ;;  %v2914_v5 = vld [vmem:[%s3133_s1 + $0x78] ss:$12 sps:$4 sm:$0xff]  }
 0x53e   :  { %v948_v56 = vadd.f32 %v947_v55, %v2457_v62  ;;  %v1867_v57 = vpop.f32.mrb[25].mxu1 }
 0x53f   :  { %v950_v61 = vpop.f32.mrb[26].mxu1 }
 0x540   :  { %v967_v48 = vmul.f32 %v2097_v58, %v948_v56  ;;  %v1868_v63 = vpop.f32.mrb[27].mxu1 }
 0x541   :  { %v1529_v63 = vld [vmem:[%s3137_s0 + $0x88] sm:$0xff] }
 0x542   :  { %v968_v25 = vadd.f32 %v1523_v59, %v967_v48 }
 0x544   :  { %2100 = vtanh.f32 %v968_v25 }
 0x54e   :  { %v2101_v40 = vpop.eup %2100 }
 0x54f   :  { %v971_v43 = vmul.f32 %v2101_v40, %v970_v38 }
 0x551   :  { %v2800_v45 = vadd.f32 %v972_v44, %v971_v43 }
 0x553   :  { %v974_v46 = vpack.c.bf16 %v2800_v45, %v2800_v45 }
 0x555   :  { %1886 = vmatmul.mubr.bf16.vlgmr.msra.gmra.mrb[28].mxu0 %v974_v46  ;;  %1054 = vmatmul.mubr.bf16.vlgmr.msra.gmra.mrb[28].mxu1 %v974_v46 }
 0x556   :  { %1890 = vmatpush3.bf16.msra.mxu0 %v2807_v37  ;;  %1905 = vmatprep.mubr.msk.bf16.mxu0 %vm2167_vm0, %v2165_v1 }
 0x557   :  { %1891 = vmatprep.subr.bf16.mxu0 %v2165_v1  ;;  %1910 = vmatpush3.bf16.msra.mxu1 %v2389_v28  ;;  %v2829_v28 = vld [vmem:[%s3133_s1 + $0x38] ss:$12 sps:$4 sm:$0xff]  }
 0x558   :  { %1911 = vmatprep.subr.bf16.mxu1 %v2165_v1  ;;  %1925 = vmatprep.mubr.msk.bf16.mxu1 %vm2167_vm0, %v2165_v1 }
 0x55a   :  { %1892 = vmatpush3.bf16.msra.mxu0 %v2820_v0 }
 0x55b   :  { %1893 = vmatprep.subr.bf16.mxu0 %v2165_v1  ;;  %1912 = vmatpush3.bf16.msra.mxu1 %v2396_v29  ;;  %v2847_v29 = vld [vmem:[%s3133_s1 + $0x68] ss:$12 sps:$4 sm:$0xff]  }
 0x55c   :  { %1913 = vmatprep.subr.bf16.mxu1 %v2165_v1 }
 0x55e   :  { %1894 = vmatpush3.bf16.msra.mxu0 %v2829_v28 }
 0x55f   :  { %1895 = vmatprep.subr.bf16.mxu0 %v2165_v1  ;;  %1914 = vmatpush3.bf16.msra.mxu1 %v2403_v30  ;;  %v2856_v30 = vld [vmem:[%s3133_s1 + $0x80] ss:$12 sps:$4 sm:$0xff]  }
 0x560   :  { %1915 = vmatprep.subr.bf16.mxu1 %v2165_v1 }
 0x562   :  { %1896 = vmatpush3.bf16.msra.mxu0 %v2838_v3 }
 0x563   :  { %1897 = vmatprep.subr.bf16.mxu0 %v2165_v1  ;;  %1916 = vmatpush3.bf16.msra.mxu1 %v2410_v31  ;;  %v2865_v31 = vld [vmem:[%s3133_s1 + $0x98] ss:$12 sps:$4 sm:$0xff]  }
 0x564   :  { %1917 = vmatprep.subr.bf16.mxu1 %v2165_v1 }
 0x566   :  { %1898 = vmatpush3.bf16.msra.mxu0 %v2847_v29 }
 0x567   :  { %1899 = vmatprep.subr.bf16.mxu0 %v2165_v1  ;;  %1918 = vmatpush3.bf16.msra.mxu1 %v2417_v32  ;;  %v2874_v32 = vld [vmem:[%s3133_s1 + $0xb0] ss:$12 sps:$4 sm:$0xff]  }
 0x568   :  { %1919 = vmatprep.subr.bf16.mxu1 %v2165_v1 }
 0x56a   :  { %1900 = vmatpush3.bf16.msra.mxu0 %v2856_v30 }
 0x56b   :  { %1901 = vmatprep.subr.bf16.mxu0 %v2165_v1  ;;  %1920 = vmatpush3.bf16.msra.mxu1 %v2423_v33  ;;  %v2890_v33 = vld [vmem:[%s3133_s1 + $0x48] ss:$12 sps:$4 sm:$0xff]  }
 0x56c   :  { %1921 = vmatprep.subr.bf16.mxu1 %v2165_v1 }
 0x56e   :  { %1902 = vmatpush3.bf16.msra.mxu0 %v2865_v31 }
 0x56f   :  { %1903 = vmatprep.subr.bf16.mxu0 %v2165_v1  ;;  %1922 = vmatpush3.bf16.msra.mxu1 %v2430_v34  ;;  %v2896_v34 = vld [vmem:[%s3133_s1 + $0x64] ss:$12 sps:$4 sm:$0xff]  }
 0x570   :  { %1923 = vmatprep.subr.bf16.mxu1 %v2165_v1 }
 0x572   :  { %1904 = vmatpush3.bf16.msra.mxu0 %v2874_v32 }
 0x573   :  { %1170 = vmatprep.subr.bf16.mxu0 %v2731_v9  ;;  %1924 = vmatpush3.bf16.msra.mxu1 %v2437_v35  ;;  %v2902_v35 = vld [vmem:[%s3133_s1 + $0x60] ss:$12 sps:$4 sm:$0xff]  }
 0x574   :  { %1929 = vmatprep.subr.bf16.mxu1 %v2165_v1 }
 0x575   :  { %1906 = vmatmul.mubr.bf16.vlgmr.msra.gmra.mrb[32].mxu0 %v974_v46 }
 0x576   :  { %1171 = vmatpush1.bf16.msra.mxu0 %v2739_v12  ;;  %1202 = vmatprep.mubr.bf16.mxu0 %v2166_v2 }
 0x577   :  { %1172 = vmatprep.subr.bf16.mxu0 %v2746_v15 }
 0x57a   :  { %1173 = vmatpush1.bf16.msra.mxu0 %v2752_v18 }
 0x57b   :  { %1174 = vmatprep.subr.bf16.mxu0 %v2758_v21 }
 0x57e   :  { %1175 = vmatpush1.bf16.msra.mxu0 %v2764_v24 }
 0x57f   :  { %1176 = vmatprep.subr.bf16.mxu0 %v2770_v26 }
 0x582   :  { %1177 = vmatpush1.bf16.msra.mxu0 %v2890_v33 }
 0x583   :  { %1178 = vmatprep.subr.bf16.mxu0 %v2896_v34 }
 0x586   :  { %1179 = vmatpush1.bf16.msra.mxu0 %v2902_v35 }
 0x587   :  { %1180 = vmatprep.subr.bf16.mxu0 %v2908_v4 }
 0x58a   :  { %1181 = vmatpush1.bf16.msra.mxu0 %v2914_v5 }
 0x58b   :  { %1182 = vmatprep.subr.bf16.mxu0 %v2920_v6 }
 0x58e   :  { %1183 = vmatpush1.bf16.msra.mxu0 %v2926_v27 }
 0x58f   :  { %1184 = vmatprep.subr.bf16.mxu0 %v2932_v10 }
 0x592   :  { %1185 = vmatpush1.bf16.msra.mxu0 %v2938_v11 }
 0x593   :  { %1949 = vmatprep.subr.bf16.mxu0 %v2165_v1 }
 0x628   :  { %v1009_v13 = vpop.f32.mrb[28].mxu0  ;;  %v1055_v16 = vpop.f32.mrb[28].mxu1 }
 0x629   :  { %v1010_v17 = vadd.f32 %v2524_v23, %v1009_v13  ;;  %v1056_v47 = vadd.f32 %v1055_v16, %v2445_v41  ;;  %v1887_v19 = vpop.f32.mrb[29].mxu0  ;;  %v1057_v20 = vpop.f32.mrb[29].mxu1 }
 0x62a   :  { %v1012_v22 = vpop.f32.mrb[30].mxu0  ;;  %v1059_v7 = vpop.f32.mrb[30].mxu1  ;;  %v1058_v50 = vadd.f32 %v1057_v20, %v2447_v42  ;;  %v2990_v19 = vld [vmem:[%s3135_s4 + $0x10] sm:$0xff]   ;;  %v2999_v20 = vld [vmem:[%s3135_s4 + $0x18] sm:$0xff]  }
 0x62b   :  { %1526 = vst [vmem:[%s3139_s6 + $0x20] sm:$0xff] %v1010_v17  ;;  %v1102_v8 = vadd.f32 %v1527_v14, %v1056_v47  ;;  %v1888_v60 = vpop.f32.mrb[31].mxu0  ;;  %v1060_v39 = vpop.f32.mrb[31].mxu1  ;;  %v2970_v47 = vld [vmem:[%s3135_s4] sm:$0xff]   ;;  %v3017_v7 = vld [vmem:[%s3135_s4 + $0x28] sm:$0xff]  }
 0x62c   :  { %v1109_v52 = vadd.f32 %v1528_v51, %v1058_v50  ;;  %v3008_v22 = vld [vmem:[%s3135_s4 + $0x20] sm:$0xff]   ;;  %v3035_v60 = vld [vmem:[%s3135_s4 + $0x38] sm:$0xff]  }
 0x62d   :  { %v1530_v49 = vmul.f32 -1.442695, %v1102_v8  ;;  %v3026_v8 = vld [vmem:[%s3135_s4 + $0x30] sm:$0xff]  }
 0x62e   :  { %v1531_v53 = vmul.f32 -1.442695, %v1109_v52 }
 0x62f   :  { %2102 = vpow2.f32 %v1530_v49 }
 0x630   :  { %2104 = vpow2.f32 %v1531_v53 }
 0x639   :  { %v2103_v54 = vpop.eup %2102 }
 0x63a   :  { %v1106_v55 = vadd.f32 1.0, %v2103_v54  ;;  %v2105_v56 = vpop.eup %2104 }
 0x63b   :  { %v1113_v57 = vadd.f32 1.0, %v2105_v56 }
 0x63c   :  { %2106 = vrcp.f32 %v1106_v55  ;;  %v1535_v55 = vld [vmem:[%s3137_s0 + $0xa0] sm:$0xff] }
 0x63d   :  { %2108 = vrcp.f32 %v1113_v57 }
 0x646   :  { %v2107_v48 = vpop.eup %2106 }
 0x647   :  { %v2109_v43 = vpop.eup %2108 }
 0x648   :  { %v1096_v58 = vpop.f32.mrb[32].mxu0  ;;  %v1119_v44 = vsub.f32 1.0, %v2109_v43  ;;  %v1121_v14 = vmul.f32 %v2109_v43, %v2800_v45  ;;  %v2981_v45 = vld [vmem:[%s3135_s4 + $0x8] sm:$0xff]  }
 0x649   :  { %v1097_v59 = vadd.f32 %v1096_v58, %v2457_v62  ;;  %v1907_v61 = vpop.f32.mrb[33].mxu0 }
 0x64a   :  { %v1099_v25 = vpop.f32.mrb[34].mxu0 }
 0x64b   :  { %v1116_v36 = vmul.f32 %v2107_v48, %v1097_v59  ;;  %v1908_v38 = vpop.f32.mrb[35].mxu0 }
 0x64d   :  { %v1117_v40 = vadd.f32 %v1529_v63, %v1116_v36 }
 0x64f   :  { %2110 = vtanh.f32 %v1117_v40 }
 0x659   :  { %v2111_v46 = vpop.eup %2110 }
 0x65a   :  { %v1120_v13 = vmul.f32 %v2111_v46, %v1119_v44 }
 0x65c   :  { %v2959_v16 = vadd.f32 %v1121_v14, %v1120_v13 }
 0x65e   :  { %v1123_v17 = vpack.c.bf16 %v2959_v16, %v2959_v16 }
 0x660   :  { %1926 = vmatmul.mubr.bf16.vlgmr.msra.gmra.mrb[32].mxu1 %v1123_v17  ;;  %1203 = vmatmul.mubr.bf16.vlgmr.msra.gmra.mrb[36].mxu0 %v1123_v17 }
 0x661   :  { %1930 = vmatpush3.bf16.msra.mxu1 %v2807_v37  ;;  %1945 = vmatprep.mubr.msk.bf16.mxu1 %vm2167_vm0, %v2165_v1 }
 0x662   :  { %1931 = vmatprep.subr.bf16.mxu1 %v2165_v1  ;;  %1950 = vmatpush3.bf16.msra.mxu0 %v2970_v47 }
 0x663   :  { %1951 = vmatprep.subr.bf16.mxu0 %v2165_v1  ;;  %1965 = vmatprep.mubr.msk.bf16.mxu0 %vm2167_vm0, %v2165_v1 }
 0x665   :  { %1932 = vmatpush3.bf16.msra.mxu1 %v2820_v0 }
 0x666   :  { %1933 = vmatprep.subr.bf16.mxu1 %v2165_v1  ;;  %1952 = vmatpush3.bf16.msra.mxu0 %v2981_v45 }
 0x667   :  { %1953 = vmatprep.subr.bf16.mxu0 %v2165_v1 }
 0x669   :  { %1934 = vmatpush3.bf16.msra.mxu1 %v2829_v28 }
 0x66a   :  { %1935 = vmatprep.subr.bf16.mxu1 %v2165_v1  ;;  %1954 = vmatpush3.bf16.msra.mxu0 %v2990_v19 }
 0x66b   :  { %1955 = vmatprep.subr.bf16.mxu0 %v2165_v1 }
 0x66d   :  { %1936 = vmatpush3.bf16.msra.mxu1 %v2838_v3 }
 0x66e   :  { %1937 = vmatprep.subr.bf16.mxu1 %v2165_v1  ;;  %1956 = vmatpush3.bf16.msra.mxu0 %v2999_v20 }
 0x66f   :  { %1957 = vmatprep.subr.bf16.mxu0 %v2165_v1 }
 0x671   :  { %1938 = vmatpush3.bf16.msra.mxu1 %v2847_v29 }
 0x672   :  { %1939 = vmatprep.subr.bf16.mxu1 %v2165_v1  ;;  %1958 = vmatpush3.bf16.msra.mxu0 %v3008_v22 }
 0x673   :  { %1959 = vmatprep.subr.bf16.mxu0 %v2165_v1 }
 0x675   :  { %1940 = vmatpush3.bf16.msra.mxu1 %v2856_v30 }
 0x676   :  { %1941 = vmatprep.subr.bf16.mxu1 %v2165_v1  ;;  %1960 = vmatpush3.bf16.msra.mxu0 %v3017_v7 }
 0x677   :  { %1961 = vmatprep.subr.bf16.mxu0 %v2165_v1 }
 0x679   :  { %1942 = vmatpush3.bf16.msra.mxu1 %v2865_v31 }
 0x67a   :  { %1943 = vmatprep.subr.bf16.mxu1 %v2165_v1  ;;  %1962 = vmatpush3.bf16.msra.mxu0 %v3026_v8 }
 0x67b   :  { %1963 = vmatprep.subr.bf16.mxu0 %v2165_v1 }
 0x67d   :  { %1944 = vmatpush3.bf16.msra.mxu1 %v2874_v32 }
 0x67e   :  { %1319 = vmatprep.subr.bf16.mxu1 %v2731_v9  ;;  %1964 = vmatpush3.bf16.msra.mxu0 %v3035_v60  ;;  %v1533_v9 = vld [vmem:[%s3137_s0 + $0x90] sm:$0xff] }
 0x67f   :  { %1969 = vmatprep.subr.bf16.mxu0 %v2165_v1 }
 0x680   :  { %1946 = vmatmul.mubr.bf16.vlgmr.msra.gmra.mrb[36].mxu1 %v1123_v17  ;;  %v1540_v17 = vld [vmem:[%s3137_s0 + $0xb0] sm:$0xff] }
 0x681   :  { %1320 = vmatpush1.bf16.msra.mxu1 %v2739_v12  ;;  %1351 = vmatprep.mubr.bf16.mxu1 %v2166_v2 }
 0x682   :  { %1321 = vmatprep.subr.bf16.mxu1 %v2746_v15 }
 0x685   :  { %1322 = vmatpush1.bf16.msra.mxu1 %v2752_v18 }
 0x686   :  { %1323 = vmatprep.subr.bf16.mxu1 %v2758_v21 }
 0x689   :  { %1324 = vmatpush1.bf16.msra.mxu1 %v2764_v24 }
 0x68a   :  { %1325 = vmatprep.subr.bf16.mxu1 %v2770_v26 }
 0x68d   :  { %1326 = vmatpush1.bf16.msra.mxu1 %v2890_v33 }
 0x68e   :  { %1327 = vmatprep.subr.bf16.mxu1 %v2896_v34 }
 0x691   :  { %1328 = vmatpush1.bf16.msra.mxu1 %v2902_v35 }
 0x692   :  { %1329 = vmatprep.subr.bf16.mxu1 %v2908_v4 }
 0x695   :  { %1330 = vmatpush1.bf16.msra.mxu1 %v2914_v5 }
 0x696   :  { %1331 = vmatprep.subr.bf16.mxu1 %v2920_v6 }
 0x699   :  { %1332 = vmatpush1.bf16.msra.mxu1 %v2926_v27 }
 0x69a   :  { %1333 = vmatprep.subr.bf16.mxu1 %v2932_v10 }
 0x69d   :  { %1334 = vmatpush1.bf16.msra.mxu1 %v2938_v11 }
 0x69e   :  { %1989 = vmatprep.subr.bf16.mxu1 %v2165_v1 }
 0x733   :  { %v1158_v2 = vpop.f32.mrb[32].mxu1  ;;  %v1204_v12 = vpop.f32.mrb[36].mxu0 }
 0x734   :  { %v1159_v15 = vadd.f32 %v2524_v23, %v1158_v2  ;;  %v1205_v18 = vadd.f32 %v1204_v12, %v2445_v41  ;;  %v1927_v21 = vpop.f32.mrb[33].mxu1  ;;  %v1206_v24 = vpop.f32.mrb[37].mxu0  ;;  %v1534_v23 = vld [vmem:[%s3137_s0 + $0x98] sm:$0xff] }
 0x735   :  { %v1161_v26 = vpop.f32.mrb[34].mxu1  ;;  %v1208_v33 = vpop.f32.mrb[38].mxu0  ;;  %v1207_v6 = vadd.f32 %v1206_v24, %v2447_v42 }
 0x736   :  { %1532 = vst [vmem:[%s3139_s6 + $0x28] sm:$0xff] %v1159_v15  ;;  %v1251_v34 = vadd.f32 %v1533_v9, %v1205_v18  ;;  %v1928_v35 = vpop.f32.mrb[35].mxu1  ;;  %v1209_v4 = vpop.f32.mrb[39].mxu0 }
 0x737   :  { %v1258_v27 = vadd.f32 %v1534_v23, %v1207_v6 }
 0x738   :  { %v1536_v5 = vmul.f32 -1.442695, %v1251_v34 }
 0x739   :  { %v1537_v10 = vmul.f32 -1.442695, %v1258_v27 }
 0x73a   :  { %2112 = vpow2.f32 %v1536_v5 }
 0x73b   :  { %2114 = vpow2.f32 %v1537_v10 }
 0x744   :  { %v2113_v11 = vpop.eup %2112 }
 0x745   :  { %v1255_v39 = vadd.f32 1.0, %v2113_v11  ;;  %v2115_v49 = vpop.eup %2114 }
 0x746   :  { %v1262_v50 = vadd.f32 1.0, %v2115_v49 }
 0x747   :  { %2116 = vrcp.f32 %v1255_v39 }
 0x748   :  { %2118 = vrcp.f32 %v1262_v50 }
 0x751   :  { %v2117_v54 = vpop.eup %2116 }
 0x752   :  { %v2119_v61 = vpop.eup %2118 }
 0x753   :  { %v1245_v51 = vpop.f32.mrb[36].mxu1  ;;  %v1268_v48 = vsub.f32 1.0, %v2119_v61  ;;  %v1270_v36 = vmul.f32 %v2119_v61, %v2959_v16 }
 0x754   :  { %v1246_v52 = vadd.f32 %v1245_v51, %v2457_v62  ;;  %v1947_v53 = vpop.f32.mrb[37].mxu1 }
 0x755   :  { %v1248_v56 = vpop.f32.mrb[38].mxu1 }
 0x756   :  { %v1265_v57 = vmul.f32 %v2117_v54, %v1246_v52  ;;  %v1948_v58 = vpop.f32.mrb[39].mxu1 }
 0x758   :  { %v1266_v59 = vadd.f32 %v1535_v55, %v1265_v57 }
 0x75a   :  { %2120 = vtanh.f32 %v1266_v59 }
 0x764   :  { %v2121_v63 = vpop.eup %2120 }
 0x765   :  { %v1269_v25 = vmul.f32 %v2121_v63, %v1268_v48 }
 0x767   :  { %v3073_v38 = vadd.f32 %v1270_v36, %v1269_v25 }
 0x769   :  { %v1272_v40 = vpack.c.bf16 %v3073_v38, %v3073_v38 }
 0x76b   :  { %1966 = vmatmul.mubr.bf16.vlgmr.msra.gmra.mrb[40].mxu0 %v1272_v40  ;;  %1352 = vmatmul.mubr.bf16.vlgmr.msra.gmra.mrb[40].mxu1 %v1272_v40 }
 0x76c   :  { %1970 = vmatpush3.bf16.msra.mxu0 %v2807_v37  ;;  %1985 = vmatprep.mubr.msk.bf16.mxu0 %vm2167_vm0, %v2165_v1 }
 0x76d   :  { %1971 = vmatprep.subr.bf16.mxu0 %v2165_v1  ;;  %1990 = vmatpush3.bf16.msra.mxu1 %v2970_v47 }
 0x76e   :  { %1991 = vmatprep.subr.bf16.mxu1 %v2165_v1  ;;  %2005 = vmatprep.mubr.msk.bf16.mxu1 %vm2167_vm0, %v2165_v1 }
 0x770   :  { %1972 = vmatpush3.bf16.msra.mxu0 %v2820_v0  ;;  %v1539_v0 = vld [vmem:[%s3137_s0 + $0xa8] sm:$0xff] }
 0x771   :  { %1973 = vmatprep.subr.bf16.mxu0 %v2165_v1  ;;  %1992 = vmatpush3.bf16.msra.mxu1 %v2981_v45 }
 0x772   :  { %1993 = vmatprep.subr.bf16.mxu1 %v2165_v1 }
 0x774   :  { %1974 = vmatpush3.bf16.msra.mxu0 %v2829_v28 }
 0x775   :  { %1975 = vmatprep.subr.bf16.mxu0 %v2165_v1  ;;  %1994 = vmatpush3.bf16.msra.mxu1 %v2990_v19 }
 0x776   :  { %1995 = vmatprep.subr.bf16.mxu1 %v2165_v1 }
 0x778   :  { %1976 = vmatpush3.bf16.msra.mxu0 %v2838_v3  ;;  %v2164_v3 = vld [vmem:[%s3138_s5] ss:$0 sm:$0xff] }
 0x779   :  { %1977 = vmatprep.subr.bf16.mxu0 %v2165_v1  ;;  %1996 = vmatpush3.bf16.msra.mxu1 %v2999_v20 }
 0x77a   :  { %1997 = vmatprep.subr.bf16.mxu1 %v2165_v1 }
 0x77c   :  { %1978 = vmatpush3.bf16.msra.mxu0 %v2847_v29 }
 0x77d   :  { %1979 = vmatprep.subr.bf16.mxu0 %v2165_v1  ;;  %1998 = vmatpush3.bf16.msra.mxu1 %v3008_v22 }
 0x77e   :  { %1999 = vmatprep.subr.bf16.mxu1 %v2165_v1 }
 0x780   :  { %1980 = vmatpush3.bf16.msra.mxu0 %v2856_v30 }
 0x781   :  { %1981 = vmatprep.subr.bf16.mxu0 %v2165_v1  ;;  %2000 = vmatpush3.bf16.msra.mxu1 %v3017_v7 }
 0x782   :  { %2001 = vmatprep.subr.bf16.mxu1 %v2165_v1 }
 0x784   :  { %1982 = vmatpush3.bf16.msra.mxu0 %v2865_v31 }
 0x785   :  { %1983 = vmatprep.subr.bf16.mxu0 %v2165_v1  ;;  %2002 = vmatpush3.bf16.msra.mxu1 %v3026_v8 }
 0x786   :  { %2003 = vmatprep.subr.bf16.mxu1 %v2165_v1 }
 0x788   :  { %1984 = vmatpush3.bf16.msra.mxu0 %v2874_v32 }
 0x789   :  { %2004 = vmatpush3.bf16.msra.mxu1 %v3035_v60 }
 0x78b   :  { %1986 = vmatmul.mubr.bf16.vlgmr.msra.gmra.mrb[44].mxu0 %v1272_v40 }
 0x83e   :  { %v1307_v37 = vpop.f32.mrb[40].mxu0  ;;  %v1353_v28 = vpop.f32.mrb[40].mxu1 }
 0x83f   :  { %v1308_v29 = vadd.f32 %v2164_v3, %v1307_v37  ;;  %v1354_v30 = vadd.f32 %v1353_v28, %v2445_v41  ;;  %v1967_v31 = vpop.f32.mrb[41].mxu0  ;;  %v1355_v1 = vpop.f32.mrb[41].mxu1 }
 0x840   :  { %v1310_v43 = vpop.f32.mrb[42].mxu0  ;;  %v1357_v32 = vpop.f32.mrb[42].mxu1  ;;  %v1356_v16 = vadd.f32 %v1355_v1, %v2447_v42  ;;  %v1541_v42 = vld [vmem:[%s3137_s0 + $0xb8] sm:$0xff] }
 0x841   :  { %1538 = vst [vmem:[%s3139_s6 + $0x30] sm:$0xff] %v1308_v29  ;;  %v1400_v44 = vadd.f32 %v1539_v0, %v1354_v30  ;;  %v1968_v46 = vpop.f32.mrb[43].mxu0  ;;  %v1358_v13 = vpop.f32.mrb[43].mxu1 }
 0x842   :  { %v1407_v41 = vadd.f32 %v1540_v17, %v1356_v16 }
 0x843   :  { %v1542_v14 = vmul.f32 -1.442695, %v1400_v44 }
 0x844   :  { %v1543_v47 = vmul.f32 -1.442695, %v1407_v41 }
 0x845   :  { %2122 = vpow2.f32 %v1542_v14 }
 0x846   :  { %2124 = vpow2.f32 %v1543_v47 }
 0x84f   :  { %v2123_v45 = vpop.eup %2122 }
 0x850   :  { %v1404_v19 = vadd.f32 1.0, %v2123_v45  ;;  %v2125_v20 = vpop.eup %2124 }
 0x851   :  { %v1411_v22 = vadd.f32 1.0, %v2125_v20 }
 0x852   :  { %2126 = vrcp.f32 %v1404_v19 }
 0x853   :  { %2128 = vrcp.f32 %v1411_v22 }
 0x85c   :  { %v2127_v2 = vpop.eup %2126 }
 0x85d   :  { %v2129_v21 = vpop.eup %2128 }
 0x85e   :  { %v1394_v7 = vpop.f32.mrb[44].mxu0  ;;  %v1417_v24 = vsub.f32 1.0, %v2129_v21  ;;  %v1419_v34 = vmul.f32 %v2129_v21, %v3073_v38 }
 0x85f   :  { %v1395_v8 = vadd.f32 %v1394_v7, %v2457_v62  ;;  %v1987_v60 = vpop.f32.mrb[45].mxu0 }
 0x860   :  { %v1397_v9 = vpop.f32.mrb[46].mxu0 }
 0x861   :  { %v1414_v12 = vmul.f32 %v2127_v2, %v1395_v8  ;;  %v1988_v15 = vpop.f32.mrb[47].mxu0 }
 0x863   :  { %v1415_v18 = vadd.f32 %v1541_v42, %v1414_v12 }
 0x865   :  { %2130 = vtanh.f32 %v1415_v18 }
 0x86f   :  { %v2131_v26 = vpop.eup %2130 }
 0x870   :  { %v1418_v33 = vmul.f32 %v2131_v26, %v1417_v24 }
 0x872   :  { %v1420_v35 = vadd.f32 %v1419_v34, %v1418_v33 }
 0x874   :  { %v1421_v62 = vpack.c.bf16 %v1420_v35, %v1420_v35 }
 0x876   :  { %2006 = vmatmul.mubr.bf16.vlgmr.msra.gmra.mrb[44].mxu1 %v1421_v62 }
 0x949   :  { %v1456_v4 = vpop.f32.mrb[44].mxu1 }
 0x94a   :  { %v1457_v5 = vadd.f32 %v2164_v3, %v1456_v4  ;;  %v2007_v6 = vpop.f32.mrb[45].mxu1 }
 0x94b   :  { %v1459_v23 = vpop.f32.mrb[46].mxu1 }
 0x94c   :  { %1544 = vst [vmem:[%s3139_s6 + $0x38] sm:$0xff] %v1457_v5  ;;  %v2008_v27 = vpop.f32.mrb[47].mxu1 }

</bundles_post_ra>
